<compile_context>
chip_gen: v7x
topology: tpu7x:2x2x1
jax: 0.10.0
libtpu: 0.0.40
codegen_flags: <defaults>
</compile_context>

<pallas_src>
import math
import functools

import jax
import jax.numpy as jnp
from jax.experimental import pallas as pl
from jax.experimental.pallas import tpu as pltpu


# ----------------------------------------------------------------------------
# tiling helpers / compiler params
# ----------------------------------------------------------------------------
def _pick_tile(dim, pref, granule):
    """Largest tile <= pref that divides `dim` and is a multiple of `granule`;
    falls back to the full dimension (always a legal block)."""
    t = pref
    while t >= granule:
        if dim % t == 0:
            return t
        t //= 2
    return dim


def _round_up(x, m):
    return ((x + m - 1) // m) * m


_VMEM_LIMIT = 48 * 1024 * 1024  # <= ~48 MiB keeps v7x (64 MiB VMEM) safe; fine on v5e/v6e


def _cparams(sem):
    return pltpu.CompilerParams(dimension_semantics=sem, vmem_limit_bytes=_VMEM_LIMIT)


# ----------------------------------------------------------------------------
# Pallas kernels / wrappers
# ----------------------------------------------------------------------------
def pallas_linear(x, w, b, residual=None, leaky=False, out_dtype=jnp.float32,
                  tm_pref=256, tn_pref=512, tk_pref=1024):
    """out = act(x @ w + b) [+ residual]

    x: (M, K) bf16 (producers emit bf16), w: (K, N) bf16, b: (N,) f32,
    residual: (M, N) f32 or None.  Tiled over (M, N, K) with a f32 VMEM accumulator.
    """
    if x.dtype != jnp.bfloat16:
        x = x.astype(jnp.bfloat16)  # wrapper-side cast: halves x DMA bytes per re-fetch
    M, K = x.shape
    N = w.shape[1]
    tm = _pick_tile(M, tm_pref, 16)
    tn = _pick_tile(N, tn_pref, 128)
    tk = _pick_tile(K, tk_pref, 128)
    gm, gn, gk = M // tm, N // tn, K // tk
    has_res = residual is not None

    def kernel(*refs):
        x_ref, w_ref, b_ref = refs[0], refs[1], refs[2]
        r_ref = refs[3] if has_res else None
        o_ref, acc_ref = refs[-2], refs[-1]

        @pl.when(pl.program_id(2) == 0)
        def _init():
            acc_ref[...] = jnp.zeros_like(acc_ref)

        acc_ref[...] += jnp.dot(x_ref[...], w_ref[...],
                                preferred_element_type=jnp.float32)

        @pl.when(pl.program_id(2) == pl.num_programs(2) - 1)
        def _finalize():
            y = acc_ref[...] + b_ref[...]
            if leaky:                       # F.leaky_relu, negative_slope=0.01
                y = jnp.where(y > 0, y, 0.01 * y)
            if has_res:
                y = y + r_ref[...].astype(jnp.float32)
            o_ref[...] = y.astype(o_ref.dtype)

    in_specs = [
        pl.BlockSpec((tm, tk), lambda i, j, k: (i, k)),
        pl.BlockSpec((tk, tn), lambda i, j, k: (k, j)),
        pl.BlockSpec((1, tn), lambda i, j, k: (0, j)),
    ]
    args = [x, w, b.reshape(1, N)]
    if has_res:
        in_specs.append(pl.BlockSpec((tm, tn), lambda i, j, k: (i, j)))
        args.append(residual)

    return pl.pallas_call(
        kernel,
        out_shape=jax.ShapeDtypeStruct((M, N), out_dtype),
        grid=(gm, gn, gk),
        in_specs=in_specs,
        out_specs=pl.BlockSpec((tm, tn), lambda i, j, k: (i, j)),
        scratch_shapes=[pltpu.VMEM((tm, tn), jnp.float32)],
        compiler_params=_cparams(("parallel", "parallel", "arbitrary")),
    )(*args)


def pallas_ln_linear(x, gamma, beta, w, b, leaky=False, out_dtype=jnp.bfloat16,
                     tm_pref=128, tn_pref=512):
    """out = act(LayerNorm(x) @ w + b).

    LN stats in f32 over the full feature axis (K kept whole).  The normalized,
    bf16-cast row tile is computed ONCE at j==0 into VMEM scratch and reused for
    every column tile (so mean/var/rsqrt are not redone gn times)."""
    M, K = x.shape
    N = w.shape[1]
    tm = _pick_tile(M, tm_pref, 16)
    tn = _pick_tile(N, tn_pref, 128)
    gm, gn = M // tm, N // tn

    def kernel(x_ref, g_ref, bl_ref, w_ref, b_ref, o_ref, xn_scr):
        @pl.when(pl.program_id(1) == 0)
        def _ln():
            xf = x_ref[...].astype(jnp.float32)
            mu = jnp.mean(xf, axis=-1, keepdims=True)
            var = jnp.mean((xf - mu) ** 2, axis=-1, keepdims=True)
            xn = (xf - mu) * jax.lax.rsqrt(var + 1e-5) * g_ref[...] + bl_ref[...]
            xn_scr[...] = xn.astype(jnp.bfloat16)

        y = jnp.dot(xn_scr[...], w_ref[...],
                    preferred_element_type=jnp.float32) + b_ref[...]
        if leaky:
            y = jnp.where(y > 0, y, 0.01 * y)
        o_ref[...] = y.astype(o_ref.dtype)

    return pl.pallas_call(
        kernel,
        out_shape=jax.ShapeDtypeStruct((M, N), out_dtype),
        grid=(gm, gn),
        in_specs=[
            pl.BlockSpec((tm, K), lambda i, j: (i, 0)),
            pl.BlockSpec((1, K), lambda i, j: (0, 0)),
            pl.BlockSpec((1, K), lambda i, j: (0, 0)),
            pl.BlockSpec((K, tn), lambda i, j: (0, j)),
            pl.BlockSpec((1, tn), lambda i, j: (0, j)),
        ],
        out_specs=pl.BlockSpec((tm, tn), lambda i, j: (i, j)),
        scratch_shapes=[pltpu.VMEM((tm, K), jnp.bfloat16)],
        # j must stay sequential on one core so the LN scratch (filled at j==0)
        # is valid for every column tile of a given row tile.
        compiler_params=_cparams(("parallel", "arbitrary")),
    )(x, gamma.reshape(1, K), beta.reshape(1, K), w, b.reshape(1, N))


def pallas_layernorm(x2d, gamma, beta, out_dtype=jnp.float32, tm_pref=256):
    """Row-tiled LayerNorm (PyTorch semantics, eps=1e-5, biased variance)."""
    M, E = x2d.shape
    tm = _pick_tile(M, tm_pref, 8)

    def kernel(x_ref, w_ref, b_ref, o_ref):
        x = x_ref[...].astype(jnp.float32)
        mu = jnp.mean(x, axis=-1, keepdims=True)
        var = jnp.mean((x - mu) ** 2, axis=-1, keepdims=True)
        o_ref[...] = ((x - mu) * jax.lax.rsqrt(var + 1e-5) * w_ref[...]
                      + b_ref[...]).astype(o_ref.dtype)

    return pl.pallas_call(
        kernel,
        out_shape=jax.ShapeDtypeStruct((M, E), out_dtype),
        grid=(M // tm,),
        in_specs=[
            pl.BlockSpec((tm, E), lambda i: (i, 0)),
            pl.BlockSpec((1, E), lambda i: (0, 0)),
            pl.BlockSpec((1, E), lambda i: (0, 0)),
        ],
        out_specs=pl.BlockSpec((tm, E), lambda i: (i, 0)),
        compiler_params=_cparams(("parallel",)),
    )(x2d, gamma.reshape(1, E), beta.reshape(1, E))


def _mha_kernel(q_ref, k_ref, v_ref, mask_ref, o_ref, m_scr, l_scr, acc_scr,
                *, H, dk, tq, tk, causal):
    """Flash-style attention step for one (batch, q-tile, k-tile) grid point.

    q_ref: (tq, H*dk) bf16, k_ref/v_ref: (tk, H*dk) bf16, mask_ref: (1, tk) f32
    additive key-padding mask.  1/sqrt(dk) is folded into the Q projection weights.
    """
    qi = pl.program_id(1)
    ki = pl.program_id(2)
    nk = pl.num_programs(2)

    @pl.when(ki == 0)
    def _init():
        m_scr[...] = jnp.full(m_scr.shape, -jnp.inf, jnp.float32)
        l_scr[...] = jnp.zeros(l_scr.shape, jnp.float32)
        acc_scr[...] = jnp.zeros(acc_scr.shape, jnp.float32)

    def _compute():
        bias = mask_ref[...].astype(jnp.float32)                        # (1, tk)
        if causal:
            q_pos = qi * tq + jax.lax.broadcasted_iota(jnp.int32, (tq, tk), 0)
            k_pos = ki * tk + jax.lax.broadcasted_iota(jnp.int32, (tq, tk), 1)
            bias = bias + jnp.where(k_pos > q_pos, -1e9, 0.0)           # (tq, tk)

        q = q_ref[...]                                                  # (tq, H*dk)
        k = k_ref[...]                                                  # (tk, H*dk)
        v = v_ref[...]

        for h in range(H):
            lo, hi = h * dk, (h + 1) * dk
            s = jax.lax.dot_general(q[:, lo:hi], k[:, lo:hi],
                                    (((1,), (1,)), ((), ())),
                                    preferred_element_type=jnp.float32)  # (tq, tk)
            s = s + bias
            m_prev = m_scr[h]                                            # (tq, 1)
            m_new = jnp.maximum(m_prev, jnp.max(s, axis=-1, keepdims=True))
            alpha = jnp.exp(m_prev - m_new)
            p = jnp.exp(s - m_new)
            l_scr[h] = alpha * l_scr[h] + jnp.sum(p, axis=-1, keepdims=True)
            acc_scr[h] = alpha * acc_scr[h] + jnp.dot(
                p.astype(jnp.bfloat16), v[:, lo:hi],
                preferred_element_type=jnp.float32)                      # (tq, dk)
            m_scr[h] = m_new

    if causal:
        # skip key tiles entirely above the diagonal (fully masked)
        @pl.when(ki * tk <= qi * tq + (tq - 1))
        def _():
            _compute()
    else:
        _compute()

    @pl.when(ki == nk - 1)
    def _finalize():
        for h in range(H):
            inv = pl.reciprocal(l_scr[h], approx=True)
            o_ref[:, h * dk:(h + 1) * dk] = (acc_scr[h] * inv).astype(o_ref.dtype)


def pallas_mha(q_src, kv_src, kmask_add, *, B, Tq, Tk, H, dk,
               q_col, k_col, v_col, causal, tq_pref=128, tk_pref=512):
    """Flash multi-head attention over lane-dense (B, T, H*dk) activations.

    q_src : (B*Tq, nq*Ep)  bf16 -- Q lives in column slab `q_col`
    kv_src: (B*Tk, nkv*Ep) bf16 -- K / V live in column slabs `k_col` / `v_col`
    kmask_add: (B, 1, Tk) f32 additive key-padding mask (0 or -1e9)
    Returns (B*Tq, Ep) bf16 already merged across heads (no XLA transposes).
    """
    Ep = H * dk
    q3 = q_src.reshape(B, Tq, -1)
    kv3 = kv_src.reshape(B, Tk, -1)
    if Ep % 128 == 0:
        # zero-copy: the BlockSpec column-block index selects the Q/K/V slab
        k3, v3 = kv3, kv3
    else:
        # toy-sized heads: slice slabs in XLA so each block's last dim equals the
        # full array dim (keeps the (8,128) block rule satisfied)
        q3 = q3[..., q_col * Ep:(q_col + 1) * Ep]
        k3 = kv3[..., k_col * Ep:(k_col + 1) * Ep]
        v3 = kv3[..., v_col * Ep:(v_col + 1) * Ep]
        q_col = k_col = v_col = 0

    tq = _pick_tile(Tq, tq_pref, 16)
    tk = _pick_tile(Tk, tk_pref, 128)       # >=256 preferred so p@V fills the MXU
    grid = (B, Tq // tq, Tk // tk)

    kernel = functools.partial(_mha_kernel, H=H, dk=dk, tq=tq, tk=tk, causal=causal)

    out = pl.pallas_call(
        kernel,
        out_shape=jax.ShapeDtypeStruct((B, Tq, Ep), jnp.bfloat16),
        grid=grid,
        in_specs=[
            pl.BlockSpec((None, tq, Ep), lambda b, i, j, qc=q_col: (b, i, qc)),
            pl.BlockSpec((None, tk, Ep), lambda b, i, j, kc=k_col: (b, j, kc)),
            pl.BlockSpec((None, tk, Ep), lambda b, i, j, vc=v_col: (b, j, vc)),
            pl.BlockSpec((None, 1, tk), lambda b, i, j: (b, 0, j)),
        ],
        out_specs=pl.BlockSpec((None, tq, Ep), lambda b, i, j: (b, i, 0)),
        scratch_shapes=[
            pltpu.VMEM((H, tq, 1), jnp.float32),    # running max
            pltpu.VMEM((H, tq, 1), jnp.float32),    # running denominator
            pltpu.VMEM((H, tq, dk), jnp.float32),   # output accumulator
        ],
        compiler_params=_cparams(("parallel", "parallel", "arbitrary")),
    )(q3, k3, v3, kmask_add)
    return out.reshape(B * Tq, Ep)


# ----------------------------------------------------------------------------
# model glue (XLA ops between Pallas kernels)
# ----------------------------------------------------------------------------
def _key_mask_add(mask, B, Tk):
    """(B,*,Tk)-ish padding mask -> (B,1,Tk) additive f32 mask (0 keep / -1e9 drop)."""
    m = jnp.broadcast_to(mask.reshape(B, 1, -1)[:, :, :Tk], (B, 1, Tk)).astype(jnp.float32)
    return jnp.where(m == 0, -1e9, 0.0).astype(jnp.float32)


def encoder_layer_forward(p, x2d, src_add, B, T, H, dk):
    # self-attention block: LN1 fused into the fused QKV projection
    qkv = pallas_ln_linear(x2d, p["ln1_w"], p["ln1_b"],
                           p["attn"]["wqkv"], p["attn"]["bqkv"])
    attn = pallas_mha(qkv, qkv, src_add, B=B, Tq=T, Tk=T, H=H, dk=dk,
                      q_col=0, k_col=1, v_col=2, causal=False)
    x2d = pallas_linear(attn, p["attn"]["wo"], p["attn"]["bo"], residual=x2d)
    # feed-forward block: LN2 + leaky_relu fused into linear-1, residual into linear-2
    h = pallas_ln_linear(x2d, p["ln2_w"], p["ln2_b"], p["ff_w1"], p["ff_b1"], leaky=True)
    x2d = pallas_linear(h, p["ff_w2"], p["ff_b2"], residual=x2d)
    return x2d


def decoder_layer_forward(p, y2d, trg_add, en2d_bf, src_add, B, Tt, Ts, H, dk):
    # masked self-attention (causal mask built in-kernel)
    qkv = pallas_ln_linear(y2d, p["ln1_w"], p["ln1_b"],
                           p["attn1"]["wqkv"], p["attn1"]["bqkv"])
    attn = pallas_mha(qkv, qkv, trg_add, B=B, Tq=Tt, Tk=Tt, H=H, dk=dk,
                      q_col=0, k_col=1, v_col=2, causal=True)
    y2d = pallas_linear(attn, p["attn1"]["wo"], p["attn1"]["bo"], residual=y2d)
    # cross-attention: Q from decoder stream (LN2 fused), fused K/V from encoder out
    qx = pallas_ln_linear(y2d, p["ln2_w"], p["ln2_b"],
                          p["attn2"]["wq"], p["attn2"]["bq"])
    kv = pallas_linear(en2d_bf, p["attn2"]["wkv"], p["attn2"]["bkv"],
                       out_dtype=jnp.bfloat16)
    attn = pallas_mha(qx, kv, src_add, B=B, Tq=Tt, Tk=Ts, H=H, dk=dk,
                      q_col=0, k_col=0, v_col=1, causal=False)
    y2d = pallas_linear(attn, p["attn2"]["wo"], p["attn2"]["bo"], residual=y2d)
    # feed-forward block
    h = pallas_ln_linear(y2d, p["ln3_w"], p["ln3_b"], p["ff_w1"], p["ff_b1"], leaky=True)
    y2d = pallas_linear(h, p["ff_w2"], p["ff_b2"], residual=y2d)
    return y2d


def transformer_forward(params, src_toks, trg_toks, src_mask, trg_mask, *,
                        heads, dim_k, vocab):
    B, Ts = src_toks.shape
    _, Tt = trg_toks.shape
    E = params["wte"].shape[1]
    H, dk = heads, dim_k

    # tiny additive key-padding masks; causal structure is generated in-kernel
    src_add = _key_mask_add(src_mask, B, Ts)
    # TODO(synk): assumes trg_mask == causal AND key-padding; padding recovered from last row.
    trg_add = _key_mask_add(trg_mask[:, -1, :], B, Tt)

    # ---- encoder ----
    x = jnp.take(params["wte"], src_toks, axis=0) + params["enc_wpe"][None, :Ts, :]
    x2d = x.reshape(B * Ts, E)
    for lp in params["enc_layers"]:
        x2d = encoder_layer_forward(lp, x2d, src_add, B, Ts, H, dk)
    en2d_bf = pallas_layernorm(x2d, params["enc_ln_w"], params["enc_ln_b"],
                               out_dtype=jnp.bfloat16)

    # ---- decoder ----
    y = jnp.take(params["wte"], trg_toks, axis=0) + params["dec_wpe"][None, :Tt, :]
    y2d = y.reshape(B * Tt, E)
    for lp in params["dec_layers"]:
        y2d = decoder_layer_forward(lp, y2d, trg_add, en2d_bf, src_add, B, Tt, Ts, H, dk)
    y2d_bf = pallas_layernorm(y2d, params["dec_ln_w"], params["dec_ln_b"],
                              out_dtype=jnp.bfloat16)

    # ---- output projection to (padded) vocab, then slice ----
    logits = pallas_linear(y2d_bf, params["out_w"], params["out_b"])
    return logits[:, :vocab].reshape(B, Tt, vocab)


# ----------------------------------------------------------------------------
# deterministic parameter init (shapes follow the PyTorch module's __init__)
# ----------------------------------------------------------------------------
def _lin(key, fan_in, fan_out):
    kw, kb = jax.random.split(key)
    w = jax.random.normal(kw, (fan_in, fan_out), jnp.float32) * 0.02
    b = jax.random.normal(kb, (fan_out,), jnp.float32) * 0.02
    return w, b


def _mha_self_params(key, emb_dim, Hk, qscale):
    ks = jax.random.split(key, 4)
    wq, bq = _lin(ks[0], emb_dim, Hk)
    wk, bk = _lin(ks[1], emb_dim, Hk)
    wv, bv = _lin(ks[2], emb_dim, Hk)
    wo, bo = _lin(ks[3], Hk, emb_dim)
    return {
        # Q/K/V fused along columns; 1/sqrt(dim_k) folded into the Q slice.
        "wqkv": jnp.concatenate([wq * qscale, wk, wv], axis=1).astype(jnp.bfloat16),
        "bqkv": jnp.concatenate([bq * qscale, bk, bv], axis=0),
        "wo": wo.astype(jnp.bfloat16), "bo": bo,
    }


def _mha_cross_params(key, emb_dim, Hk, qscale):
    ks = jax.random.split(key, 4)
    wq, bq = _lin(ks[0], emb_dim, Hk)
    wk, bk = _lin(ks[1], emb_dim, Hk)
    wv, bv = _lin(ks[2], emb_dim, Hk)
    wo, bo = _lin(ks[3], Hk, emb_dim)
    return {
        "wq": (wq * qscale).astype(jnp.bfloat16), "bq": bq * qscale,
        "wkv": jnp.concatenate([wk, wv], axis=1).astype(jnp.bfloat16),
        "bkv": jnp.concatenate([bk, bv], axis=0),
        "wo": wo.astype(jnp.bfloat16), "bo": bo,
    }


def init_params(key, vocab, emb_dim, n_layers, heads, ffwd_dim=2048, max_seq_len=200):
    dim_k = emb_dim // heads
    Hk = heads * dim_k
    qscale = 1.0 / math.sqrt(dim_k)
    k_wte, k_wpe_e, k_wpe_d, k_out, k_enc, k_dec = jax.random.split(key, 6)

    def ones(): return jnp.ones((emb_dim,), jnp.float32)
    def zeros(): return jnp.zeros((emb_dim,), jnp.float32)

    out_w, out_b = _lin(k_out, emb_dim, vocab)
    vocab_pad = _round_up(vocab, 256)        # keep the vocab matmul tileable
    out_w = jnp.pad(out_w, ((0, 0), (0, vocab_pad - vocab)))
    out_b = jnp.pad(out_b, (0, vocab_pad - vocab))

    params = {
        "wte": jax.random.normal(k_wte, (vocab, emb_dim), jnp.float32) * 0.02,
        "enc_wpe": jax.random.normal(k_wpe_e, (max_seq_len, emb_dim), jnp.float32) * 0.02,
        "dec_wpe": jax.random.normal(k_wpe_d, (max_seq_len, emb_dim), jnp.float32) * 0.02,
        "enc_ln_w": ones(), "enc_ln_b": zeros(),
        "dec_ln_w": ones(), "dec_ln_b": zeros(),
        "out_w": out_w.astype(jnp.bfloat16), "out_b": out_b,
        "enc_layers": [], "dec_layers": [],
    }

    for lk in jax.random.split(k_enc, n_layers):
        ka, kf1, kf2 = jax.random.split(lk, 3)
        ff_w1, ff_b1 = _lin(kf1, emb_dim, ffwd_dim)
        ff_w2, ff_b2 = _lin(kf2, ffwd_dim, emb_dim)
        params["enc_layers"].append({
            "ln1_w": ones(), "ln1_b": zeros(),
            "ln2_w": ones(), "ln2_b": zeros(),
            "attn": _mha_self_params(ka, emb_dim, Hk, qscale),
            "ff_w1": ff_w1.astype(jnp.bfloat16), "ff_b1": ff_b1,
            "ff_w2": ff_w2.astype(jnp.bfloat16), "ff_b2": ff_b2,
        })

    for lk in jax.random.split(k_dec, n_layers):
        ka1, ka2, kf1, kf2 = jax.random.split(lk, 4)
        ff_w1, ff_b1 = _lin(kf1, emb_dim, ffwd_dim)
        ff_w2, ff_b2 = _lin(kf2, ffwd_dim, emb_dim)
        params["dec_layers"].append({
            "ln1_w": ones(), "ln1_b": zeros(),
            "ln2_w": ones(), "ln2_b": zeros(),
            "ln3_w": ones(), "ln3_b": zeros(),
            "attn1": _mha_self_params(ka1, emb_dim, Hk, qscale),
            "attn2": _mha_cross_params(ka2, emb_dim, Hk, qscale),
            "ff_w1": ff_w1.astype(jnp.bfloat16), "ff_b1": ff_b1,
            "ff_w2": ff_w2.astype(jnp.bfloat16), "ff_b2": ff_b2,
        })
    return params


# ----------------------------------------------------------------------------
if __name__ == "__main__":
    B, T_SRC, T_TRG = 2, 8, 8
    EMB_DIM, HEADS, N_LAYERS = 32, 4, 2
    DIM_K = EMB_DIM // HEADS
    VOCAB = 50

    root = jax.random.PRNGKey(0)
    k_par, k_src, k_trg = jax.random.split(root, 3)

    params = init_params(k_par, VOCAB, EMB_DIM, N_LAYERS, HEADS)

    src_toks = jax.random.randint(k_src, (B, T_SRC), 0, VOCAB, dtype=jnp.int32)
    trg_toks = jax.random.randint(k_trg, (B, T_TRG), 0, VOCAB, dtype=jnp.int32)
    # encoder/source mask (B, 1, T_src) of ones; causal decoder mask (B, T_trg, T_trg)
    src_mask = jnp.ones((B, 1, T_SRC), jnp.float32)
    trg_mask = jnp.broadcast_to(
        jnp.tril(jnp.ones((T_TRG, T_TRG), jnp.float32))[None], (B, T_TRG, T_TRG))

    fwd = jax.jit(functools.partial(transformer_forward,
                                    heads=HEADS, dim_k=DIM_K, vocab=VOCAB))
    logits = jax.block_until_ready(fwd(params, src_toks, trg_toks, src_mask, trg_mask))

    assert logits.shape == (B, T_TRG, VOCAB), logits.shape
    assert jnp.all(jnp.isfinite(logits))
    print("KERNEL_OK")
</pallas_src>

<mosaic_0001>
module attributes {stable_mosaic.version = 11 : i64} {
  func.func @kernel(%arg0: i32, %arg1: i32, %arg2: memref<16x32xf32, #tpu.memory_space<vmem>>, %arg3: memref<1x32xf32, #tpu.memory_space<vmem>>, %arg4: memref<1x32xf32, #tpu.memory_space<vmem>>, %arg5: memref<32x96xbf16, #tpu.memory_space<vmem>>, %arg6: memref<1x96xf32, #tpu.memory_space<vmem>>, %arg7: memref<16x96xbf16, #tpu.memory_space<vmem>>, %arg8: memref<16x32xbf16, #tpu.memory_space<vmem>>) attributes {dimension_semantics = [#tpu.dimension_semantics<parallel>, #tpu.dimension_semantics<arbitrary>], iteration_bounds = array<i64: 1, 1>, scalar_prefetch = 0 : i64, scratch_operands = 1 : i64, tpu.core_type = #tpu.core_type<tc>, window_params = [{transform_indices = @transform_0, window_bounds = array<i64: 16, 32>}, {pipeline_mode = #tpu.pipeline_mode<synchronous>, transform_indices = @transform_1, window_bounds = array<i64: 1, 32>}, {pipeline_mode = #tpu.pipeline_mode<synchronous>, transform_indices = @transform_2, window_bounds = array<i64: 1, 32>}, {transform_indices = @transform_3, window_bounds = array<i64: 32, 96>}, {transform_indices = @transform_4, window_bounds = array<i64: 1, 96>}, {transform_indices = @transform_5, window_bounds = array<i64: 16, 96>}]} {
    %c0_i32 = arith.constant 0 : i32
    %0 = arith.cmpi eq, %arg1, %c0_i32 : i32
    %1 = arith.extui %0 : i1 to i32
    %c0_i32_0 = arith.constant 0 : i32
    %2 = arith.cmpi ne, %1, %c0_i32_0 : i32
    scf.if %2 {
      %c0_8 = arith.constant 0 : index
      %c0_9 = arith.constant 0 : index
      %11 = vector.load %arg2[%c0_8, %c0_9] : memref<16x32xf32, #tpu.memory_space<vmem>>, vector<16x32xf32>
      %cst_10 = arith.constant dense<0.000000e+00> : vector<16xf32>
      %12 = vector.multi_reduction <add>, %11, %cst_10 [1] : vector<16x32xf32> to vector<16xf32>
      %13 = vector.shape_cast %12 : vector<16xf32> to vector<16x1xf32>
      %cst_11 = arith.constant 3.200000e+01 : f32
      %14 = vector.broadcast %cst_11 : f32 to vector<16x1xf32>
      %15 = arith.divf %13, %14 : vector<16x1xf32>
      %16 = vector.broadcast %15 : vector<16x1xf32> to vector<16x32xf32>
      %17 = arith.subf %11, %16 : vector<16x32xf32>
      %18 = arith.mulf %17, %17 : vector<16x32xf32>
      %cst_12 = arith.constant dense<0.000000e+00> : vector<16xf32>
      %19 = vector.multi_reduction <add>, %18, %cst_12 [1] : vector<16x32xf32> to vector<16xf32>
      %20 = vector.shape_cast %19 : vector<16xf32> to vector<16x1xf32>
      %cst_13 = arith.constant 3.200000e+01 : f32
      %21 = vector.broadcast %cst_13 : f32 to vector<16x1xf32>
      %22 = arith.divf %20, %21 : vector<16x1xf32>
      %23 = vector.broadcast %15 : vector<16x1xf32> to vector<16x32xf32>
      %24 = arith.subf %11, %23 : vector<16x32xf32>
      %cst_14 = arith.constant 9.99999974E-6 : f32
      %25 = vector.broadcast %cst_14 : f32 to vector<16x1xf32>
      %26 = arith.addf %22, %25 : vector<16x1xf32>
      %27 = math.rsqrt %26 : vector<16x1xf32>
      %28 = vector.broadcast %27 : vector<16x1xf32> to vector<16x32xf32>
      %29 = arith.mulf %24, %28 : vector<16x32xf32>
      %c0_15 = arith.constant 0 : index
      %c0_16 = arith.constant 0 : index
      %30 = vector.load %arg3[%c0_15, %c0_16] : memref<1x32xf32, #tpu.memory_space<vmem>>, vector<1x32xf32>
      %31 = vector.broadcast %30 : vector<1x32xf32> to vector<16x32xf32>
      %32 = arith.mulf %29, %31 : vector<16x32xf32>
      %c0_17 = arith.constant 0 : index
      %c0_18 = arith.constant 0 : index
      %33 = vector.load %arg4[%c0_17, %c0_18] : memref<1x32xf32, #tpu.memory_space<vmem>>, vector<1x32xf32>
      %34 = vector.broadcast %33 : vector<1x32xf32> to vector<16x32xf32>
      %35 = arith.addf %32, %34 : vector<16x32xf32>
      %36 = arith.truncf %35 : vector<16x32xf32> to vector<16x32xbf16>
      %c0_19 = arith.constant 0 : index
      %c0_20 = arith.constant 0 : index
      %37 = vector.load %arg8[%c0_19, %c0_20] : memref<16x32xbf16, #tpu.memory_space<vmem>>, vector<16x32xbf16>
      tpu.vector_store %arg8[%c0_19, %c0_20], %36 {strides = array<i32>} : memref<16x32xbf16, #tpu.memory_space<vmem>>, vector<16x32xbf16>,
    } else {
    }
    %c0 = arith.constant 0 : index
    %c0_1 = arith.constant 0 : index
    %3 = vector.load %arg8[%c0, %c0_1] : memref<16x32xbf16, #tpu.memory_space<vmem>>, vector<16x32xbf16>
    %c0_2 = arith.constant 0 : index
    %c0_3 = arith.constant 0 : index
    %4 = vector.load %arg5[%c0_2, %c0_3] : memref<32x96xbf16, #tpu.memory_space<vmem>>, vector<32x96xbf16>
    %cst = arith.constant dense<0.000000e+00> : vector<16x96xf32>
    %5 = tpu.matmul %3, %4, %cst {dimension_numbers = #tpu.dot_dimension_numbers<[1], [0], [0], [1], [0, 0, 1, 1], [], []>} : vector<16x32xbf16>, vector<32x96xbf16>, vector<16x96xf32> -> vector<16x96xf32>
    %c0_4 = arith.constant 0 : index
    %c0_5 = arith.constant 0 : index
    %6 = vector.load %arg6[%c0_4, %c0_5] : memref<1x96xf32, #tpu.memory_space<vmem>>, vector<1x96xf32>
    %7 = vector.broadcast %6 : vector<1x96xf32> to vector<16x96xf32>
    %8 = arith.addf %5, %7 : vector<16x96xf32>
    %9 = arith.truncf %8 : vector<16x96xf32> to vector<16x96xbf16>
    %c0_6 = arith.constant 0 : index
    %c0_7 = arith.constant 0 : index
    %10 = vector.load %arg7[%c0_6, %c0_7] : memref<16x96xbf16, #tpu.memory_space<vmem>>, vector<16x96xbf16>
    tpu.vector_store %arg7[%c0_6, %c0_7], %9 {strides = array<i32>} : memref<16x96xbf16, #tpu.memory_space<vmem>>, vector<16x96xbf16>,
    return
  }
  func.func @transform_0(%arg0: i32, %arg1: i32) -> (i32, i32) {
    %c0_i32 = arith.constant 0 : i32
    %c0_i32_0 = arith.constant 0 : i32
    return %arg0, %c0_i32 : i32, i32
  }
  func.func @transform_1(%arg0: i32, %arg1: i32) -> (i32, i32) {
    %c0_i32 = arith.constant 0 : i32
    %c0_i32_0 = arith.constant 0 : i32
    %c0_i32_1 = arith.constant 0 : i32
    return %c0_i32, %c0_i32_0 : i32, i32
  }
  func.func @transform_2(%arg0: i32, %arg1: i32) -> (i32, i32) {
    %c0_i32 = arith.constant 0 : i32
    %c0_i32_0 = arith.constant 0 : i32
    %c0_i32_1 = arith.constant 0 : i32
    return %c0_i32, %c0_i32_0 : i32, i32
  }
  func.func @transform_3(%arg0: i32, %arg1: i32) -> (i32, i32) {
    %c0_i32 = arith.constant 0 : i32
    %c0_i32_0 = arith.constant 0 : i32
    return %c0_i32, %arg1 : i32, i32
  }
  func.func @transform_4(%arg0: i32, %arg1: i32) -> (i32, i32) {
    %c0_i32 = arith.constant 0 : i32
    %c0_i32_0 = arith.constant 0 : i32
    return %c0_i32, %arg1 : i32, i32
  }
  func.func @transform_5(%arg0: i32, %arg1: i32) -> (i32, i32) {
    %c0_i32 = arith.constant 0 : i32
    return %arg0, %arg1 : i32, i32
  }
}

module attributes {stable_mosaic.version = 11 : i64} {
  func.func @kernel(%arg0: i32, %arg1: i32, %arg2: memref<16x32xf32, #tpu.memory_space<vmem>>, %arg3: memref<1x32xf32, #tpu.memory_space<vmem>>, %arg4: memref<1x32xf32, #tpu.memory_space<vmem>>, %arg5: memref<32x32xbf16, #tpu.memory_space<vmem>>, %arg6: memref<1x32xf32, #tpu.memory_space<vmem>>, %arg7: memref<16x32xbf16, #tpu.memory_space<vmem>>, %arg8: memref<16x32xbf16, #tpu.memory_space<vmem>>) attributes {dimension_semantics = [#tpu.dimension_semantics<parallel>, #tpu.dimension_semantics<arbitrary>], iteration_bounds = array<i64: 1, 1>, scalar_prefetch = 0 : i64, scratch_operands = 1 : i64, tpu.core_type = #tpu.core_type<tc>, window_params = [{transform_indices = @transform_0, window_bounds = array<i64: 16, 32>}, {pipeline_mode = #tpu.pipeline_mode<synchronous>, transform_indices = @transform_1, window_bounds = array<i64: 1, 32>}, {pipeline_mode = #tpu.pipeline_mode<synchronous>, transform_indices = @transform_2, window_bounds = array<i64: 1, 32>}, {transform_indices = @transform_3, window_bounds = array<i64: 32, 32>}, {transform_indices = @transform_4, window_bounds = array<i64: 1, 32>}, {transform_indices = @transform_5, window_bounds = array<i64: 16, 32>}]} {
    %c0_i32 = arith.constant 0 : i32
    %0 = arith.cmpi eq, %arg1, %c0_i32 : i32
    %1 = arith.extui %0 : i1 to i32
    %c0_i32_0 = arith.constant 0 : i32
    %2 = arith.cmpi ne, %1, %c0_i32_0 : i32
    scf.if %2 {
      %c0_8 = arith.constant 0 : index
      %c0_9 = arith.constant 0 : index
      %11 = vector.load %arg2[%c0_8, %c0_9] : memref<16x32xf32, #tpu.memory_space<vmem>>, vector<16x32xf32>
      %cst_10 = arith.constant dense<0.000000e+00> : vector<16xf32>
      %12 = vector.multi_reduction <add>, %11, %cst_10 [1] : vector<16x32xf32> to vector<16xf32>
      %13 = vector.shape_cast %12 : vector<16xf32> to vector<16x1xf32>
      %cst_11 = arith.constant 3.200000e+01 : f32
      %14 = vector.broadcast %cst_11 : f32 to vector<16x1xf32>
      %15 = arith.divf %13, %14 : vector<16x1xf32>
      %16 = vector.broadcast %15 : vector<16x1xf32> to vector<16x32xf32>
      %17 = arith.subf %11, %16 : vector<16x32xf32>
      %18 = arith.mulf %17, %17 : vector<16x32xf32>
      %cst_12 = arith.constant dense<0.000000e+00> : vector<16xf32>
      %19 = vector.multi_reduction <add>, %18, %cst_12 [1] : vector<16x32xf32> to vector<16xf32>
      %20 = vector.shape_cast %19 : vector<16xf32> to vector<16x1xf32>
      %cst_13 = arith.constant 3.200000e+01 : f32
      %21 = vector.broadcast %cst_13 : f32 to vector<16x1xf32>
      %22 = arith.divf %20, %21 : vector<16x1xf32>
      %23 = vector.broadcast %15 : vector<16x1xf32> to vector<16x32xf32>
      %24 = arith.subf %11, %23 : vector<16x32xf32>
      %cst_14 = arith.constant 9.99999974E-6 : f32
      %25 = vector.broadcast %cst_14 : f32 to vector<16x1xf32>
      %26 = arith.addf %22, %25 : vector<16x1xf32>
      %27 = math.rsqrt %26 : vector<16x1xf32>
      %28 = vector.broadcast %27 : vector<16x1xf32> to vector<16x32xf32>
      %29 = arith.mulf %24, %28 : vector<16x32xf32>
      %c0_15 = arith.constant 0 : index
      %c0_16 = arith.constant 0 : index
      %30 = vector.load %arg3[%c0_15, %c0_16] : memref<1x32xf32, #tpu.memory_space<vmem>>, vector<1x32xf32>
      %31 = vector.broadcast %30 : vector<1x32xf32> to vector<16x32xf32>
      %32 = arith.mulf %29, %31 : vector<16x32xf32>
      %c0_17 = arith.constant 0 : index
      %c0_18 = arith.constant 0 : index
      %33 = vector.load %arg4[%c0_17, %c0_18] : memref<1x32xf32, #tpu.memory_space<vmem>>, vector<1x32xf32>
      %34 = vector.broadcast %33 : vector<1x32xf32> to vector<16x32xf32>
      %35 = arith.addf %32, %34 : vector<16x32xf32>
      %36 = arith.truncf %35 : vector<16x32xf32> to vector<16x32xbf16>
      %c0_19 = arith.constant 0 : index
      %c0_20 = arith.constant 0 : index
      %37 = vector.load %arg8[%c0_19, %c0_20] : memref<16x32xbf16, #tpu.memory_space<vmem>>, vector<16x32xbf16>
      tpu.vector_store %arg8[%c0_19, %c0_20], %36 {strides = array<i32>} : memref<16x32xbf16, #tpu.memory_space<vmem>>, vector<16x32xbf16>,
    } else {
    }
    %c0 = arith.constant 0 : index
    %c0_1 = arith.constant 0 : index
    %3 = vector.load %arg8[%c0, %c0_1] : memref<16x32xbf16, #tpu.memory_space<vmem>>, vector<16x32xbf16>
    %c0_2 = arith.constant 0 : index
    %c0_3 = arith.constant 0 : index
    %4 = vector.load %arg5[%c0_2, %c0_3] : memref<32x32xbf16, #tpu.memory_space<vmem>>, vector<32x32xbf16>
    %cst = arith.constant dense<0.000000e+00> : vector<16x32xf32>
    %5 = tpu.matmul %3, %4, %cst {dimension_numbers = #tpu.dot_dimension_numbers<[1], [0], [0], [1], [0, 0, 1, 1], [], []>} : vector<16x32xbf16>, vector<32x32xbf16>, vector<16x32xf32> -> vector<16x32xf32>
    %c0_4 = arith.constant 0 : index
    %c0_5 = arith.constant 0 : index
    %6 = vector.load %arg6[%c0_4, %c0_5] : memref<1x32xf32, #tpu.memory_space<vmem>>, vector<1x32xf32>
    %7 = vector.broadcast %6 : vector<1x32xf32> to vector<16x32xf32>
    %8 = arith.addf %5, %7 : vector<16x32xf32>
    %9 = arith.truncf %8 : vector<16x32xf32> to vector<16x32xbf16>
    %c0_6 = arith.constant 0 : index
    %c0_7 = arith.constant 0 : index
    %10 = vector.load %arg7[%c0_6, %c0_7] : memref<16x32xbf16, #tpu.memory_space<vmem>>, vector<16x32xbf16>
    tpu.vector_store %arg7[%c0_6, %c0_7], %9 {strides = array<i32>} : memref<16x32xbf16, #tpu.memory_space<vmem>>, vector<16x32xbf16>,
    return
  }
  func.func @transform_0(%arg0: i32, %arg1: i32) -> (i32, i32) {
    %c0_i32 = arith.constant 0 : i32
    %c0_i32_0 = arith.constant 0 : i32
    return %arg0, %c0_i32 : i32, i32
  }
  func.func @transform_1(%arg0: i32, %arg1: i32) -> (i32, i32) {
    %c0_i32 = arith.constant 0 : i32
    %c0_i32_0 = arith.constant 0 : i32
    %c0_i32_1 = arith.constant 0 : i32
    return %c0_i32, %c0_i32_0 : i32, i32
  }
  func.func @transform_2(%arg0: i32, %arg1: i32) -> (i32, i32) {
    %c0_i32 = arith.constant 0 : i32
    %c0_i32_0 = arith.constant 0 : i32
    %c0_i32_1 = arith.constant 0 : i32
    return %c0_i32, %c0_i32_0 : i32, i32
  }
  func.func @transform_3(%arg0: i32, %arg1: i32) -> (i32, i32) {
    %c0_i32 = arith.constant 0 : i32
    %c0_i32_0 = arith.constant 0 : i32
    return %c0_i32, %arg1 : i32, i32
  }
  func.func @transform_4(%arg0: i32, %arg1: i32) -> (i32, i32) {
    %c0_i32 = arith.constant 0 : i32
    %c0_i32_0 = arith.constant 0 : i32
    return %c0_i32, %arg1 : i32, i32
  }
  func.func @transform_5(%arg0: i32, %arg1: i32) -> (i32, i32) {
    %c0_i32 = arith.constant 0 : i32
    return %arg0, %arg1 : i32, i32
  }
}

module attributes {stable_mosaic.version = 11 : i64} {
  func.func @kernel(%arg0: i32, %arg1: i32, %arg2: i32, %arg3: memref<16x32xbf16, #tpu.memory_space<vmem>>, %arg4: memref<32x32xbf16, #tpu.memory_space<vmem>>, %arg5: memref<1x32xf32, #tpu.memory_space<vmem>>, %arg6: memref<16x32xf32, #tpu.memory_space<vmem>>, %arg7: memref<16x32xf32, #tpu.memory_space<vmem>>, %arg8: memref<16x32xf32, #tpu.memory_space<vmem>>) attributes {dimension_semantics = [#tpu.dimension_semantics<parallel>, #tpu.dimension_semantics<parallel>, #tpu.dimension_semantics<arbitrary>], iteration_bounds = array<i64: 1, 1, 1>, scalar_prefetch = 0 : i64, scratch_operands = 1 : i64, tpu.core_type = #tpu.core_type<tc>, window_params = [{transform_indices = @transform_0, window_bounds = array<i64: 16, 32>}, {transform_indices = @transform_1, window_bounds = array<i64: 32, 32>}, {transform_indices = @transform_2, window_bounds = array<i64: 1, 32>}, {transform_indices = @transform_3, window_bounds = array<i64: 16, 32>}, {transform_indices = @transform_4, window_bounds = array<i64: 16, 32>}]} {
    %c0_i32 = arith.constant 0 : i32
    %0 = arith.cmpi eq, %arg2, %c0_i32 : i32
    %1 = arith.extui %0 : i1 to i32
    %c0_i32_0 = arith.constant 0 : i32
    %2 = arith.cmpi ne, %1, %c0_i32_0 : i32
    scf.if %2 {
      %cst_10 = arith.constant 0.000000e+00 : f32
      %12 = vector.broadcast %cst_10 : f32 to vector<16x32xf32>
      %c0_11 = arith.constant 0 : index
      %c0_12 = arith.constant 0 : index
      %13 = vector.load %arg8[%c0_11, %c0_12] : memref<16x32xf32, #tpu.memory_space<vmem>>, vector<16x32xf32>
      tpu.vector_store %arg8[%c0_11, %c0_12], %12 {strides = array<i32>} : memref<16x32xf32, #tpu.memory_space<vmem>>, vector<16x32xf32>,
    } else {
    }
    %c0 = arith.constant 0 : index
    %c0_1 = arith.constant 0 : index
    %3 = vector.load %arg8[%c0, %c0_1] : memref<16x32xf32, #tpu.memory_space<vmem>>, vector<16x32xf32>
    %c0_2 = arith.constant 0 : index
    %c0_3 = arith.constant 0 : index
    %4 = vector.load %arg3[%c0_2, %c0_3] : memref<16x32xbf16, #tpu.memory_space<vmem>>, vector<16x32xbf16>
    %c0_4 = arith.constant 0 : index
    %c0_5 = arith.constant 0 : index
    %5 = vector.load %arg4[%c0_4, %c0_5] : memref<32x32xbf16, #tpu.memory_space<vmem>>, vector<32x32xbf16>
    %cst = arith.constant dense<0.000000e+00> : vector<16x32xf32>
    %6 = tpu.matmul %4, %5, %cst {dimension_numbers = #tpu.dot_dimension_numbers<[1], [0], [0], [1], [0, 0, 1, 1], [], []>} : vector<16x32xbf16>, vector<32x32xbf16>, vector<16x32xf32> -> vector<16x32xf32>
    %7 = arith.addf %3, %6 : vector<16x32xf32>
    %c0_6 = arith.constant 0 : index
    %c0_7 = arith.constant 0 : index
    %8 = vector.load %arg8[%c0_6, %c0_7] : memref<16x32xf32, #tpu.memory_space<vmem>>, vector<16x32xf32>
    tpu.vector_store %arg8[%c0_6, %c0_7], %7 {strides = array<i32>} : memref<16x32xf32, #tpu.memory_space<vmem>>, vector<16x32xf32>,
    %c0_i32_8 = arith.constant 0 : i32
    %9 = arith.cmpi eq, %arg2, %c0_i32_8 : i32
    %10 = arith.extui %9 : i1 to i32
    %c0_i32_9 = arith.constant 0 : i32
    %11 = arith.cmpi ne, %10, %c0_i32_9 : i32
    scf.if %11 {
      %c0_10 = arith.constant 0 : index
      %c0_11 = arith.constant 0 : index
      %12 = vector.load %arg8[%c0_10, %c0_11] : memref<16x32xf32, #tpu.memory_space<vmem>>, vector<16x32xf32>
      %c0_12 = arith.constant 0 : index
      %c0_13 = arith.constant 0 : index
      %13 = vector.load %arg5[%c0_12, %c0_13] : memref<1x32xf32, #tpu.memory_space<vmem>>, vector<1x32xf32>
      %14 = vector.broadcast %13 : vector<1x32xf32> to vector<16x32xf32>
      %15 = arith.addf %12, %14 : vector<16x32xf32>
      %c0_14 = arith.constant 0 : index
      %c0_15 = arith.constant 0 : index
      %16 = vector.load %arg6[%c0_14, %c0_15] : memref<16x32xf32, #tpu.memory_space<vmem>>, vector<16x32xf32>
      %17 = arith.addf %15, %16 : vector<16x32xf32>
      %c0_16 = arith.constant 0 : index
      %c0_17 = arith.constant 0 : index
      %18 = vector.load %arg7[%c0_16, %c0_17] : memref<16x32xf32, #tpu.memory_space<vmem>>, vector<16x32xf32>
      tpu.vector_store %arg7[%c0_16, %c0_17], %17 {strides = array<i32>} : memref<16x32xf32, #tpu.memory_space<vmem>>, vector<16x32xf32>,
    } else {
    }
    return
  }
  func.func @transform_0(%arg0: i32, %arg1: i32, %arg2: i32) -> (i32, i32) {
    %c0_i32 = arith.constant 0 : i32
    return %arg0, %arg2 : i32, i32
  }
  func.func @transform_1(%arg0: i32, %arg1: i32, %arg2: i32) -> (i32, i32) {
    %c0_i32 = arith.constant 0 : i32
    return %arg2, %arg1 : i32, i32
  }
  func.func @transform_2(%arg0: i32, %arg1: i32, %arg2: i32) -> (i32, i32) {
    %c0_i32 = arith.constant 0 : i32
    %c0_i32_0 = arith.constant 0 : i32
    return %c0_i32, %arg1 : i32, i32
  }
  func.func @transform_3(%arg0: i32, %arg1: i32, %arg2: i32) -> (i32, i32) {
    %c0_i32 = arith.constant 0 : i32
    return %arg0, %arg1 : i32, i32
  }
  func.func @transform_4(%arg0: i32, %arg1: i32, %arg2: i32) -> (i32, i32) {
    %c0_i32 = arith.constant 0 : i32
    return %arg0, %arg1 : i32, i32
  }
}

module attributes {stable_mosaic.version = 11 : i64} {
  func.func @_mha_kernel(%arg0: i32, %arg1: i32, %arg2: i32, %arg3: memref<1x8x32xbf16, #tpu.memory_space<vmem>>, %arg4: memref<1x8x32xbf16, #tpu.memory_space<vmem>>, %arg5: memref<1x8x32xbf16, #tpu.memory_space<vmem>>, %arg6: memref<1x1x8xf32, #tpu.memory_space<vmem>>, %arg7: memref<1x8x32xbf16, #tpu.memory_space<vmem>>, %arg8: memref<4x8x1xf32, #tpu.memory_space<vmem>>, %arg9: memref<4x8x1xf32, #tpu.memory_space<vmem>>, %arg10: memref<4x8x8xf32, #tpu.memory_space<vmem>>) attributes {dimension_semantics = [#tpu.dimension_semantics<parallel>, #tpu.dimension_semantics<parallel>, #tpu.dimension_semantics<arbitrary>], iteration_bounds = array<i64: 2, 1, 1>, scalar_prefetch = 0 : i64, scratch_operands = 3 : i64, tpu.core_type = #tpu.core_type<tc>, window_params = [{transform_indices = @transform_0, window_bounds = array<i64: 1, 8, 32>}, {transform_indices = @transform_1, window_bounds = array<i64: 1, 8, 32>}, {transform_indices = @transform_2, window_bounds = array<i64: 1, 8, 32>}, {transform_indices = @transform_3, window_bounds = array<i64: 1, 1, 8>}, {transform_indices = @transform_4, window_bounds = array<i64: 1, 8, 32>}]} {
    %c0_i32 = arith.constant 0 : i32
    %0 = arith.cmpi eq, %arg2, %c0_i32 : i32
    %1 = arith.extui %0 : i1 to i32
    %c0_i32_0 = arith.constant 0 : i32
    %2 = arith.cmpi ne, %1, %c0_i32_0 : i32
    scf.if %2 {
      %cst = arith.constant 0xFF800000 : f32
      %12 = vector.broadcast %cst : f32 to vector<4x8x1xf32>
      %c0 = arith.constant 0 : index
      %c0_5 = arith.constant 0 : index
      %c0_6 = arith.constant 0 : index
      %13 = vector.load %arg8[%c0, %c0_5, %c0_6] : memref<4x8x1xf32, #tpu.memory_space<vmem>>, vector<4x8x1xf32>
      tpu.vector_store %arg8[%c0, %c0_5, %c0_6], %12 {strides = array<i32>} : memref<4x8x1xf32, #tpu.memory_space<vmem>>, vector<4x8x1xf32>,
      %cst_7 = arith.constant 0.000000e+00 : f32
      %14 = vector.broadcast %cst_7 : f32 to vector<4x8x1xf32>
      %c0_8 = arith.constant 0 : index
      %c0_9 = arith.constant 0 : index
      %c0_10 = arith.constant 0 : index
      %15 = vector.load %arg9[%c0_8, %c0_9, %c0_10] : memref<4x8x1xf32, #tpu.memory_space<vmem>>, vector<4x8x1xf32>
      tpu.vector_store %arg9[%c0_8, %c0_9, %c0_10], %14 {strides = array<i32>} : memref<4x8x1xf32, #tpu.memory_space<vmem>>, vector<4x8x1xf32>,
      %cst_11 = arith.constant 0.000000e+00 : f32
      %16 = vector.broadcast %cst_11 : f32 to vector<4x8x8xf32>
      %c0_12 = arith.constant 0 : index
      %c0_13 = arith.constant 0 : index
      %c0_14 = arith.constant 0 : index
      %17 = vector.load %arg10[%c0_12, %c0_13, %c0_14] : memref<4x8x8xf32, #tpu.memory_space<vmem>>, vector<4x8x8xf32>
      tpu.vector_store %arg10[%c0_12, %c0_13, %c0_14], %16 {strides = array<i32>} : memref<4x8x8xf32, #tpu.memory_space<vmem>>, vector<4x8x8xf32>,
    } else {
    }
    %c8_i32 = arith.constant 8 : i32
    %3 = arith.muli %arg2, %c8_i32 : i32
    %c8_i32_1 = arith.constant 8 : i32
    %4 = arith.muli %arg1, %c8_i32_1 : i32
    %c7_i32 = arith.constant 7 : i32
    %5 = arith.addi %4, %c7_i32 : i32
    %6 = arith.cmpi sle, %3, %5 : i32
    %7 = arith.extui %6 : i1 to i32
    %c0_i32_2 = arith.constant 0 : i32
    %8 = arith.cmpi ne, %7, %c0_i32_2 : i32
    scf.if %8 {
      %c0 = arith.constant 0 : index
      %c0_5 = arith.constant 0 : index
      %c0_6 = arith.constant 0 : index
      %12 = vector.load %arg6[%c0, %c0_5, %c0_6] : memref<1x1x8xf32, #tpu.memory_space<vmem>>, vector<1x1x8xf32>
      %13 = vector.shape_cast %12 : vector<1x1x8xf32> to vector<1x8xf32>
      %c8_i32_7 = arith.constant 8 : i32
      %14 = arith.muli %arg1, %c8_i32_7 : i32
      %15 = tpu.iota {dimensions = array<i32: 0>} : vector<8x8xi32>
      %16 = vector.broadcast %14 : i32 to vector<8x8xi32>
      %17 = arith.addi %16, %15 : vector<8x8xi32>
      %c8_i32_8 = arith.constant 8 : i32
      %18 = arith.muli %arg2, %c8_i32_8 : i32
      %19 = tpu.iota {dimensions = array<i32: 1>} : vector<8x8xi32>
      %20 = vector.broadcast %18 : i32 to vector<8x8xi32>
      %21 = arith.addi %20, %19 : vector<8x8xi32>
      %22 = arith.cmpi sgt, %21, %17 : vector<8x8xi32>
      %cst = arith.constant -1.000000e+09 : f32
      %cst_9 = arith.constant 0.000000e+00 : f32
      %23 = vector.broadcast %cst : f32 to vector<8x8xf32>
      %24 = vector.broadcast %cst_9 : f32 to vector<8x8xf32>
      %25 = arith.select %22, %23, %24 : vector<8x8xi1>, vector<8x8xf32>
      %26 = vector.broadcast %13 : vector<1x8xf32> to vector<8x8xf32>
      %27 = arith.addf %26, %25 : vector<8x8xf32>
      %c0_10 = arith.constant 0 : index
      %c0_11 = arith.constant 0 : index
      %c0_12 = arith.constant 0 : index
      %28 = vector.load %arg3[%c0_10, %c0_11, %c0_12] : memref<1x8x32xbf16, #tpu.memory_space<vmem>>, vector<1x8x32xbf16>
      %29 = vector.shape_cast %28 : vector<1x8x32xbf16> to vector<8x32xbf16>
      %c0_13 = arith.constant 0 : index
      %c0_14 = arith.constant 0 : index
      %c0_15 = arith.constant 0 : index
      %30 = vector.load %arg4[%c0_13, %c0_14, %c0_15] : memref<1x8x32xbf16, #tpu.memory_space<vmem>>, vector<1x8x32xbf16>
      %31 = vector.shape_cast %30 : vector<1x8x32xbf16> to vector<8x32xbf16>
      %c0_16 = arith.constant 0 : index
      %c0_17 = arith.constant 0 : index
      %c0_18 = arith.constant 0 : index
      %32 = vector.load %arg5[%c0_16, %c0_17, %c0_18] : memref<1x8x32xbf16, #tpu.memory_space<vmem>>, vector<1x8x32xbf16>
      %33 = vector.shape_cast %32 : vector<1x8x32xbf16> to vector<8x32xbf16>
      %34 = vector.extract_strided_slice %29 {offsets = [0, 0], sizes = [8, 8], strides = [1, 1]} : vector<8x32xbf16> to vector<8x8xbf16>
      %35 = vector.extract_strided_slice %31 {offsets = [0, 0], sizes = [8, 8], strides = [1, 1]} : vector<8x32xbf16> to vector<8x8xbf16>
      %cst_19 = arith.constant dense<0.000000e+00> : vector<8x8xf32>
      %36 = tpu.matmul %34, %35, %cst_19 {dimension_numbers = #tpu.dot_dimension_numbers<[1], [1], [0], [0], [0, 0, 1, 0], [], []>} : vector<8x8xbf16>, vector<8x8xbf16>, vector<8x8xf32> -> vector<8x8xf32>
      %37 = arith.addf %36, %27 : vector<8x8xf32>
      %c0_20 = arith.constant 0 : index
      %c0_21 = arith.constant 0 : index
      %c0_22 = arith.constant 0 : index
      %38 = vector.load %arg8[%c0_20, %c0_21, %c0_22] : memref<4x8x1xf32, #tpu.memory_space<vmem>>, vector<1x8x1xf32>
      %39 = vector.shape_cast %38 : vector<1x8x1xf32> to vector<8x1xf32>
      %cst_23 = arith.constant dense<0xFF800000> : vector<8xf32>
      %40 = vector.multi_reduction <maximumf>, %37, %cst_23 [1] : vector<8x8xf32> to vector<8xf32>
      %41 = vector.shape_cast %40 : vector<8xf32> to vector<8x1xf32>
      %42 = arith.maximumf %39, %41 : vector<8x1xf32>
      %43 = arith.subf %39, %42 : vector<8x1xf32>
      %44 = math.exp %43 : vector<8x1xf32>
      %45 = vector.broadcast %42 : vector<8x1xf32> to vector<8x8xf32>
      %46 = arith.subf %37, %45 : vector<8x8xf32>
      %47 = math.exp %46 : vector<8x8xf32>
      %c0_24 = arith.constant 0 : index
      %c0_25 = arith.constant 0 : index
      %c0_26 = arith.constant 0 : index
      %48 = vector.load %arg9[%c0_24, %c0_25, %c0_26] : memref<4x8x1xf32, #tpu.memory_space<vmem>>, vector<1x8x1xf32>
      %49 = vector.shape_cast %48 : vector<1x8x1xf32> to vector<8x1xf32>
      %50 = arith.mulf %44, %49 : vector<8x1xf32>
      %cst_27 = arith.constant dense<0.000000e+00> : vector<8xf32>
      %51 = vector.multi_reduction <add>, %47, %cst_27 [1] : vector<8x8xf32> to vector<8xf32>
      %52 = vector.shape_cast %51 : vector<8xf32> to vector<8x1xf32>
      %53 = arith.addf %50, %52 : vector<8x1xf32>
      %c0_28 = arith.constant 0 : index
      %c0_29 = arith.constant 0 : index
      %c0_30 = arith.constant 0 : index
      %54 = vector.load %arg9[%c0_28, %c0_29, %c0_30] : memref<4x8x1xf32, #tpu.memory_space<vmem>>, vector<1x8x1xf32>
      %55 = vector.shape_cast %54 : vector<1x8x1xf32> to vector<8x1xf32>
      %56 = vector.shape_cast %53 : vector<8x1xf32> to vector<1x8x1xf32>
      tpu.vector_store %arg9[%c0_28, %c0_29, %c0_30], %56 {strides = array<i32>} : memref<4x8x1xf32, #tpu.memory_space<vmem>>, vector<1x8x1xf32>,
      %c0_31 = arith.constant 0 : index
      %c0_32 = arith.constant 0 : index
      %c0_33 = arith.constant 0 : index
      %57 = vector.load %arg10[%c0_31, %c0_32, %c0_33] : memref<4x8x8xf32, #tpu.memory_space<vmem>>, vector<1x8x8xf32>
      %58 = vector.shape_cast %57 : vector<1x8x8xf32> to vector<8x8xf32>
      %59 = vector.broadcast %44 : vector<8x1xf32> to vector<8x8xf32>
      %60 = arith.mulf %59, %58 : vector<8x8xf32>
      %61 = arith.truncf %47 : vector<8x8xf32> to vector<8x8xbf16>
      %62 = vector.extract_strided_slice %33 {offsets = [0, 0], sizes = [8, 8], strides = [1, 1]} : vector<8x32xbf16> to vector<8x8xbf16>
      %cst_34 = arith.constant dense<0.000000e+00> : vector<8x8xf32>
      %63 = tpu.matmul %61, %62, %cst_34 {dimension_numbers = #tpu.dot_dimension_numbers<[1], [0], [0], [1], [0, 0, 1, 1], [], []>} : vector<8x8xbf16>, vector<8x8xbf16>, vector<8x8xf32> -> vector<8x8xf32>
      %64 = arith.addf %60, %63 : vector<8x8xf32>
      %c0_35 = arith.constant 0 : index
      %c0_36 = arith.constant 0 : index
      %c0_37 = arith.constant 0 : index
      %65 = vector.load %arg10[%c0_35, %c0_36, %c0_37] : memref<4x8x8xf32, #tpu.memory_space<vmem>>, vector<1x8x8xf32>
      %66 = vector.shape_cast %65 : vector<1x8x8xf32> to vector<8x8xf32>
      %67 = vector.shape_cast %64 : vector<8x8xf32> to vector<1x8x8xf32>
      tpu.vector_store %arg10[%c0_35, %c0_36, %c0_37], %67 {strides = array<i32>} : memref<4x8x8xf32, #tpu.memory_space<vmem>>, vector<1x8x8xf32>,
      %c0_38 = arith.constant 0 : index
      %c0_39 = arith.constant 0 : index
      %c0_40 = arith.constant 0 : index
      %68 = vector.load %arg8[%c0_38, %c0_39, %c0_40] : memref<4x8x1xf32, #tpu.memory_space<vmem>>, vector<1x8x1xf32>
      %69 = vector.shape_cast %68 : vector<1x8x1xf32> to vector<8x1xf32>
      %70 = vector.shape_cast %42 : vector<8x1xf32> to vector<1x8x1xf32>
      tpu.vector_store %arg8[%c0_38, %c0_39, %c0_40], %70 {strides = array<i32>} : memref<4x8x1xf32, #tpu.memory_space<vmem>>, vector<1x8x1xf32>,
      %71 = vector.extract_strided_slice %29 {offsets = [0, 8], sizes = [8, 8], strides = [1, 1]} : vector<8x32xbf16> to vector<8x8xbf16>
      %72 = vector.extract_strided_slice %31 {offsets = [0, 8], sizes = [8, 8], strides = [1, 1]} : vector<8x32xbf16> to vector<8x8xbf16>
      %cst_41 = arith.constant dense<0.000000e+00> : vector<8x8xf32>
      %73 = tpu.matmul %71, %72, %cst_41 {dimension_numbers = #tpu.dot_dimension_numbers<[1], [1], [0], [0], [0, 0, 1, 0], [], []>} : vector<8x8xbf16>, vector<8x8xbf16>, vector<8x8xf32> -> vector<8x8xf32>
      %74 = arith.addf %73, %27 : vector<8x8xf32>
      %c1 = arith.constant 1 : index
      %c0_42 = arith.constant 0 : index
      %c0_43 = arith.constant 0 : index
      %75 = vector.load %arg8[%c1, %c0_42, %c0_43] : memref<4x8x1xf32, #tpu.memory_space<vmem>>, vector<1x8x1xf32>
      %76 = vector.shape_cast %75 : vector<1x8x1xf32> to vector<8x1xf32>
      %cst_44 = arith.constant dense<0xFF800000> : vector<8xf32>
      %77 = vector.multi_reduction <maximumf>, %74, %cst_44 [1] : vector<8x8xf32> to vector<8xf32>
      %78 = vector.shape_cast %77 : vector<8xf32> to vector<8x1xf32>
      %79 = arith.maximumf %76, %78 : vector<8x1xf32>
      %80 = arith.subf %76, %79 : vector<8x1xf32>
      %81 = math.exp %80 : vector<8x1xf32>
      %82 = vector.broadcast %79 : vector<8x1xf32> to vector<8x8xf32>
      %83 = arith.subf %74, %82 : vector<8x8xf32>
      %84 = math.exp %83 : vector<8x8xf32>
      %c1_45 = arith.constant 1 : index
      %c0_46 = arith.constant 0 : index
      %c0_47 = arith.constant 0 : index
      %85 = vector.load %arg9[%c1_45, %c0_46, %c0_47] : memref<4x8x1xf32, #tpu.memory_space<vmem>>, vector<1x8x1xf32>
      %86 = vector.shape_cast %85 : vector<1x8x1xf32> to vector<8x1xf32>
      %87 = arith.mulf %81, %86 : vector<8x1xf32>
      %cst_48 = arith.constant dense<0.000000e+00> : vector<8xf32>
      %88 = vector.multi_reduction <add>, %84, %cst_48 [1] : vector<8x8xf32> to vector<8xf32>
      %89 = vector.shape_cast %88 : vector<8xf32> to vector<8x1xf32>
      %90 = arith.addf %87, %89 : vector<8x1xf32>
      %c1_49 = arith.constant 1 : index
      %c0_50 = arith.constant 0 : index
      %c0_51 = arith.constant 0 : index
      %91 = vector.load %arg9[%c1_49, %c0_50, %c0_51] : memref<4x8x1xf32, #tpu.memory_space<vmem>>, vector<1x8x1xf32>
      %92 = vector.shape_cast %91 : vector<1x8x1xf32> to vector<8x1xf32>
      %93 = vector.shape_cast %90 : vector<8x1xf32> to vector<1x8x1xf32>
      tpu.vector_store %arg9[%c1_49, %c0_50, %c0_51], %93 {strides = array<i32>} : memref<4x8x1xf32, #tpu.memory_space<vmem>>, vector<1x8x1xf32>,
      %c1_52 = arith.constant 1 : index
      %c0_53 = arith.constant 0 : index
      %c0_54 = arith.constant 0 : index
      %94 = vector.load %arg10[%c1_52, %c0_53, %c0_54] : memref<4x8x8xf32, #tpu.memory_space<vmem>>, vector<1x8x8xf32>
      %95 = vector.shape_cast %94 : vector<1x8x8xf32> to vector<8x8xf32>
      %96 = vector.broadcast %81 : vector<8x1xf32> to vector<8x8xf32>
      %97 = arith.mulf %96, %95 : vector<8x8xf32>
      %98 = arith.truncf %84 : vector<8x8xf32> to vector<8x8xbf16>
      %99 = vector.extract_strided_slice %33 {offsets = [0, 8], sizes = [8, 8], strides = [1, 1]} : vector<8x32xbf16> to vector<8x8xbf16>
      %cst_55 = arith.constant dense<0.000000e+00> : vector<8x8xf32>
      %100 = tpu.matmul %98, %99, %cst_55 {dimension_numbers = #tpu.dot_dimension_numbers<[1], [0], [0], [1], [0, 0, 1, 1], [], []>} : vector<8x8xbf16>, vector<8x8xbf16>, vector<8x8xf32> -> vector<8x8xf32>
      %101 = arith.addf %97, %100 : vector<8x8xf32>
      %c1_56 = arith.constant 1 : index
      %c0_57 = arith.constant 0 : index
      %c0_58 = arith.constant 0 : index
      %102 = vector.load %arg10[%c1_56, %c0_57, %c0_58] : memref<4x8x8xf32, #tpu.memory_space<vmem>>, vector<1x8x8xf32>
      %103 = vector.shape_cast %102 : vector<1x8x8xf32> to vector<8x8xf32>
      %104 = vector.shape_cast %101 : vector<8x8xf32> to vector<1x8x8xf32>
      tpu.vector_store %arg10[%c1_56, %c0_57, %c0_58], %104 {strides = array<i32>} : memref<4x8x8xf32, #tpu.memory_space<vmem>>, vector<1x8x8xf32>,
      %c1_59 = arith.constant 1 : index
      %c0_60 = arith.constant 0 : index
      %c0_61 = arith.constant 0 : index
      %105 = vector.load %arg8[%c1_59, %c0_60, %c0_61] : memref<4x8x1xf32, #tpu.memory_space<vmem>>, vector<1x8x1xf32>
      %106 = vector.shape_cast %105 : vector<1x8x1xf32> to vector<8x1xf32>
      %107 = vector.shape_cast %79 : vector<8x1xf32> to vector<1x8x1xf32>
      tpu.vector_store %arg8[%c1_59, %c0_60, %c0_61], %107 {strides = array<i32>} : memref<4x8x1xf32, #tpu.memory_space<vmem>>, vector<1x8x1xf32>,
      %108 = vector.extract_strided_slice %29 {offsets = [0, 16], sizes = [8, 8], strides = [1, 1]} : vector<8x32xbf16> to vector<8x8xbf16>
      %109 = vector.extract_strided_slice %31 {offsets = [0, 16], sizes = [8, 8], strides = [1, 1]} : vector<8x32xbf16> to vector<8x8xbf16>
      %cst_62 = arith.constant dense<0.000000e+00> : vector<8x8xf32>
      %110 = tpu.matmul %108, %109, %cst_62 {dimension_numbers = #tpu.dot_dimension_numbers<[1], [1], [0], [0], [0, 0, 1, 0], [], []>} : vector<8x8xbf16>, vector<8x8xbf16>, vector<8x8xf32> -> vector<8x8xf32>
      %111 = arith.addf %110, %27 : vector<8x8xf32>
      %c2 = arith.constant 2 : index
      %c0_63 = arith.constant 0 : index
      %c0_64 = arith.constant 0 : index
      %112 = vector.load %arg8[%c2, %c0_63, %c0_64] : memref<4x8x1xf32, #tpu.memory_space<vmem>>, vector<1x8x1xf32>
      %113 = vector.shape_cast %112 : vector<1x8x1xf32> to vector<8x1xf32>
      %cst_65 = arith.constant dense<0xFF800000> : vector<8xf32>
      %114 = vector.multi_reduction <maximumf>, %111, %cst_65 [1] : vector<8x8xf32> to vector<8xf32>
      %115 = vector.shape_cast %114 : vector<8xf32> to vector<8x1xf32>
      %116 = arith.maximumf %113, %115 : vector<8x1xf32>
      %117 = arith.subf %113, %116 : vector<8x1xf32>
      %118 = math.exp %117 : vector<8x1xf32>
      %119 = vector.broadcast %116 : vector<8x1xf32> to vector<8x8xf32>
      %120 = arith.subf %111, %119 : vector<8x8xf32>
      %121 = math.exp %120 : vector<8x8xf32>
      %c2_66 = arith.constant 2 : index
      %c0_67 = arith.constant 0 : index
      %c0_68 = arith.constant 0 : index
      %122 = vector.load %arg9[%c2_66, %c0_67, %c0_68] : memref<4x8x1xf32, #tpu.memory_space<vmem>>, vector<1x8x1xf32>
      %123 = vector.shape_cast %122 : vector<1x8x1xf32> to vector<8x1xf32>
      %124 = arith.mulf %118, %123 : vector<8x1xf32>
      %cst_69 = arith.constant dense<0.000000e+00> : vector<8xf32>
      %125 = vector.multi_reduction <add>, %121, %cst_69 [1] : vector<8x8xf32> to vector<8xf32>
      %126 = vector.shape_cast %125 : vector<8xf32> to vector<8x1xf32>
      %127 = arith.addf %124, %126 : vector<8x1xf32>
      %c2_70 = arith.constant 2 : index
      %c0_71 = arith.constant 0 : index
      %c0_72 = arith.constant 0 : index
      %128 = vector.load %arg9[%c2_70, %c0_71, %c0_72] : memref<4x8x1xf32, #tpu.memory_space<vmem>>, vector<1x8x1xf32>
      %129 = vector.shape_cast %128 : vector<1x8x1xf32> to vector<8x1xf32>
      %130 = vector.shape_cast %127 : vector<8x1xf32> to vector<1x8x1xf32>
      tpu.vector_store %arg9[%c2_70, %c0_71, %c0_72], %130 {strides = array<i32>} : memref<4x8x1xf32, #tpu.memory_space<vmem>>, vector<1x8x1xf32>,
      %c2_73 = arith.constant 2 : index
      %c0_74 = arith.constant 0 : index
      %c0_75 = arith.constant 0 : index
      %131 = vector.load %arg10[%c2_73, %c0_74, %c0_75] : memref<4x8x8xf32, #tpu.memory_space<vmem>>, vector<1x8x8xf32>
      %132 = vector.shape_cast %131 : vector<1x8x8xf32> to vector<8x8xf32>
      %133 = vector.broadcast %118 : vector<8x1xf32> to vector<8x8xf32>
      %134 = arith.mulf %133, %132 : vector<8x8xf32>
      %135 = arith.truncf %121 : vector<8x8xf32> to vector<8x8xbf16>
      %136 = vector.extract_strided_slice %33 {offsets = [0, 16], sizes = [8, 8], strides = [1, 1]} : vector<8x32xbf16> to vector<8x8xbf16>
      %cst_76 = arith.constant dense<0.000000e+00> : vector<8x8xf32>
      %137 = tpu.matmul %135, %136, %cst_76 {dimension_numbers = #tpu.dot_dimension_numbers<[1], [0], [0], [1], [0, 0, 1, 1], [], []>} : vector<8x8xbf16>, vector<8x8xbf16>, vector<8x8xf32> -> vector<8x8xf32>
      %138 = arith.addf %134, %137 : vector<8x8xf32>
      %c2_77 = arith.constant 2 : index
      %c0_78 = arith.constant 0 : index
      %c0_79 = arith.constant 0 : index
      %139 = vector.load %arg10[%c2_77, %c0_78, %c0_79] : memref<4x8x8xf32, #tpu.memory_space<vmem>>, vector<1x8x8xf32>
      %140 = vector.shape_cast %139 : vector<1x8x8xf32> to vector<8x8xf32>
      %141 = vector.shape_cast %138 : vector<8x8xf32> to vector<1x8x8xf32>
      tpu.vector_store %arg10[%c2_77, %c0_78, %c0_79], %141 {strides = array<i32>} : memref<4x8x8xf32, #tpu.memory_space<vmem>>, vector<1x8x8xf32>,
      %c2_80 = arith.constant 2 : index
      %c0_81 = arith.constant 0 : index
      %c0_82 = arith.constant 0 : index
      %142 = vector.load %arg8[%c2_80, %c0_81, %c0_82] : memref<4x8x1xf32, #tpu.memory_space<vmem>>, vector<1x8x1xf32>
      %143 = vector.shape_cast %142 : vector<1x8x1xf32> to vector<8x1xf32>
      %144 = vector.shape_cast %116 : vector<8x1xf32> to vector<1x8x1xf32>
      tpu.vector_store %arg8[%c2_80, %c0_81, %c0_82], %144 {strides = array<i32>} : memref<4x8x1xf32, #tpu.memory_space<vmem>>, vector<1x8x1xf32>,
      %145 = vector.extract_strided_slice %29 {offsets = [0, 24], sizes = [8, 8], strides = [1, 1]} : vector<8x32xbf16> to vector<8x8xbf16>
      %146 = vector.extract_strided_slice %31 {offsets = [0, 24], sizes = [8, 8], strides = [1, 1]} : vector<8x32xbf16> to vector<8x8xbf16>
      %cst_83 = arith.constant dense<0.000000e+00> : vector<8x8xf32>
      %147 = tpu.matmul %145, %146, %cst_83 {dimension_numbers = #tpu.dot_dimension_numbers<[1], [1], [0], [0], [0, 0, 1, 0], [], []>} : vector<8x8xbf16>, vector<8x8xbf16>, vector<8x8xf32> -> vector<8x8xf32>
      %148 = arith.addf %147, %27 : vector<8x8xf32>
      %c3 = arith.constant 3 : index
      %c0_84 = arith.constant 0 : index
      %c0_85 = arith.constant 0 : index
      %149 = vector.load %arg8[%c3, %c0_84, %c0_85] : memref<4x8x1xf32, #tpu.memory_space<vmem>>, vector<1x8x1xf32>
      %150 = vector.shape_cast %149 : vector<1x8x1xf32> to vector<8x1xf32>
      %cst_86 = arith.constant dense<0xFF800000> : vector<8xf32>
      %151 = vector.multi_reduction <maximumf>, %148, %cst_86 [1] : vector<8x8xf32> to vector<8xf32>
      %152 = vector.shape_cast %151 : vector<8xf32> to vector<8x1xf32>
      %153 = arith.maximumf %150, %152 : vector<8x1xf32>
      %154 = arith.subf %150, %153 : vector<8x1xf32>
      %155 = math.exp %154 : vector<8x1xf32>
      %156 = vector.broadcast %153 : vector<8x1xf32> to vector<8x8xf32>
      %157 = arith.subf %148, %156 : vector<8x8xf32>
      %158 = math.exp %157 : vector<8x8xf32>
      %c3_87 = arith.constant 3 : index
      %c0_88 = arith.constant 0 : index
      %c0_89 = arith.constant 0 : index
      %159 = vector.load %arg9[%c3_87, %c0_88, %c0_89] : memref<4x8x1xf32, #tpu.memory_space<vmem>>, vector<1x8x1xf32>
      %160 = vector.shape_cast %159 : vector<1x8x1xf32> to vector<8x1xf32>
      %161 = arith.mulf %155, %160 : vector<8x1xf32>
      %cst_90 = arith.constant dense<0.000000e+00> : vector<8xf32>
      %162 = vector.multi_reduction <add>, %158, %cst_90 [1] : vector<8x8xf32> to vector<8xf32>
      %163 = vector.shape_cast %162 : vector<8xf32> to vector<8x1xf32>
      %164 = arith.addf %161, %163 : vector<8x1xf32>
      %c3_91 = arith.constant 3 : index
      %c0_92 = arith.constant 0 : index
      %c0_93 = arith.constant 0 : index
      %165 = vector.load %arg9[%c3_91, %c0_92, %c0_93] : memref<4x8x1xf32, #tpu.memory_space<vmem>>, vector<1x8x1xf32>
      %166 = vector.shape_cast %165 : vector<1x8x1xf32> to vector<8x1xf32>
      %167 = vector.shape_cast %164 : vector<8x1xf32> to vector<1x8x1xf32>
      tpu.vector_store %arg9[%c3_91, %c0_92, %c0_93], %167 {strides = array<i32>} : memref<4x8x1xf32, #tpu.memory_space<vmem>>, vector<1x8x1xf32>,
      %c3_94 = arith.constant 3 : index
      %c0_95 = arith.constant 0 : index
      %c0_96 = arith.constant 0 : index
      %168 = vector.load %arg10[%c3_94, %c0_95, %c0_96] : memref<4x8x8xf32, #tpu.memory_space<vmem>>, vector<1x8x8xf32>
      %169 = vector.shape_cast %168 : vector<1x8x8xf32> to vector<8x8xf32>
      %170 = vector.broadcast %155 : vector<8x1xf32> to vector<8x8xf32>
      %171 = arith.mulf %170, %169 : vector<8x8xf32>
      %172 = arith.truncf %158 : vector<8x8xf32> to vector<8x8xbf16>
      %173 = vector.extract_strided_slice %33 {offsets = [0, 24], sizes = [8, 8], strides = [1, 1]} : vector<8x32xbf16> to vector<8x8xbf16>
      %cst_97 = arith.constant dense<0.000000e+00> : vector<8x8xf32>
      %174 = tpu.matmul %172, %173, %cst_97 {dimension_numbers = #tpu.dot_dimension_numbers<[1], [0], [0], [1], [0, 0, 1, 1], [], []>} : vector<8x8xbf16>, vector<8x8xbf16>, vector<8x8xf32> -> vector<8x8xf32>
      %175 = arith.addf %171, %174 : vector<8x8xf32>
      %c3_98 = arith.constant 3 : index
      %c0_99 = arith.constant 0 : index
      %c0_100 = arith.constant 0 : index
      %176 = vector.load %arg10[%c3_98, %c0_99, %c0_100] : memref<4x8x8xf32, #tpu.memory_space<vmem>>, vector<1x8x8xf32>
      %177 = vector.shape_cast %176 : vector<1x8x8xf32> to vector<8x8xf32>
      %178 = vector.shape_cast %175 : vector<8x8xf32> to vector<1x8x8xf32>
      tpu.vector_store %arg10[%c3_98, %c0_99, %c0_100], %178 {strides = array<i32>} : memref<4x8x8xf32, #tpu.memory_space<vmem>>, vector<1x8x8xf32>,
      %c3_101 = arith.constant 3 : index
      %c0_102 = arith.constant 0 : index
      %c0_103 = arith.constant 0 : index
      %179 = vector.load %arg8[%c3_101, %c0_102, %c0_103] : memref<4x8x1xf32, #tpu.memory_space<vmem>>, vector<1x8x1xf32>
      %180 = vector.shape_cast %179 : vector<1x8x1xf32> to vector<8x1xf32>
      %181 = vector.shape_cast %153 : vector<8x1xf32> to vector<1x8x1xf32>
      tpu.vector_store %arg8[%c3_101, %c0_102, %c0_103], %181 {strides = array<i32>} : memref<4x8x1xf32, #tpu.memory_space<vmem>>, vector<1x8x1xf32>,
    } else {
    }
    %c0_i32_3 = arith.constant 0 : i32
    %9 = arith.cmpi eq, %arg2, %c0_i32_3 : i32
    %10 = arith.extui %9 : i1 to i32
    %c0_i32_4 = arith.constant 0 : i32
    %11 = arith.cmpi ne, %10, %c0_i32_4 : i32
    scf.if %11 {
      %c0 = arith.constant 0 : index
      %c0_5 = arith.constant 0 : index
      %c0_6 = arith.constant 0 : index
      %12 = vector.load %arg9[%c0, %c0_5, %c0_6] : memref<4x8x1xf32, #tpu.memory_space<vmem>>, vector<1x8x1xf32>
      %13 = vector.shape_cast %12 : vector<1x8x1xf32> to vector<8x1xf32>
      %14 = tpu.reciprocal %13 {approx = true} : vector<8x1xf32> -> vector<8x1xf32>
      %c0_7 = arith.constant 0 : index
      %c0_8 = arith.constant 0 : index
      %c0_9 = arith.constant 0 : index
      %15 = vector.load %arg10[%c0_7, %c0_8, %c0_9] : memref<4x8x8xf32, #tpu.memory_space<vmem>>, vector<1x8x8xf32>
      %16 = vector.shape_cast %15 : vector<1x8x8xf32> to vector<8x8xf32>
      %17 = vector.broadcast %14 : vector<8x1xf32> to vector<8x8xf32>
      %18 = arith.mulf %16, %17 : vector<8x8xf32>
      %19 = arith.truncf %18 : vector<8x8xf32> to vector<8x8xbf16>
      %c0_10 = arith.constant 0 : index
      %c0_11 = arith.constant 0 : index
      %c0_12 = arith.constant 0 : index
      %20 = vector.load %arg7[%c0_10, %c0_11, %c0_12] : memref<1x8x32xbf16, #tpu.memory_space<vmem>>, vector<1x8x8xbf16>
      %21 = vector.shape_cast %20 : vector<1x8x8xbf16> to vector<8x8xbf16>
      %22 = vector.shape_cast %19 : vector<8x8xbf16> to vector<1x8x8xbf16>
      tpu.vector_store %arg7[%c0_10, %c0_11, %c0_12], %22 {strides = array<i32>} : memref<1x8x32xbf16, #tpu.memory_space<vmem>>, vector<1x8x8xbf16>,
      %c1 = arith.constant 1 : index
      %c0_13 = arith.constant 0 : index
      %c0_14 = arith.constant 0 : index
      %23 = vector.load %arg9[%c1, %c0_13, %c0_14] : memref<4x8x1xf32, #tpu.memory_space<vmem>>, vector<1x8x1xf32>
      %24 = vector.shape_cast %23 : vector<1x8x1xf32> to vector<8x1xf32>
      %25 = tpu.reciprocal %24 {approx = true} : vector<8x1xf32> -> vector<8x1xf32>
      %c1_15 = arith.constant 1 : index
      %c0_16 = arith.constant 0 : index
      %c0_17 = arith.constant 0 : index
      %26 = vector.load %arg10[%c1_15, %c0_16, %c0_17] : memref<4x8x8xf32, #tpu.memory_space<vmem>>, vector<1x8x8xf32>
      %27 = vector.shape_cast %26 : vector<1x8x8xf32> to vector<8x8xf32>
      %28 = vector.broadcast %25 : vector<8x1xf32> to vector<8x8xf32>
      %29 = arith.mulf %27, %28 : vector<8x8xf32>
      %30 = arith.truncf %29 : vector<8x8xf32> to vector<8x8xbf16>
      %c0_18 = arith.constant 0 : index
      %c0_19 = arith.constant 0 : index
      %c8 = arith.constant 8 : index
      %31 = vector.load %arg7[%c0_18, %c0_19, %c8] : memref<1x8x32xbf16, #tpu.memory_space<vmem>>, vector<1x8x8xbf16>
      %32 = vector.shape_cast %31 : vector<1x8x8xbf16> to vector<8x8xbf16>
      %33 = vector.shape_cast %30 : vector<8x8xbf16> to vector<1x8x8xbf16>
      tpu.vector_store %arg7[%c0_18, %c0_19, %c8], %33 {strides = array<i32>} : memref<1x8x32xbf16, #tpu.memory_space<vmem>>, vector<1x8x8xbf16>,
      %c2 = arith.constant 2 : index
      %c0_20 = arith.constant 0 : index
      %c0_21 = arith.constant 0 : index
      %34 = vector.load %arg9[%c2, %c0_20, %c0_21] : memref<4x8x1xf32, #tpu.memory_space<vmem>>, vector<1x8x1xf32>
      %35 = vector.shape_cast %34 : vector<1x8x1xf32> to vector<8x1xf32>
      %36 = tpu.reciprocal %35 {approx = true} : vector<8x1xf32> -> vector<8x1xf32>
      %c2_22 = arith.constant 2 : index
      %c0_23 = arith.constant 0 : index
      %c0_24 = arith.constant 0 : index
      %37 = vector.load %arg10[%c2_22, %c0_23, %c0_24] : memref<4x8x8xf32, #tpu.memory_space<vmem>>, vector<1x8x8xf32>
      %38 = vector.shape_cast %37 : vector<1x8x8xf32> to vector<8x8xf32>
      %39 = vector.broadcast %36 : vector<8x1xf32> to vector<8x8xf32>
      %40 = arith.mulf %38, %39 : vector<8x8xf32>
      %41 = arith.truncf %40 : vector<8x8xf32> to vector<8x8xbf16>
      %c0_25 = arith.constant 0 : index
      %c0_26 = arith.constant 0 : index
      %c16 = arith.constant 16 : index
      %42 = vector.load %arg7[%c0_25, %c0_26, %c16] : memref<1x8x32xbf16, #tpu.memory_space<vmem>>, vector<1x8x8xbf16>
      %43 = vector.shape_cast %42 : vector<1x8x8xbf16> to vector<8x8xbf16>
      %44 = vector.shape_cast %41 : vector<8x8xbf16> to vector<1x8x8xbf16>
      tpu.vector_store %arg7[%c0_25, %c0_26, %c16], %44 {strides = array<i32>} : memref<1x8x32xbf16, #tpu.memory_space<vmem>>, vector<1x8x8xbf16>,
      %c3 = arith.constant 3 : index
      %c0_27 = arith.constant 0 : index
      %c0_28 = arith.constant 0 : index
      %45 = vector.load %arg9[%c3, %c0_27, %c0_28] : memref<4x8x1xf32, #tpu.memory_space<vmem>>, vector<1x8x1xf32>
      %46 = vector.shape_cast %45 : vector<1x8x1xf32> to vector<8x1xf32>
      %47 = tpu.reciprocal %46 {approx = true} : vector<8x1xf32> -> vector<8x1xf32>
      %c3_29 = arith.constant 3 : index
      %c0_30 = arith.constant 0 : index
      %c0_31 = arith.constant 0 : index
      %48 = vector.load %arg10[%c3_29, %c0_30, %c0_31] : memref<4x8x8xf32, #tpu.memory_space<vmem>>, vector<1x8x8xf32>
      %49 = vector.shape_cast %48 : vector<1x8x8xf32> to vector<8x8xf32>
      %50 = vector.broadcast %47 : vector<8x1xf32> to vector<8x8xf32>
      %51 = arith.mulf %49, %50 : vector<8x8xf32>
      %52 = arith.truncf %51 : vector<8x8xf32> to vector<8x8xbf16>
      %c0_32 = arith.constant 0 : index
      %c0_33 = arith.constant 0 : index
      %c24 = arith.constant 24 : index
      %53 = vector.load %arg7[%c0_32, %c0_33, %c24] : memref<1x8x32xbf16, #tpu.memory_space<vmem>>, vector<1x8x8xbf16>
      %54 = vector.shape_cast %53 : vector<1x8x8xbf16> to vector<8x8xbf16>
      %55 = vector.shape_cast %52 : vector<8x8xbf16> to vector<1x8x8xbf16>
      tpu.vector_store %arg7[%c0_32, %c0_33, %c24], %55 {strides = array<i32>} : memref<1x8x32xbf16, #tpu.memory_space<vmem>>, vector<1x8x8xbf16>,
    } else {
    }
    return
  }
  func.func @transform_0(%arg0: i32, %arg1: i32, %arg2: i32) -> (i32, i32, i32) {
    %c0_i32 = arith.constant 0 : i32
    %c0_i32_0 = arith.constant 0 : i32
    return %arg0, %arg1, %c0_i32 : i32, i32, i32
  }
  func.func @transform_1(%arg0: i32, %arg1: i32, %arg2: i32) -> (i32, i32, i32) {
    %c0_i32 = arith.constant 0 : i32
    %c0_i32_0 = arith.constant 0 : i32
    return %arg0, %arg2, %c0_i32 : i32, i32, i32
  }
  func.func @transform_2(%arg0: i32, %arg1: i32, %arg2: i32) -> (i32, i32, i32) {
    %c0_i32 = arith.constant 0 : i32
    %c0_i32_0 = arith.constant 0 : i32
    return %arg0, %arg2, %c0_i32 : i32, i32, i32
  }
  func.func @transform_3(%arg0: i32, %arg1: i32, %arg2: i32) -> (i32, i32, i32) {
    %c0_i32 = arith.constant 0 : i32
    %c0_i32_0 = arith.constant 0 : i32
    return %arg0, %c0_i32, %arg2 : i32, i32, i32
  }
  func.func @transform_4(%arg0: i32, %arg1: i32, %arg2: i32) -> (i32, i32, i32) {
    %c0_i32 = arith.constant 0 : i32
    %c0_i32_0 = arith.constant 0 : i32
    return %arg0, %arg1, %c0_i32 : i32, i32, i32
  }
}

module attributes {stable_mosaic.version = 11 : i64} {
  func.func @kernel(%arg0: i32, %arg1: i32, %arg2: memref<16x32xf32, #tpu.memory_space<vmem>>, %arg3: memref<1x32xf32, #tpu.memory_space<vmem>>, %arg4: memref<1x32xf32, #tpu.memory_space<vmem>>, %arg5: memref<32x512xbf16, #tpu.memory_space<vmem>>, %arg6: memref<1x512xf32, #tpu.memory_space<vmem>>, %arg7: memref<16x512xbf16, #tpu.memory_space<vmem>>, %arg8: memref<16x32xbf16, #tpu.memory_space<vmem>>) attributes {dimension_semantics = [#tpu.dimension_semantics<parallel>, #tpu.dimension_semantics<arbitrary>], iteration_bounds = array<i64: 1, 4>, scalar_prefetch = 0 : i64, scratch_operands = 1 : i64, tpu.core_type = #tpu.core_type<tc>, window_params = [{transform_indices = @transform_0, window_bounds = array<i64: 16, 32>}, {pipeline_mode = #tpu.pipeline_mode<synchronous>, transform_indices = @transform_1, window_bounds = array<i64: 1, 32>}, {pipeline_mode = #tpu.pipeline_mode<synchronous>, transform_indices = @transform_2, window_bounds = array<i64: 1, 32>}, {transform_indices = @transform_3, window_bounds = array<i64: 32, 512>}, {transform_indices = @transform_4, window_bounds = array<i64: 1, 512>}, {transform_indices = @transform_5, window_bounds = array<i64: 16, 512>}]} {
    %c0_i32 = arith.constant 0 : i32
    %0 = arith.cmpi eq, %arg1, %c0_i32 : i32
    %1 = arith.extui %0 : i1 to i32
    %c0_i32_0 = arith.constant 0 : i32
    %2 = arith.cmpi ne, %1, %c0_i32_0 : i32
    scf.if %2 {
      %c0_10 = arith.constant 0 : index
      %c0_11 = arith.constant 0 : index
      %16 = vector.load %arg2[%c0_10, %c0_11] : memref<16x32xf32, #tpu.memory_space<vmem>>, vector<16x32xf32>
      %cst_12 = arith.constant dense<0.000000e+00> : vector<16xf32>
      %17 = vector.multi_reduction <add>, %16, %cst_12 [1] : vector<16x32xf32> to vector<16xf32>
      %18 = vector.shape_cast %17 : vector<16xf32> to vector<16x1xf32>
      %cst_13 = arith.constant 3.200000e+01 : f32
      %19 = vector.broadcast %cst_13 : f32 to vector<16x1xf32>
      %20 = arith.divf %18, %19 : vector<16x1xf32>
      %21 = vector.broadcast %20 : vector<16x1xf32> to vector<16x32xf32>
      %22 = arith.subf %16, %21 : vector<16x32xf32>
      %23 = arith.mulf %22, %22 : vector<16x32xf32>
      %cst_14 = arith.constant dense<0.000000e+00> : vector<16xf32>
      %24 = vector.multi_reduction <add>, %23, %cst_14 [1] : vector<16x32xf32> to vector<16xf32>
      %25 = vector.shape_cast %24 : vector<16xf32> to vector<16x1xf32>
      %cst_15 = arith.constant 3.200000e+01 : f32
      %26 = vector.broadcast %cst_15 : f32 to vector<16x1xf32>
      %27 = arith.divf %25, %26 : vector<16x1xf32>
      %28 = vector.broadcast %20 : vector<16x1xf32> to vector<16x32xf32>
      %29 = arith.subf %16, %28 : vector<16x32xf32>
      %cst_16 = arith.constant 9.99999974E-6 : f32
      %30 = vector.broadcast %cst_16 : f32 to vector<16x1xf32>
      %31 = arith.addf %27, %30 : vector<16x1xf32>
      %32 = math.rsqrt %31 : vector<16x1xf32>
      %33 = vector.broadcast %32 : vector<16x1xf32> to vector<16x32xf32>
      %34 = arith.mulf %29, %33 : vector<16x32xf32>
      %c0_17 = arith.constant 0 : index
      %c0_18 = arith.constant 0 : index
      %35 = vector.load %arg3[%c0_17, %c0_18] : memref<1x32xf32, #tpu.memory_space<vmem>>, vector<1x32xf32>
      %36 = vector.broadcast %35 : vector<1x32xf32> to vector<16x32xf32>
      %37 = arith.mulf %34, %36 : vector<16x32xf32>
      %c0_19 = arith.constant 0 : index
      %c0_20 = arith.constant 0 : index
      %38 = vector.load %arg4[%c0_19, %c0_20] : memref<1x32xf32, #tpu.memory_space<vmem>>, vector<1x32xf32>
      %39 = vector.broadcast %38 : vector<1x32xf32> to vector<16x32xf32>
      %40 = arith.addf %37, %39 : vector<16x32xf32>
      %41 = arith.truncf %40 : vector<16x32xf32> to vector<16x32xbf16>
      %c0_21 = arith.constant 0 : index
      %c0_22 = arith.constant 0 : index
      %42 = vector.load %arg8[%c0_21, %c0_22] : memref<16x32xbf16, #tpu.memory_space<vmem>>, vector<16x32xbf16>
      tpu.vector_store %arg8[%c0_21, %c0_22], %41 {strides = array<i32>} : memref<16x32xbf16, #tpu.memory_space<vmem>>, vector<16x32xbf16>,
    } else {
    }
    %c0 = arith.constant 0 : index
    %c0_1 = arith.constant 0 : index
    %3 = vector.load %arg8[%c0, %c0_1] : memref<16x32xbf16, #tpu.memory_space<vmem>>, vector<16x32xbf16>
    %c0_2 = arith.constant 0 : index
    %c0_3 = arith.constant 0 : index
    %4 = vector.load %arg5[%c0_2, %c0_3] : memref<32x512xbf16, #tpu.memory_space<vmem>>, vector<32x512xbf16>
    %cst = arith.constant dense<0.000000e+00> : vector<16x512xf32>
    %5 = tpu.matmul %3, %4, %cst {dimension_numbers = #tpu.dot_dimension_numbers<[1], [0], [0], [1], [0, 0, 1, 1], [], []>} : vector<16x32xbf16>, vector<32x512xbf16>, vector<16x512xf32> -> vector<16x512xf32>
    %c0_4 = arith.constant 0 : index
    %c0_5 = arith.constant 0 : index
    %6 = vector.load %arg6[%c0_4, %c0_5] : memref<1x512xf32, #tpu.memory_space<vmem>>, vector<1x512xf32>
    %7 = vector.broadcast %6 : vector<1x512xf32> to vector<16x512xf32>
    %8 = arith.addf %5, %7 : vector<16x512xf32>
    %cst_6 = arith.constant 0.000000e+00 : f32
    %9 = vector.broadcast %cst_6 : f32 to vector<16x512xf32>
    %10 = arith.cmpf ogt, %8, %9 : vector<16x512xf32>
    %cst_7 = arith.constant 0.00999999977 : f32
    %11 = vector.broadcast %cst_7 : f32 to vector<16x512xf32>
    %12 = arith.mulf %11, %8 : vector<16x512xf32>
    %13 = arith.select %10, %8, %12 : vector<16x512xi1>, vector<16x512xf32>
    %14 = arith.truncf %13 : vector<16x512xf32> to vector<16x512xbf16>
    %c0_8 = arith.constant 0 : index
    %c0_9 = arith.constant 0 : index
    %15 = vector.load %arg7[%c0_8, %c0_9] : memref<16x512xbf16, #tpu.memory_space<vmem>>, vector<16x512xbf16>
    tpu.vector_store %arg7[%c0_8, %c0_9], %14 {strides = array<i32>} : memref<16x512xbf16, #tpu.memory_space<vmem>>, vector<16x512xbf16>,
    return
  }
  func.func @transform_0(%arg0: i32, %arg1: i32) -> (i32, i32) {
    %c0_i32 = arith.constant 0 : i32
    %c0_i32_0 = arith.constant 0 : i32
    return %arg0, %c0_i32 : i32, i32
  }
  func.func @transform_1(%arg0: i32, %arg1: i32) -> (i32, i32) {
    %c0_i32 = arith.constant 0 : i32
    %c0_i32_0 = arith.constant 0 : i32
    %c0_i32_1 = arith.constant 0 : i32
    return %c0_i32, %c0_i32_0 : i32, i32
  }
  func.func @transform_2(%arg0: i32, %arg1: i32) -> (i32, i32) {
    %c0_i32 = arith.constant 0 : i32
    %c0_i32_0 = arith.constant 0 : i32
    %c0_i32_1 = arith.constant 0 : i32
    return %c0_i32, %c0_i32_0 : i32, i32
  }
  func.func @transform_3(%arg0: i32, %arg1: i32) -> (i32, i32) {
    %c0_i32 = arith.constant 0 : i32
    %c0_i32_0 = arith.constant 0 : i32
    return %c0_i32, %arg1 : i32, i32
  }
  func.func @transform_4(%arg0: i32, %arg1: i32) -> (i32, i32) {
    %c0_i32 = arith.constant 0 : i32
    %c0_i32_0 = arith.constant 0 : i32
    return %c0_i32, %arg1 : i32, i32
  }
  func.func @transform_5(%arg0: i32, %arg1: i32) -> (i32, i32) {
    %c0_i32 = arith.constant 0 : i32
    return %arg0, %arg1 : i32, i32
  }
}

module attributes {stable_mosaic.version = 11 : i64} {
  func.func @_mha_kernel(%arg0: i32, %arg1: i32, %arg2: i32, %arg3: memref<1x8x32xbf16, #tpu.memory_space<vmem>>, %arg4: memref<1x8x32xbf16, #tpu.memory_space<vmem>>, %arg5: memref<1x8x32xbf16, #tpu.memory_space<vmem>>, %arg6: memref<1x1x8xf32, #tpu.memory_space<vmem>>, %arg7: memref<1x8x32xbf16, #tpu.memory_space<vmem>>, %arg8: memref<4x8x1xf32, #tpu.memory_space<vmem>>, %arg9: memref<4x8x1xf32, #tpu.memory_space<vmem>>, %arg10: memref<4x8x8xf32, #tpu.memory_space<vmem>>) attributes {dimension_semantics = [#tpu.dimension_semantics<parallel>, #tpu.dimension_semantics<parallel>, #tpu.dimension_semantics<arbitrary>], iteration_bounds = array<i64: 2, 1, 1>, scalar_prefetch = 0 : i64, scratch_operands = 3 : i64, tpu.core_type = #tpu.core_type<tc>, window_params = [{transform_indices = @transform_0, window_bounds = array<i64: 1, 8, 32>}, {transform_indices = @transform_1, window_bounds = array<i64: 1, 8, 32>}, {transform_indices = @transform_2, window_bounds = array<i64: 1, 8, 32>}, {transform_indices = @transform_3, window_bounds = array<i64: 1, 1, 8>}, {transform_indices = @transform_4, window_bounds = array<i64: 1, 8, 32>}]} {
    %c0_i32 = arith.constant 0 : i32
    %0 = arith.cmpi eq, %arg2, %c0_i32 : i32
    %1 = arith.extui %0 : i1 to i32
    %c0_i32_0 = arith.constant 0 : i32
    %2 = arith.cmpi ne, %1, %c0_i32_0 : i32
    scf.if %2 {
      %cst_98 = arith.constant 0xFF800000 : f32
      %166 = vector.broadcast %cst_98 : f32 to vector<4x8x1xf32>
      %c0_99 = arith.constant 0 : index
      %c0_100 = arith.constant 0 : index
      %c0_101 = arith.constant 0 : index
      %167 = vector.load %arg8[%c0_99, %c0_100, %c0_101] : memref<4x8x1xf32, #tpu.memory_space<vmem>>, vector<4x8x1xf32>
      tpu.vector_store %arg8[%c0_99, %c0_100, %c0_101], %166 {strides = array<i32>} : memref<4x8x1xf32, #tpu.memory_space<vmem>>, vector<4x8x1xf32>,
      %cst_102 = arith.constant 0.000000e+00 : f32
      %168 = vector.broadcast %cst_102 : f32 to vector<4x8x1xf32>
      %c0_103 = arith.constant 0 : index
      %c0_104 = arith.constant 0 : index
      %c0_105 = arith.constant 0 : index
      %169 = vector.load %arg9[%c0_103, %c0_104, %c0_105] : memref<4x8x1xf32, #tpu.memory_space<vmem>>, vector<4x8x1xf32>
      tpu.vector_store %arg9[%c0_103, %c0_104, %c0_105], %168 {strides = array<i32>} : memref<4x8x1xf32, #tpu.memory_space<vmem>>, vector<4x8x1xf32>,
      %cst_106 = arith.constant 0.000000e+00 : f32
      %170 = vector.broadcast %cst_106 : f32 to vector<4x8x8xf32>
      %c0_107 = arith.constant 0 : index
      %c0_108 = arith.constant 0 : index
      %c0_109 = arith.constant 0 : index
      %171 = vector.load %arg10[%c0_107, %c0_108, %c0_109] : memref<4x8x8xf32, #tpu.memory_space<vmem>>, vector<4x8x8xf32>
      tpu.vector_store %arg10[%c0_107, %c0_108, %c0_109], %170 {strides = array<i32>} : memref<4x8x8xf32, #tpu.memory_space<vmem>>, vector<4x8x8xf32>,
    } else {
    }
    %c0 = arith.constant 0 : index
    %c0_1 = arith.constant 0 : index
    %c0_2 = arith.constant 0 : index
    %3 = vector.load %arg6[%c0, %c0_1, %c0_2] : memref<1x1x8xf32, #tpu.memory_space<vmem>>, vector<1x1x8xf32>
    %4 = vector.shape_cast %3 : vector<1x1x8xf32> to vector<1x8xf32>
    %c0_3 = arith.constant 0 : index
    %c0_4 = arith.constant 0 : index
    %c0_5 = arith.constant 0 : index
    %5 = vector.load %arg3[%c0_3, %c0_4, %c0_5] : memref<1x8x32xbf16, #tpu.memory_space<vmem>>, vector<1x8x32xbf16>
    %6 = vector.shape_cast %5 : vector<1x8x32xbf16> to vector<8x32xbf16>
    %c0_6 = arith.constant 0 : index
    %c0_7 = arith.constant 0 : index
    %c0_8 = arith.constant 0 : index
    %7 = vector.load %arg4[%c0_6, %c0_7, %c0_8] : memref<1x8x32xbf16, #tpu.memory_space<vmem>>, vector<1x8x32xbf16>
    %8 = vector.shape_cast %7 : vector<1x8x32xbf16> to vector<8x32xbf16>
    %c0_9 = arith.constant 0 : index
    %c0_10 = arith.constant 0 : index
    %c0_11 = arith.constant 0 : index
    %9 = vector.load %arg5[%c0_9, %c0_10, %c0_11] : memref<1x8x32xbf16, #tpu.memory_space<vmem>>, vector<1x8x32xbf16>
    %10 = vector.shape_cast %9 : vector<1x8x32xbf16> to vector<8x32xbf16>
    %11 = vector.extract_strided_slice %6 {offsets = [0, 0], sizes = [8, 8], strides = [1, 1]} : vector<8x32xbf16> to vector<8x8xbf16>
    %12 = vector.extract_strided_slice %8 {offsets = [0, 0], sizes = [8, 8], strides = [1, 1]} : vector<8x32xbf16> to vector<8x8xbf16>
    %cst = arith.constant dense<0.000000e+00> : vector<8x8xf32>
    %13 = tpu.matmul %11, %12, %cst {dimension_numbers = #tpu.dot_dimension_numbers<[1], [1], [0], [0], [0, 0, 1, 0], [], []>} : vector<8x8xbf16>, vector<8x8xbf16>, vector<8x8xf32> -> vector<8x8xf32>
    %14 = vector.broadcast %4 : vector<1x8xf32> to vector<8x8xf32>
    %15 = arith.addf %13, %14 : vector<8x8xf32>
    %c0_12 = arith.constant 0 : index
    %c0_13 = arith.constant 0 : index
    %c0_14 = arith.constant 0 : index
    %16 = vector.load %arg8[%c0_12, %c0_13, %c0_14] : memref<4x8x1xf32, #tpu.memory_space<vmem>>, vector<1x8x1xf32>
    %17 = vector.shape_cast %16 : vector<1x8x1xf32> to vector<8x1xf32>
    %cst_15 = arith.constant dense<0xFF800000> : vector<8xf32>
    %18 = vector.multi_reduction <maximumf>, %15, %cst_15 [1] : vector<8x8xf32> to vector<8xf32>
    %19 = vector.shape_cast %18 : vector<8xf32> to vector<8x1xf32>
    %20 = arith.maximumf %17, %19 : vector<8x1xf32>
    %21 = arith.subf %17, %20 : vector<8x1xf32>
    %22 = math.exp %21 : vector<8x1xf32>
    %23 = vector.broadcast %20 : vector<8x1xf32> to vector<8x8xf32>
    %24 = arith.subf %15, %23 : vector<8x8xf32>
    %25 = math.exp %24 : vector<8x8xf32>
    %c0_16 = arith.constant 0 : index
    %c0_17 = arith.constant 0 : index
    %c0_18 = arith.constant 0 : index
    %26 = vector.load %arg9[%c0_16, %c0_17, %c0_18] : memref<4x8x1xf32, #tpu.memory_space<vmem>>, vector<1x8x1xf32>
    %27 = vector.shape_cast %26 : vector<1x8x1xf32> to vector<8x1xf32>
    %28 = arith.mulf %22, %27 : vector<8x1xf32>
    %cst_19 = arith.constant dense<0.000000e+00> : vector<8xf32>
    %29 = vector.multi_reduction <add>, %25, %cst_19 [1] : vector<8x8xf32> to vector<8xf32>
    %30 = vector.shape_cast %29 : vector<8xf32> to vector<8x1xf32>
    %31 = arith.addf %28, %30 : vector<8x1xf32>
    %c0_20 = arith.constant 0 : index
    %c0_21 = arith.constant 0 : index
    %c0_22 = arith.constant 0 : index
    %32 = vector.load %arg9[%c0_20, %c0_21, %c0_22] : memref<4x8x1xf32, #tpu.memory_space<vmem>>, vector<1x8x1xf32>
    %33 = vector.shape_cast %32 : vector<1x8x1xf32> to vector<8x1xf32>
    %34 = vector.shape_cast %31 : vector<8x1xf32> to vector<1x8x1xf32>
    tpu.vector_store %arg9[%c0_20, %c0_21, %c0_22], %34 {strides = array<i32>} : memref<4x8x1xf32, #tpu.memory_space<vmem>>, vector<1x8x1xf32>,
    %c0_23 = arith.constant 0 : index
    %c0_24 = arith.constant 0 : index
    %c0_25 = arith.constant 0 : index
    %35 = vector.load %arg10[%c0_23, %c0_24, %c0_25] : memref<4x8x8xf32, #tpu.memory_space<vmem>>, vector<1x8x8xf32>
    %36 = vector.shape_cast %35 : vector<1x8x8xf32> to vector<8x8xf32>
    %37 = vector.broadcast %22 : vector<8x1xf32> to vector<8x8xf32>
    %38 = arith.mulf %37, %36 : vector<8x8xf32>
    %39 = arith.truncf %25 : vector<8x8xf32> to vector<8x8xbf16>
    %40 = vector.extract_strided_slice %10 {offsets = [0, 0], sizes = [8, 8], strides = [1, 1]} : vector<8x32xbf16> to vector<8x8xbf16>
    %cst_26 = arith.constant dense<0.000000e+00> : vector<8x8xf32>
    %41 = tpu.matmul %39, %40, %cst_26 {dimension_numbers = #tpu.dot_dimension_numbers<[1], [0], [0], [1], [0, 0, 1, 1], [], []>} : vector<8x8xbf16>, vector<8x8xbf16>, vector<8x8xf32> -> vector<8x8xf32>
    %42 = arith.addf %38, %41 : vector<8x8xf32>
    %c0_27 = arith.constant 0 : index
    %c0_28 = arith.constant 0 : index
    %c0_29 = arith.constant 0 : index
    %43 = vector.load %arg10[%c0_27, %c0_28, %c0_29] : memref<4x8x8xf32, #tpu.memory_space<vmem>>, vector<1x8x8xf32>
    %44 = vector.shape_cast %43 : vector<1x8x8xf32> to vector<8x8xf32>
    %45 = vector.shape_cast %42 : vector<8x8xf32> to vector<1x8x8xf32>
    tpu.vector_store %arg10[%c0_27, %c0_28, %c0_29], %45 {strides = array<i32>} : memref<4x8x8xf32, #tpu.memory_space<vmem>>, vector<1x8x8xf32>,
    %c0_30 = arith.constant 0 : index
    %c0_31 = arith.constant 0 : index
    %c0_32 = arith.constant 0 : index
    %46 = vector.load %arg8[%c0_30, %c0_31, %c0_32] : memref<4x8x1xf32, #tpu.memory_space<vmem>>, vector<1x8x1xf32>
    %47 = vector.shape_cast %46 : vector<1x8x1xf32> to vector<8x1xf32>
    %48 = vector.shape_cast %20 : vector<8x1xf32> to vector<1x8x1xf32>
    tpu.vector_store %arg8[%c0_30, %c0_31, %c0_32], %48 {strides = array<i32>} : memref<4x8x1xf32, #tpu.memory_space<vmem>>, vector<1x8x1xf32>,
    %49 = vector.extract_strided_slice %6 {offsets = [0, 8], sizes = [8, 8], strides = [1, 1]} : vector<8x32xbf16> to vector<8x8xbf16>
    %50 = vector.extract_strided_slice %8 {offsets = [0, 8], sizes = [8, 8], strides = [1, 1]} : vector<8x32xbf16> to vector<8x8xbf16>
    %cst_33 = arith.constant dense<0.000000e+00> : vector<8x8xf32>
    %51 = tpu.matmul %49, %50, %cst_33 {dimension_numbers = #tpu.dot_dimension_numbers<[1], [1], [0], [0], [0, 0, 1, 0], [], []>} : vector<8x8xbf16>, vector<8x8xbf16>, vector<8x8xf32> -> vector<8x8xf32>
    %52 = vector.broadcast %4 : vector<1x8xf32> to vector<8x8xf32>
    %53 = arith.addf %51, %52 : vector<8x8xf32>
    %c1 = arith.constant 1 : index
    %c0_34 = arith.constant 0 : index
    %c0_35 = arith.constant 0 : index
    %54 = vector.load %arg8[%c1, %c0_34, %c0_35] : memref<4x8x1xf32, #tpu.memory_space<vmem>>, vector<1x8x1xf32>
    %55 = vector.shape_cast %54 : vector<1x8x1xf32> to vector<8x1xf32>
    %cst_36 = arith.constant dense<0xFF800000> : vector<8xf32>
    %56 = vector.multi_reduction <maximumf>, %53, %cst_36 [1] : vector<8x8xf32> to vector<8xf32>
    %57 = vector.shape_cast %56 : vector<8xf32> to vector<8x1xf32>
    %58 = arith.maximumf %55, %57 : vector<8x1xf32>
    %59 = arith.subf %55, %58 : vector<8x1xf32>
    %60 = math.exp %59 : vector<8x1xf32>
    %61 = vector.broadcast %58 : vector<8x1xf32> to vector<8x8xf32>
    %62 = arith.subf %53, %61 : vector<8x8xf32>
    %63 = math.exp %62 : vector<8x8xf32>
    %c1_37 = arith.constant 1 : index
    %c0_38 = arith.constant 0 : index
    %c0_39 = arith.constant 0 : index
    %64 = vector.load %arg9[%c1_37, %c0_38, %c0_39] : memref<4x8x1xf32, #tpu.memory_space<vmem>>, vector<1x8x1xf32>
    %65 = vector.shape_cast %64 : vector<1x8x1xf32> to vector<8x1xf32>
    %66 = arith.mulf %60, %65 : vector<8x1xf32>
    %cst_40 = arith.constant dense<0.000000e+00> : vector<8xf32>
    %67 = vector.multi_reduction <add>, %63, %cst_40 [1] : vector<8x8xf32> to vector<8xf32>
    %68 = vector.shape_cast %67 : vector<8xf32> to vector<8x1xf32>
    %69 = arith.addf %66, %68 : vector<8x1xf32>
    %c1_41 = arith.constant 1 : index
    %c0_42 = arith.constant 0 : index
    %c0_43 = arith.constant 0 : index
    %70 = vector.load %arg9[%c1_41, %c0_42, %c0_43] : memref<4x8x1xf32, #tpu.memory_space<vmem>>, vector<1x8x1xf32>
    %71 = vector.shape_cast %70 : vector<1x8x1xf32> to vector<8x1xf32>
    %72 = vector.shape_cast %69 : vector<8x1xf32> to vector<1x8x1xf32>
    tpu.vector_store %arg9[%c1_41, %c0_42, %c0_43], %72 {strides = array<i32>} : memref<4x8x1xf32, #tpu.memory_space<vmem>>, vector<1x8x1xf32>,
    %c1_44 = arith.constant 1 : index
    %c0_45 = arith.constant 0 : index
    %c0_46 = arith.constant 0 : index
    %73 = vector.load %arg10[%c1_44, %c0_45, %c0_46] : memref<4x8x8xf32, #tpu.memory_space<vmem>>, vector<1x8x8xf32>
    %74 = vector.shape_cast %73 : vector<1x8x8xf32> to vector<8x8xf32>
    %75 = vector.broadcast %60 : vector<8x1xf32> to vector<8x8xf32>
    %76 = arith.mulf %75, %74 : vector<8x8xf32>
    %77 = arith.truncf %63 : vector<8x8xf32> to vector<8x8xbf16>
    %78 = vector.extract_strided_slice %10 {offsets = [0, 8], sizes = [8, 8], strides = [1, 1]} : vector<8x32xbf16> to vector<8x8xbf16>
    %cst_47 = arith.constant dense<0.000000e+00> : vector<8x8xf32>
    %79 = tpu.matmul %77, %78, %cst_47 {dimension_numbers = #tpu.dot_dimension_numbers<[1], [0], [0], [1], [0, 0, 1, 1], [], []>} : vector<8x8xbf16>, vector<8x8xbf16>, vector<8x8xf32> -> vector<8x8xf32>
    %80 = arith.addf %76, %79 : vector<8x8xf32>
    %c1_48 = arith.constant 1 : index
    %c0_49 = arith.constant 0 : index
    %c0_50 = arith.constant 0 : index
    %81 = vector.load %arg10[%c1_48, %c0_49, %c0_50] : memref<4x8x8xf32, #tpu.memory_space<vmem>>, vector<1x8x8xf32>
    %82 = vector.shape_cast %81 : vector<1x8x8xf32> to vector<8x8xf32>
    %83 = vector.shape_cast %80 : vector<8x8xf32> to vector<1x8x8xf32>
    tpu.vector_store %arg10[%c1_48, %c0_49, %c0_50], %83 {strides = array<i32>} : memref<4x8x8xf32, #tpu.memory_space<vmem>>, vector<1x8x8xf32>,
    %c1_51 = arith.constant 1 : index
    %c0_52 = arith.constant 0 : index
    %c0_53 = arith.constant 0 : index
    %84 = vector.load %arg8[%c1_51, %c0_52, %c0_53] : memref<4x8x1xf32, #tpu.memory_space<vmem>>, vector<1x8x1xf32>
    %85 = vector.shape_cast %84 : vector<1x8x1xf32> to vector<8x1xf32>
    %86 = vector.shape_cast %58 : vector<8x1xf32> to vector<1x8x1xf32>
    tpu.vector_store %arg8[%c1_51, %c0_52, %c0_53], %86 {strides = array<i32>} : memref<4x8x1xf32, #tpu.memory_space<vmem>>, vector<1x8x1xf32>,
    %87 = vector.extract_strided_slice %6 {offsets = [0, 16], sizes = [8, 8], strides = [1, 1]} : vector<8x32xbf16> to vector<8x8xbf16>
    %88 = vector.extract_strided_slice %8 {offsets = [0, 16], sizes = [8, 8], strides = [1, 1]} : vector<8x32xbf16> to vector<8x8xbf16>
    %cst_54 = arith.constant dense<0.000000e+00> : vector<8x8xf32>
    %89 = tpu.matmul %87, %88, %cst_54 {dimension_numbers = #tpu.dot_dimension_numbers<[1], [1], [0], [0], [0, 0, 1, 0], [], []>} : vector<8x8xbf16>, vector<8x8xbf16>, vector<8x8xf32> -> vector<8x8xf32>
    %90 = vector.broadcast %4 : vector<1x8xf32> to vector<8x8xf32>
    %91 = arith.addf %89, %90 : vector<8x8xf32>
    %c2 = arith.constant 2 : index
    %c0_55 = arith.constant 0 : index
    %c0_56 = arith.constant 0 : index
    %92 = vector.load %arg8[%c2, %c0_55, %c0_56] : memref<4x8x1xf32, #tpu.memory_space<vmem>>, vector<1x8x1xf32>
    %93 = vector.shape_cast %92 : vector<1x8x1xf32> to vector<8x1xf32>
    %cst_57 = arith.constant dense<0xFF800000> : vector<8xf32>
    %94 = vector.multi_reduction <maximumf>, %91, %cst_57 [1] : vector<8x8xf32> to vector<8xf32>
    %95 = vector.shape_cast %94 : vector<8xf32> to vector<8x1xf32>
    %96 = arith.maximumf %93, %95 : vector<8x1xf32>
    %97 = arith.subf %93, %96 : vector<8x1xf32>
    %98 = math.exp %97 : vector<8x1xf32>
    %99 = vector.broadcast %96 : vector<8x1xf32> to vector<8x8xf32>
    %100 = arith.subf %91, %99 : vector<8x8xf32>
    %101 = math.exp %100 : vector<8x8xf32>
    %c2_58 = arith.constant 2 : index
    %c0_59 = arith.constant 0 : index
    %c0_60 = arith.constant 0 : index
    %102 = vector.load %arg9[%c2_58, %c0_59, %c0_60] : memref<4x8x1xf32, #tpu.memory_space<vmem>>, vector<1x8x1xf32>
    %103 = vector.shape_cast %102 : vector<1x8x1xf32> to vector<8x1xf32>
    %104 = arith.mulf %98, %103 : vector<8x1xf32>
    %cst_61 = arith.constant dense<0.000000e+00> : vector<8xf32>
    %105 = vector.multi_reduction <add>, %101, %cst_61 [1] : vector<8x8xf32> to vector<8xf32>
    %106 = vector.shape_cast %105 : vector<8xf32> to vector<8x1xf32>
    %107 = arith.addf %104, %106 : vector<8x1xf32>
    %c2_62 = arith.constant 2 : index
    %c0_63 = arith.constant 0 : index
    %c0_64 = arith.constant 0 : index
    %108 = vector.load %arg9[%c2_62, %c0_63, %c0_64] : memref<4x8x1xf32, #tpu.memory_space<vmem>>, vector<1x8x1xf32>
    %109 = vector.shape_cast %108 : vector<1x8x1xf32> to vector<8x1xf32>
    %110 = vector.shape_cast %107 : vector<8x1xf32> to vector<1x8x1xf32>
    tpu.vector_store %arg9[%c2_62, %c0_63, %c0_64], %110 {strides = array<i32>} : memref<4x8x1xf32, #tpu.memory_space<vmem>>, vector<1x8x1xf32>,
    %c2_65 = arith.constant 2 : index
    %c0_66 = arith.constant 0 : index
    %c0_67 = arith.constant 0 : index
    %111 = vector.load %arg10[%c2_65, %c0_66, %c0_67] : memref<4x8x8xf32, #tpu.memory_space<vmem>>, vector<1x8x8xf32>
    %112 = vector.shape_cast %111 : vector<1x8x8xf32> to vector<8x8xf32>
    %113 = vector.broadcast %98 : vector<8x1xf32> to vector<8x8xf32>
    %114 = arith.mulf %113, %112 : vector<8x8xf32>
    %115 = arith.truncf %101 : vector<8x8xf32> to vector<8x8xbf16>
    %116 = vector.extract_strided_slice %10 {offsets = [0, 16], sizes = [8, 8], strides = [1, 1]} : vector<8x32xbf16> to vector<8x8xbf16>
    %cst_68 = arith.constant dense<0.000000e+00> : vector<8x8xf32>
    %117 = tpu.matmul %115, %116, %cst_68 {dimension_numbers = #tpu.dot_dimension_numbers<[1], [0], [0], [1], [0, 0, 1, 1], [], []>} : vector<8x8xbf16>, vector<8x8xbf16>, vector<8x8xf32> -> vector<8x8xf32>
    %118 = arith.addf %114, %117 : vector<8x8xf32>
    %c2_69 = arith.constant 2 : index
    %c0_70 = arith.constant 0 : index
    %c0_71 = arith.constant 0 : index
    %119 = vector.load %arg10[%c2_69, %c0_70, %c0_71] : memref<4x8x8xf32, #tpu.memory_space<vmem>>, vector<1x8x8xf32>
    %120 = vector.shape_cast %119 : vector<1x8x8xf32> to vector<8x8xf32>
    %121 = vector.shape_cast %118 : vector<8x8xf32> to vector<1x8x8xf32>
    tpu.vector_store %arg10[%c2_69, %c0_70, %c0_71], %121 {strides = array<i32>} : memref<4x8x8xf32, #tpu.memory_space<vmem>>, vector<1x8x8xf32>,
    %c2_72 = arith.constant 2 : index
    %c0_73 = arith.constant 0 : index
    %c0_74 = arith.constant 0 : index
    %122 = vector.load %arg8[%c2_72, %c0_73, %c0_74] : memref<4x8x1xf32, #tpu.memory_space<vmem>>, vector<1x8x1xf32>
    %123 = vector.shape_cast %122 : vector<1x8x1xf32> to vector<8x1xf32>
    %124 = vector.shape_cast %96 : vector<8x1xf32> to vector<1x8x1xf32>
    tpu.vector_store %arg8[%c2_72, %c0_73, %c0_74], %124 {strides = array<i32>} : memref<4x8x1xf32, #tpu.memory_space<vmem>>, vector<1x8x1xf32>,
    %125 = vector.extract_strided_slice %6 {offsets = [0, 24], sizes = [8, 8], strides = [1, 1]} : vector<8x32xbf16> to vector<8x8xbf16>
    %126 = vector.extract_strided_slice %8 {offsets = [0, 24], sizes = [8, 8], strides = [1, 1]} : vector<8x32xbf16> to vector<8x8xbf16>
    %cst_75 = arith.constant dense<0.000000e+00> : vector<8x8xf32>
    %127 = tpu.matmul %125, %126, %cst_75 {dimension_numbers = #tpu.dot_dimension_numbers<[1], [1], [0], [0], [0, 0, 1, 0], [], []>} : vector<8x8xbf16>, vector<8x8xbf16>, vector<8x8xf32> -> vector<8x8xf32>
    %128 = vector.broadcast %4 : vector<1x8xf32> to vector<8x8xf32>
    %129 = arith.addf %127, %128 : vector<8x8xf32>
    %c3 = arith.constant 3 : index
    %c0_76 = arith.constant 0 : index
    %c0_77 = arith.constant 0 : index
    %130 = vector.load %arg8[%c3, %c0_76, %c0_77] : memref<4x8x1xf32, #tpu.memory_space<vmem>>, vector<1x8x1xf32>
    %131 = vector.shape_cast %130 : vector<1x8x1xf32> to vector<8x1xf32>
    %cst_78 = arith.constant dense<0xFF800000> : vector<8xf32>
    %132 = vector.multi_reduction <maximumf>, %129, %cst_78 [1] : vector<8x8xf32> to vector<8xf32>
    %133 = vector.shape_cast %132 : vector<8xf32> to vector<8x1xf32>
    %134 = arith.maximumf %131, %133 : vector<8x1xf32>
    %135 = arith.subf %131, %134 : vector<8x1xf32>
    %136 = math.exp %135 : vector<8x1xf32>
    %137 = vector.broadcast %134 : vector<8x1xf32> to vector<8x8xf32>
    %138 = arith.subf %129, %137 : vector<8x8xf32>
    %139 = math.exp %138 : vector<8x8xf32>
    %c3_79 = arith.constant 3 : index
    %c0_80 = arith.constant 0 : index
    %c0_81 = arith.constant 0 : index
    %140 = vector.load %arg9[%c3_79, %c0_80, %c0_81] : memref<4x8x1xf32, #tpu.memory_space<vmem>>, vector<1x8x1xf32>
    %141 = vector.shape_cast %140 : vector<1x8x1xf32> to vector<8x1xf32>
    %142 = arith.mulf %136, %141 : vector<8x1xf32>
    %cst_82 = arith.constant dense<0.000000e+00> : vector<8xf32>
    %143 = vector.multi_reduction <add>, %139, %cst_82 [1] : vector<8x8xf32> to vector<8xf32>
    %144 = vector.shape_cast %143 : vector<8xf32> to vector<8x1xf32>
    %145 = arith.addf %142, %144 : vector<8x1xf32>
    %c3_83 = arith.constant 3 : index
    %c0_84 = arith.constant 0 : index
    %c0_85 = arith.constant 0 : index
    %146 = vector.load %arg9[%c3_83, %c0_84, %c0_85] : memref<4x8x1xf32, #tpu.memory_space<vmem>>, vector<1x8x1xf32>
    %147 = vector.shape_cast %146 : vector<1x8x1xf32> to vector<8x1xf32>
    %148 = vector.shape_cast %145 : vector<8x1xf32> to vector<1x8x1xf32>
    tpu.vector_store %arg9[%c3_83, %c0_84, %c0_85], %148 {strides = array<i32>} : memref<4x8x1xf32, #tpu.memory_space<vmem>>, vector<1x8x1xf32>,
    %c3_86 = arith.constant 3 : index
    %c0_87 = arith.constant 0 : index
    %c0_88 = arith.constant 0 : index
    %149 = vector.load %arg10[%c3_86, %c0_87, %c0_88] : memref<4x8x8xf32, #tpu.memory_space<vmem>>, vector<1x8x8xf32>
    %150 = vector.shape_cast %149 : vector<1x8x8xf32> to vector<8x8xf32>
    %151 = vector.broadcast %136 : vector<8x1xf32> to vector<8x8xf32>
    %152 = arith.mulf %151, %150 : vector<8x8xf32>
    %153 = arith.truncf %139 : vector<8x8xf32> to vector<8x8xbf16>
    %154 = vector.extract_strided_slice %10 {offsets = [0, 24], sizes = [8, 8], strides = [1, 1]} : vector<8x32xbf16> to vector<8x8xbf16>
    %cst_89 = arith.constant dense<0.000000e+00> : vector<8x8xf32>
    %155 = tpu.matmul %153, %154, %cst_89 {dimension_numbers = #tpu.dot_dimension_numbers<[1], [0], [0], [1], [0, 0, 1, 1], [], []>} : vector<8x8xbf16>, vector<8x8xbf16>, vector<8x8xf32> -> vector<8x8xf32>
    %156 = arith.addf %152, %155 : vector<8x8xf32>
    %c3_90 = arith.constant 3 : index
    %c0_91 = arith.constant 0 : index
    %c0_92 = arith.constant 0 : index
    %157 = vector.load %arg10[%c3_90, %c0_91, %c0_92] : memref<4x8x8xf32, #tpu.memory_space<vmem>>, vector<1x8x8xf32>
    %158 = vector.shape_cast %157 : vector<1x8x8xf32> to vector<8x8xf32>
    %159 = vector.shape_cast %156 : vector<8x8xf32> to vector<1x8x8xf32>
    tpu.vector_store %arg10[%c3_90, %c0_91, %c0_92], %159 {strides = array<i32>} : memref<4x8x8xf32, #tpu.memory_space<vmem>>, vector<1x8x8xf32>,
    %c3_93 = arith.constant 3 : index
    %c0_94 = arith.constant 0 : index
    %c0_95 = arith.constant 0 : index
    %160 = vector.load %arg8[%c3_93, %c0_94, %c0_95] : memref<4x8x1xf32, #tpu.memory_space<vmem>>, vector<1x8x1xf32>
    %161 = vector.shape_cast %160 : vector<1x8x1xf32> to vector<8x1xf32>
    %162 = vector.shape_cast %134 : vector<8x1xf32> to vector<1x8x1xf32>
    tpu.vector_store %arg8[%c3_93, %c0_94, %c0_95], %162 {strides = array<i32>} : memref<4x8x1xf32, #tpu.memory_space<vmem>>, vector<1x8x1xf32>,
    %c0_i32_96 = arith.constant 0 : i32
    %163 = arith.cmpi eq, %arg2, %c0_i32_96 : i32
    %164 = arith.extui %163 : i1 to i32
    %c0_i32_97 = arith.constant 0 : i32
    %165 = arith.cmpi ne, %164, %c0_i32_97 : i32
    scf.if %165 {
      %c0_98 = arith.constant 0 : index
      %c0_99 = arith.constant 0 : index
      %c0_100 = arith.constant 0 : index
      %166 = vector.load %arg9[%c0_98, %c0_99, %c0_100] : memref<4x8x1xf32, #tpu.memory_space<vmem>>, vector<1x8x1xf32>
      %167 = vector.shape_cast %166 : vector<1x8x1xf32> to vector<8x1xf32>
      %168 = tpu.reciprocal %167 {approx = true} : vector<8x1xf32> -> vector<8x1xf32>
      %c0_101 = arith.constant 0 : index
      %c0_102 = arith.constant 0 : index
      %c0_103 = arith.constant 0 : index
      %169 = vector.load %arg10[%c0_101, %c0_102, %c0_103] : memref<4x8x8xf32, #tpu.memory_space<vmem>>, vector<1x8x8xf32>
      %170 = vector.shape_cast %169 : vector<1x8x8xf32> to vector<8x8xf32>
      %171 = vector.broadcast %168 : vector<8x1xf32> to vector<8x8xf32>
      %172 = arith.mulf %170, %171 : vector<8x8xf32>
      %173 = arith.truncf %172 : vector<8x8xf32> to vector<8x8xbf16>
      %c0_104 = arith.constant 0 : index
      %c0_105 = arith.constant 0 : index
      %c0_106 = arith.constant 0 : index
      %174 = vector.load %arg7[%c0_104, %c0_105, %c0_106] : memref<1x8x32xbf16, #tpu.memory_space<vmem>>, vector<1x8x8xbf16>
      %175 = vector.shape_cast %174 : vector<1x8x8xbf16> to vector<8x8xbf16>
      %176 = vector.shape_cast %173 : vector<8x8xbf16> to vector<1x8x8xbf16>
      tpu.vector_store %arg7[%c0_104, %c0_105, %c0_106], %176 {strides = array<i32>} : memref<1x8x32xbf16, #tpu.memory_space<vmem>>, vector<1x8x8xbf16>,
      %c1_107 = arith.constant 1 : index
      %c0_108 = arith.constant 0 : index
      %c0_109 = arith.constant 0 : index
      %177 = vector.load %arg9[%c1_107, %c0_108, %c0_109] : memref<4x8x1xf32, #tpu.memory_space<vmem>>, vector<1x8x1xf32>
      %178 = vector.shape_cast %177 : vector<1x8x1xf32> to vector<8x1xf32>
      %179 = tpu.reciprocal %178 {approx = true} : vector<8x1xf32> -> vector<8x1xf32>
      %c1_110 = arith.constant 1 : index
      %c0_111 = arith.constant 0 : index
      %c0_112 = arith.constant 0 : index
      %180 = vector.load %arg10[%c1_110, %c0_111, %c0_112] : memref<4x8x8xf32, #tpu.memory_space<vmem>>, vector<1x8x8xf32>
      %181 = vector.shape_cast %180 : vector<1x8x8xf32> to vector<8x8xf32>
      %182 = vector.broadcast %179 : vector<8x1xf32> to vector<8x8xf32>
      %183 = arith.mulf %181, %182 : vector<8x8xf32>
      %184 = arith.truncf %183 : vector<8x8xf32> to vector<8x8xbf16>
      %c0_113 = arith.constant 0 : index
      %c0_114 = arith.constant 0 : index
      %c8 = arith.constant 8 : index
      %185 = vector.load %arg7[%c0_113, %c0_114, %c8] : memref<1x8x32xbf16, #tpu.memory_space<vmem>>, vector<1x8x8xbf16>
      %186 = vector.shape_cast %185 : vector<1x8x8xbf16> to vector<8x8xbf16>
      %187 = vector.shape_cast %184 : vector<8x8xbf16> to vector<1x8x8xbf16>
      tpu.vector_store %arg7[%c0_113, %c0_114, %c8], %187 {strides = array<i32>} : memref<1x8x32xbf16, #tpu.memory_space<vmem>>, vector<1x8x8xbf16>,
      %c2_115 = arith.constant 2 : index
      %c0_116 = arith.constant 0 : index
      %c0_117 = arith.constant 0 : index
      %188 = vector.load %arg9[%c2_115, %c0_116, %c0_117] : memref<4x8x1xf32, #tpu.memory_space<vmem>>, vector<1x8x1xf32>
      %189 = vector.shape_cast %188 : vector<1x8x1xf32> to vector<8x1xf32>
      %190 = tpu.reciprocal %189 {approx = true} : vector<8x1xf32> -> vector<8x1xf32>
      %c2_118 = arith.constant 2 : index
      %c0_119 = arith.constant 0 : index
      %c0_120 = arith.constant 0 : index
      %191 = vector.load %arg10[%c2_118, %c0_119, %c0_120] : memref<4x8x8xf32, #tpu.memory_space<vmem>>, vector<1x8x8xf32>
      %192 = vector.shape_cast %191 : vector<1x8x8xf32> to vector<8x8xf32>
      %193 = vector.broadcast %190 : vector<8x1xf32> to vector<8x8xf32>
      %194 = arith.mulf %192, %193 : vector<8x8xf32>
      %195 = arith.truncf %194 : vector<8x8xf32> to vector<8x8xbf16>
      %c0_121 = arith.constant 0 : index
      %c0_122 = arith.constant 0 : index
      %c16 = arith.constant 16 : index
      %196 = vector.load %arg7[%c0_121, %c0_122, %c16] : memref<1x8x32xbf16, #tpu.memory_space<vmem>>, vector<1x8x8xbf16>
      %197 = vector.shape_cast %196 : vector<1x8x8xbf16> to vector<8x8xbf16>
      %198 = vector.shape_cast %195 : vector<8x8xbf16> to vector<1x8x8xbf16>
      tpu.vector_store %arg7[%c0_121, %c0_122, %c16], %198 {strides = array<i32>} : memref<1x8x32xbf16, #tpu.memory_space<vmem>>, vector<1x8x8xbf16>,
      %c3_123 = arith.constant 3 : index
      %c0_124 = arith.constant 0 : index
      %c0_125 = arith.constant 0 : index
      %199 = vector.load %arg9[%c3_123, %c0_124, %c0_125] : memref<4x8x1xf32, #tpu.memory_space<vmem>>, vector<1x8x1xf32>
      %200 = vector.shape_cast %199 : vector<1x8x1xf32> to vector<8x1xf32>
      %201 = tpu.reciprocal %200 {approx = true} : vector<8x1xf32> -> vector<8x1xf32>
      %c3_126 = arith.constant 3 : index
      %c0_127 = arith.constant 0 : index
      %c0_128 = arith.constant 0 : index
      %202 = vector.load %arg10[%c3_126, %c0_127, %c0_128] : memref<4x8x8xf32, #tpu.memory_space<vmem>>, vector<1x8x8xf32>
      %203 = vector.shape_cast %202 : vector<1x8x8xf32> to vector<8x8xf32>
      %204 = vector.broadcast %201 : vector<8x1xf32> to vector<8x8xf32>
      %205 = arith.mulf %203, %204 : vector<8x8xf32>
      %206 = arith.truncf %205 : vector<8x8xf32> to vector<8x8xbf16>
      %c0_129 = arith.constant 0 : index
      %c0_130 = arith.constant 0 : index
      %c24 = arith.constant 24 : index
      %207 = vector.load %arg7[%c0_129, %c0_130, %c24] : memref<1x8x32xbf16, #tpu.memory_space<vmem>>, vector<1x8x8xbf16>
      %208 = vector.shape_cast %207 : vector<1x8x8xbf16> to vector<8x8xbf16>
      %209 = vector.shape_cast %206 : vector<8x8xbf16> to vector<1x8x8xbf16>
      tpu.vector_store %arg7[%c0_129, %c0_130, %c24], %209 {strides = array<i32>} : memref<1x8x32xbf16, #tpu.memory_space<vmem>>, vector<1x8x8xbf16>,
    } else {
    }
    return
  }
  func.func @transform_0(%arg0: i32, %arg1: i32, %arg2: i32) -> (i32, i32, i32) {
    %c0_i32 = arith.constant 0 : i32
    %c0_i32_0 = arith.constant 0 : i32
    return %arg0, %arg1, %c0_i32 : i32, i32, i32
  }
  func.func @transform_1(%arg0: i32, %arg1: i32, %arg2: i32) -> (i32, i32, i32) {
    %c0_i32 = arith.constant 0 : i32
    %c0_i32_0 = arith.constant 0 : i32
    return %arg0, %arg2, %c0_i32 : i32, i32, i32
  }
  func.func @transform_2(%arg0: i32, %arg1: i32, %arg2: i32) -> (i32, i32, i32) {
    %c0_i32 = arith.constant 0 : i32
    %c0_i32_0 = arith.constant 0 : i32
    return %arg0, %arg2, %c0_i32 : i32, i32, i32
  }
  func.func @transform_3(%arg0: i32, %arg1: i32, %arg2: i32) -> (i32, i32, i32) {
    %c0_i32 = arith.constant 0 : i32
    %c0_i32_0 = arith.constant 0 : i32
    return %arg0, %c0_i32, %arg2 : i32, i32, i32
  }
  func.func @transform_4(%arg0: i32, %arg1: i32, %arg2: i32) -> (i32, i32, i32) {
    %c0_i32 = arith.constant 0 : i32
    %c0_i32_0 = arith.constant 0 : i32
    return %arg0, %arg1, %c0_i32 : i32, i32, i32
  }
}

module attributes {stable_mosaic.version = 11 : i64} {
  func.func @kernel(%arg0: i32, %arg1: i32, %arg2: i32, %arg3: memref<16x1024xbf16, #tpu.memory_space<vmem>>, %arg4: memref<1024x32xbf16, #tpu.memory_space<vmem>>, %arg5: memref<1x32xf32, #tpu.memory_space<vmem>>, %arg6: memref<16x32xf32, #tpu.memory_space<vmem>>, %arg7: memref<16x32xf32, #tpu.memory_space<vmem>>, %arg8: memref<16x32xf32, #tpu.memory_space<vmem>>) attributes {dimension_semantics = [#tpu.dimension_semantics<parallel>, #tpu.dimension_semantics<parallel>, #tpu.dimension_semantics<arbitrary>], iteration_bounds = array<i64: 1, 1, 2>, scalar_prefetch = 0 : i64, scratch_operands = 1 : i64, tpu.core_type = #tpu.core_type<tc>, window_params = [{transform_indices = @transform_0, window_bounds = array<i64: 16, 1024>}, {transform_indices = @transform_1, window_bounds = array<i64: 1024, 32>}, {transform_indices = @transform_2, window_bounds = array<i64: 1, 32>}, {transform_indices = @transform_3, window_bounds = array<i64: 16, 32>}, {transform_indices = @transform_4, window_bounds = array<i64: 16, 32>}]} {
    %c0_i32 = arith.constant 0 : i32
    %0 = arith.cmpi eq, %arg2, %c0_i32 : i32
    %1 = arith.extui %0 : i1 to i32
    %c0_i32_0 = arith.constant 0 : i32
    %2 = arith.cmpi ne, %1, %c0_i32_0 : i32
    scf.if %2 {
      %cst_9 = arith.constant 0.000000e+00 : f32
      %12 = vector.broadcast %cst_9 : f32 to vector<16x32xf32>
      %c0_10 = arith.constant 0 : index
      %c0_11 = arith.constant 0 : index
      %13 = vector.load %arg8[%c0_10, %c0_11] : memref<16x32xf32, #tpu.memory_space<vmem>>, vector<16x32xf32>
      tpu.vector_store %arg8[%c0_10, %c0_11], %12 {strides = array<i32>} : memref<16x32xf32, #tpu.memory_space<vmem>>, vector<16x32xf32>,
    } else {
    }
    %c0 = arith.constant 0 : index
    %c0_1 = arith.constant 0 : index
    %3 = vector.load %arg8[%c0, %c0_1] : memref<16x32xf32, #tpu.memory_space<vmem>>, vector<16x32xf32>
    %c0_2 = arith.constant 0 : index
    %c0_3 = arith.constant 0 : index
    %4 = vector.load %arg3[%c0_2, %c0_3] : memref<16x1024xbf16, #tpu.memory_space<vmem>>, vector<16x1024xbf16>
    %c0_4 = arith.constant 0 : index
    %c0_5 = arith.constant 0 : index
    %5 = vector.load %arg4[%c0_4, %c0_5] : memref<1024x32xbf16, #tpu.memory_space<vmem>>, vector<1024x32xbf16>
    %cst = arith.constant dense<0.000000e+00> : vector<16x32xf32>
    %6 = tpu.matmul %4, %5, %cst {dimension_numbers = #tpu.dot_dimension_numbers<[1], [0], [0], [1], [0, 0, 1, 1], [], []>} : vector<16x1024xbf16>, vector<1024x32xbf16>, vector<16x32xf32> -> vector<16x32xf32>
    %7 = arith.addf %3, %6 : vector<16x32xf32>
    %c0_6 = arith.constant 0 : index
    %c0_7 = arith.constant 0 : index
    %8 = vector.load %arg8[%c0_6, %c0_7] : memref<16x32xf32, #tpu.memory_space<vmem>>, vector<16x32xf32>
    tpu.vector_store %arg8[%c0_6, %c0_7], %7 {strides = array<i32>} : memref<16x32xf32, #tpu.memory_space<vmem>>, vector<16x32xf32>,
    %c1_i32 = arith.constant 1 : i32
    %9 = arith.cmpi eq, %arg2, %c1_i32 : i32
    %10 = arith.extui %9 : i1 to i32
    %c0_i32_8 = arith.constant 0 : i32
    %11 = arith.cmpi ne, %10, %c0_i32_8 : i32
    scf.if %11 {
      %c0_9 = arith.constant 0 : index
      %c0_10 = arith.constant 0 : index
      %12 = vector.load %arg8[%c0_9, %c0_10] : memref<16x32xf32, #tpu.memory_space<vmem>>, vector<16x32xf32>
      %c0_11 = arith.constant 0 : index
      %c0_12 = arith.constant 0 : index
      %13 = vector.load %arg5[%c0_11, %c0_12] : memref<1x32xf32, #tpu.memory_space<vmem>>, vector<1x32xf32>
      %14 = vector.broadcast %13 : vector<1x32xf32> to vector<16x32xf32>
      %15 = arith.addf %12, %14 : vector<16x32xf32>
      %c0_13 = arith.constant 0 : index
      %c0_14 = arith.constant 0 : index
      %16 = vector.load %arg6[%c0_13, %c0_14] : memref<16x32xf32, #tpu.memory_space<vmem>>, vector<16x32xf32>
      %17 = arith.addf %15, %16 : vector<16x32xf32>
      %c0_15 = arith.constant 0 : index
      %c0_16 = arith.constant 0 : index
      %18 = vector.load %arg7[%c0_15, %c0_16] : memref<16x32xf32, #tpu.memory_space<vmem>>, vector<16x32xf32>
      tpu.vector_store %arg7[%c0_15, %c0_16], %17 {strides = array<i32>} : memref<16x32xf32, #tpu.memory_space<vmem>>, vector<16x32xf32>,
    } else {
    }
    return
  }
  func.func @transform_0(%arg0: i32, %arg1: i32, %arg2: i32) -> (i32, i32) {
    %c0_i32 = arith.constant 0 : i32
    return %arg0, %arg2 : i32, i32
  }
  func.func @transform_1(%arg0: i32, %arg1: i32, %arg2: i32) -> (i32, i32) {
    %c0_i32 = arith.constant 0 : i32
    return %arg2, %arg1 : i32, i32
  }
  func.func @transform_2(%arg0: i32, %arg1: i32, %arg2: i32) -> (i32, i32) {
    %c0_i32 = arith.constant 0 : i32
    %c0_i32_0 = arith.constant 0 : i32
    return %c0_i32, %arg1 : i32, i32
  }
  func.func @transform_3(%arg0: i32, %arg1: i32, %arg2: i32) -> (i32, i32) {
    %c0_i32 = arith.constant 0 : i32
    return %arg0, %arg1 : i32, i32
  }
  func.func @transform_4(%arg0: i32, %arg1: i32, %arg2: i32) -> (i32, i32) {
    %c0_i32 = arith.constant 0 : i32
    return %arg0, %arg1 : i32, i32
  }
}

module attributes {stable_mosaic.version = 11 : i64} {
  func.func @kernel(%arg0: i32, %arg1: memref<16x32xf32, #tpu.memory_space<vmem>>, %arg2: memref<1x32xf32, #tpu.memory_space<vmem>>, %arg3: memref<1x32xf32, #tpu.memory_space<vmem>>, %arg4: memref<16x32xbf16, #tpu.memory_space<vmem>>) attributes {dimension_semantics = [#tpu.dimension_semantics<parallel>], iteration_bounds = array<i64: 1>, scalar_prefetch = 0 : i64, scratch_operands = 0 : i64, tpu.core_type = #tpu.core_type<tc>, window_params = [{transform_indices = @transform_0, window_bounds = array<i64: 16, 32>}, {pipeline_mode = #tpu.pipeline_mode<synchronous>, transform_indices = @transform_1, window_bounds = array<i64: 1, 32>}, {pipeline_mode = #tpu.pipeline_mode<synchronous>, transform_indices = @transform_2, window_bounds = array<i64: 1, 32>}, {transform_indices = @transform_3, window_bounds = array<i64: 16, 32>}]} {
    %c0 = arith.constant 0 : index
    %c0_0 = arith.constant 0 : index
    %0 = vector.load %arg1[%c0, %c0_0] : memref<16x32xf32, #tpu.memory_space<vmem>>, vector<16x32xf32>
    %cst = arith.constant dense<0.000000e+00> : vector<16xf32>
    %1 = vector.multi_reduction <add>, %0, %cst [1] : vector<16x32xf32> to vector<16xf32>
    %2 = vector.shape_cast %1 : vector<16xf32> to vector<16x1xf32>
    %cst_1 = arith.constant 3.200000e+01 : f32
    %3 = vector.broadcast %cst_1 : f32 to vector<16x1xf32>
    %4 = arith.divf %2, %3 : vector<16x1xf32>
    %5 = vector.broadcast %4 : vector<16x1xf32> to vector<16x32xf32>
    %6 = arith.subf %0, %5 : vector<16x32xf32>
    %7 = arith.mulf %6, %6 : vector<16x32xf32>
    %cst_2 = arith.constant dense<0.000000e+00> : vector<16xf32>
    %8 = vector.multi_reduction <add>, %7, %cst_2 [1] : vector<16x32xf32> to vector<16xf32>
    %9 = vector.shape_cast %8 : vector<16xf32> to vector<16x1xf32>
    %cst_3 = arith.constant 3.200000e+01 : f32
    %10 = vector.broadcast %cst_3 : f32 to vector<16x1xf32>
    %11 = arith.divf %9, %10 : vector<16x1xf32>
    %12 = vector.broadcast %4 : vector<16x1xf32> to vector<16x32xf32>
    %13 = arith.subf %0, %12 : vector<16x32xf32>
    %cst_4 = arith.constant 9.99999974E-6 : f32
    %14 = vector.broadcast %cst_4 : f32 to vector<16x1xf32>
    %15 = arith.addf %11, %14 : vector<16x1xf32>
    %16 = math.rsqrt %15 : vector<16x1xf32>
    %17 = vector.broadcast %16 : vector<16x1xf32> to vector<16x32xf32>
    %18 = arith.mulf %13, %17 : vector<16x32xf32>
    %c0_5 = arith.constant 0 : index
    %c0_6 = arith.constant 0 : index
    %19 = vector.load %arg2[%c0_5, %c0_6] : memref<1x32xf32, #tpu.memory_space<vmem>>, vector<1x32xf32>
    %20 = vector.broadcast %19 : vector<1x32xf32> to vector<16x32xf32>
    %21 = arith.mulf %18, %20 : vector<16x32xf32>
    %c0_7 = arith.constant 0 : index
    %c0_8 = arith.constant 0 : index
    %22 = vector.load %arg3[%c0_7, %c0_8] : memref<1x32xf32, #tpu.memory_space<vmem>>, vector<1x32xf32>
    %23 = vector.broadcast %22 : vector<1x32xf32> to vector<16x32xf32>
    %24 = arith.addf %21, %23 : vector<16x32xf32>
    %25 = arith.truncf %24 : vector<16x32xf32> to vector<16x32xbf16>
    %c0_9 = arith.constant 0 : index
    %c0_10 = arith.constant 0 : index
    %26 = vector.load %arg4[%c0_9, %c0_10] : memref<16x32xbf16, #tpu.memory_space<vmem>>, vector<16x32xbf16>
    tpu.vector_store %arg4[%c0_9, %c0_10], %25 {strides = array<i32>} : memref<16x32xbf16, #tpu.memory_space<vmem>>, vector<16x32xbf16>,
    return
  }
  func.func @transform_0(%arg0: i32) -> (i32, i32) {
    %c0_i32 = arith.constant 0 : i32
    %c0_i32_0 = arith.constant 0 : i32
    return %arg0, %c0_i32 : i32, i32
  }
  func.func @transform_1(%arg0: i32) -> (i32, i32) {
    %c0_i32 = arith.constant 0 : i32
    %c0_i32_0 = arith.constant 0 : i32
    %c0_i32_1 = arith.constant 0 : i32
    return %c0_i32, %c0_i32_0 : i32, i32
  }
  func.func @transform_2(%arg0: i32) -> (i32, i32) {
    %c0_i32 = arith.constant 0 : i32
    %c0_i32_0 = arith.constant 0 : i32
    %c0_i32_1 = arith.constant 0 : i32
    return %c0_i32, %c0_i32_0 : i32, i32
  }
  func.func @transform_3(%arg0: i32) -> (i32, i32) {
    %c0_i32 = arith.constant 0 : i32
    %c0_i32_0 = arith.constant 0 : i32
    return %arg0, %c0_i32 : i32, i32
  }
}

module attributes {stable_mosaic.version = 11 : i64} {
  func.func @kernel(%arg0: i32, %arg1: i32, %arg2: i32, %arg3: memref<16x32xbf16, #tpu.memory_space<vmem>>, %arg4: memref<32x64xbf16, #tpu.memory_space<vmem>>, %arg5: memref<1x64xf32, #tpu.memory_space<vmem>>, %arg6: memref<16x64xbf16, #tpu.memory_space<vmem>>, %arg7: memref<16x64xf32, #tpu.memory_space<vmem>>) attributes {dimension_semantics = [#tpu.dimension_semantics<parallel>, #tpu.dimension_semantics<parallel>, #tpu.dimension_semantics<arbitrary>], iteration_bounds = array<i64: 1, 1, 1>, scalar_prefetch = 0 : i64, scratch_operands = 1 : i64, tpu.core_type = #tpu.core_type<tc>, window_params = [{transform_indices = @transform_0, window_bounds = array<i64: 16, 32>}, {transform_indices = @transform_1, window_bounds = array<i64: 32, 64>}, {transform_indices = @transform_2, window_bounds = array<i64: 1, 64>}, {transform_indices = @transform_3, window_bounds = array<i64: 16, 64>}]} {
    %c0_i32 = arith.constant 0 : i32
    %0 = arith.cmpi eq, %arg2, %c0_i32 : i32
    %1 = arith.extui %0 : i1 to i32
    %c0_i32_0 = arith.constant 0 : i32
    %2 = arith.cmpi ne, %1, %c0_i32_0 : i32
    scf.if %2 {
      %cst_10 = arith.constant 0.000000e+00 : f32
      %12 = vector.broadcast %cst_10 : f32 to vector<16x64xf32>
      %c0_11 = arith.constant 0 : index
      %c0_12 = arith.constant 0 : index
      %13 = vector.load %arg7[%c0_11, %c0_12] : memref<16x64xf32, #tpu.memory_space<vmem>>, vector<16x64xf32>
      tpu.vector_store %arg7[%c0_11, %c0_12], %12 {strides = array<i32>} : memref<16x64xf32, #tpu.memory_space<vmem>>, vector<16x64xf32>,
    } else {
    }
    %c0 = arith.constant 0 : index
    %c0_1 = arith.constant 0 : index
    %3 = vector.load %arg7[%c0, %c0_1] : memref<16x64xf32, #tpu.memory_space<vmem>>, vector<16x64xf32>
    %c0_2 = arith.constant 0 : index
    %c0_3 = arith.constant 0 : index
    %4 = vector.load %arg3[%c0_2, %c0_3] : memref<16x32xbf16, #tpu.memory_space<vmem>>, vector<16x32xbf16>
    %c0_4 = arith.constant 0 : index
    %c0_5 = arith.constant 0 : index
    %5 = vector.load %arg4[%c0_4, %c0_5] : memref<32x64xbf16, #tpu.memory_space<vmem>>, vector<32x64xbf16>
    %cst = arith.constant dense<0.000000e+00> : vector<16x64xf32>
    %6 = tpu.matmul %4, %5, %cst {dimension_numbers = #tpu.dot_dimension_numbers<[1], [0], [0], [1], [0, 0, 1, 1], [], []>} : vector<16x32xbf16>, vector<32x64xbf16>, vector<16x64xf32> -> vector<16x64xf32>
    %7 = arith.addf %3, %6 : vector<16x64xf32>
    %c0_6 = arith.constant 0 : index
    %c0_7 = arith.constant 0 : index
    %8 = vector.load %arg7[%c0_6, %c0_7] : memref<16x64xf32, #tpu.memory_space<vmem>>, vector<16x64xf32>
    tpu.vector_store %arg7[%c0_6, %c0_7], %7 {strides = array<i32>} : memref<16x64xf32, #tpu.memory_space<vmem>>, vector<16x64xf32>,
    %c0_i32_8 = arith.constant 0 : i32
    %9 = arith.cmpi eq, %arg2, %c0_i32_8 : i32
    %10 = arith.extui %9 : i1 to i32
    %c0_i32_9 = arith.constant 0 : i32
    %11 = arith.cmpi ne, %10, %c0_i32_9 : i32
    scf.if %11 {
      %c0_10 = arith.constant 0 : index
      %c0_11 = arith.constant 0 : index
      %12 = vector.load %arg7[%c0_10, %c0_11] : memref<16x64xf32, #tpu.memory_space<vmem>>, vector<16x64xf32>
      %c0_12 = arith.constant 0 : index
      %c0_13 = arith.constant 0 : index
      %13 = vector.load %arg5[%c0_12, %c0_13] : memref<1x64xf32, #tpu.memory_space<vmem>>, vector<1x64xf32>
      %14 = vector.broadcast %13 : vector<1x64xf32> to vector<16x64xf32>
      %15 = arith.addf %12, %14 : vector<16x64xf32>
      %16 = arith.truncf %15 : vector<16x64xf32> to vector<16x64xbf16>
      %c0_14 = arith.constant 0 : index
      %c0_15 = arith.constant 0 : index
      %17 = vector.load %arg6[%c0_14, %c0_15] : memref<16x64xbf16, #tpu.memory_space<vmem>>, vector<16x64xbf16>
      tpu.vector_store %arg6[%c0_14, %c0_15], %16 {strides = array<i32>} : memref<16x64xbf16, #tpu.memory_space<vmem>>, vector<16x64xbf16>,
    } else {
    }
    return
  }
  func.func @transform_0(%arg0: i32, %arg1: i32, %arg2: i32) -> (i32, i32) {
    %c0_i32 = arith.constant 0 : i32
    return %arg0, %arg2 : i32, i32
  }
  func.func @transform_1(%arg0: i32, %arg1: i32, %arg2: i32) -> (i32, i32) {
    %c0_i32 = arith.constant 0 : i32
    return %arg2, %arg1 : i32, i32
  }
  func.func @transform_2(%arg0: i32, %arg1: i32, %arg2: i32) -> (i32, i32) {
    %c0_i32 = arith.constant 0 : i32
    %c0_i32_0 = arith.constant 0 : i32
    return %c0_i32, %arg1 : i32, i32
  }
  func.func @transform_3(%arg0: i32, %arg1: i32, %arg2: i32) -> (i32, i32) {
    %c0_i32 = arith.constant 0 : i32
    return %arg0, %arg1 : i32, i32
  }
}

module attributes {stable_mosaic.version = 11 : i64} {
  func.func @kernel(%arg0: i32, %arg1: i32, %arg2: i32, %arg3: memref<16x32xbf16, #tpu.memory_space<vmem>>, %arg4: memref<32x256xbf16, #tpu.memory_space<vmem>>, %arg5: memref<1x256xf32, #tpu.memory_space<vmem>>, %arg6: memref<16x256xf32, #tpu.memory_space<vmem>>, %arg7: memref<16x256xf32, #tpu.memory_space<vmem>>) attributes {dimension_semantics = [#tpu.dimension_semantics<parallel>, #tpu.dimension_semantics<parallel>, #tpu.dimension_semantics<arbitrary>], iteration_bounds = array<i64: 1, 1, 1>, scalar_prefetch = 0 : i64, scratch_operands = 1 : i64, tpu.core_type = #tpu.core_type<tc>, window_params = [{transform_indices = @transform_0, window_bounds = array<i64: 16, 32>}, {transform_indices = @transform_1, window_bounds = array<i64: 32, 256>}, {transform_indices = @transform_2, window_bounds = array<i64: 1, 256>}, {transform_indices = @transform_3, window_bounds = array<i64: 16, 256>}]} {
    %c0_i32 = arith.constant 0 : i32
    %0 = arith.cmpi eq, %arg2, %c0_i32 : i32
    %1 = arith.extui %0 : i1 to i32
    %c0_i32_0 = arith.constant 0 : i32
    %2 = arith.cmpi ne, %1, %c0_i32_0 : i32
    scf.if %2 {
      %cst_10 = arith.constant 0.000000e+00 : f32
      %12 = vector.broadcast %cst_10 : f32 to vector<16x256xf32>
      %c0_11 = arith.constant 0 : index
      %c0_12 = arith.constant 0 : index
      %13 = vector.load %arg7[%c0_11, %c0_12] : memref<16x256xf32, #tpu.memory_space<vmem>>, vector<16x256xf32>
      tpu.vector_store %arg7[%c0_11, %c0_12], %12 {strides = array<i32>} : memref<16x256xf32, #tpu.memory_space<vmem>>, vector<16x256xf32>,
    } else {
    }
    %c0 = arith.constant 0 : index
    %c0_1 = arith.constant 0 : index
    %3 = vector.load %arg7[%c0, %c0_1] : memref<16x256xf32, #tpu.memory_space<vmem>>, vector<16x256xf32>
    %c0_2 = arith.constant 0 : index
    %c0_3 = arith.constant 0 : index
    %4 = vector.load %arg3[%c0_2, %c0_3] : memref<16x32xbf16, #tpu.memory_space<vmem>>, vector<16x32xbf16>
    %c0_4 = arith.constant 0 : index
    %c0_5 = arith.constant 0 : index
    %5 = vector.load %arg4[%c0_4, %c0_5] : memref<32x256xbf16, #tpu.memory_space<vmem>>, vector<32x256xbf16>
    %cst = arith.constant dense<0.000000e+00> : vector<16x256xf32>
    %6 = tpu.matmul %4, %5, %cst {dimension_numbers = #tpu.dot_dimension_numbers<[1], [0], [0], [1], [0, 0, 1, 1], [], []>} : vector<16x32xbf16>, vector<32x256xbf16>, vector<16x256xf32> -> vector<16x256xf32>
    %7 = arith.addf %3, %6 : vector<16x256xf32>
    %c0_6 = arith.constant 0 : index
    %c0_7 = arith.constant 0 : index
    %8 = vector.load %arg7[%c0_6, %c0_7] : memref<16x256xf32, #tpu.memory_space<vmem>>, vector<16x256xf32>
    tpu.vector_store %arg7[%c0_6, %c0_7], %7 {strides = array<i32>} : memref<16x256xf32, #tpu.memory_space<vmem>>, vector<16x256xf32>,
    %c0_i32_8 = arith.constant 0 : i32
    %9 = arith.cmpi eq, %arg2, %c0_i32_8 : i32
    %10 = arith.extui %9 : i1 to i32
    %c0_i32_9 = arith.constant 0 : i32
    %11 = arith.cmpi ne, %10, %c0_i32_9 : i32
    scf.if %11 {
      %c0_10 = arith.constant 0 : index
      %c0_11 = arith.constant 0 : index
      %12 = vector.load %arg7[%c0_10, %c0_11] : memref<16x256xf32, #tpu.memory_space<vmem>>, vector<16x256xf32>
      %c0_12 = arith.constant 0 : index
      %c0_13 = arith.constant 0 : index
      %13 = vector.load %arg5[%c0_12, %c0_13] : memref<1x256xf32, #tpu.memory_space<vmem>>, vector<1x256xf32>
      %14 = vector.broadcast %13 : vector<1x256xf32> to vector<16x256xf32>
      %15 = arith.addf %12, %14 : vector<16x256xf32>
      %c0_14 = arith.constant 0 : index
      %c0_15 = arith.constant 0 : index
      %16 = vector.load %arg6[%c0_14, %c0_15] : memref<16x256xf32, #tpu.memory_space<vmem>>, vector<16x256xf32>
      tpu.vector_store %arg6[%c0_14, %c0_15], %15 {strides = array<i32>} : memref<16x256xf32, #tpu.memory_space<vmem>>, vector<16x256xf32>,
    } else {
    }
    return
  }
  func.func @transform_0(%arg0: i32, %arg1: i32, %arg2: i32) -> (i32, i32) {
    %c0_i32 = arith.constant 0 : i32
    return %arg0, %arg2 : i32, i32
  }
  func.func @transform_1(%arg0: i32, %arg1: i32, %arg2: i32) -> (i32, i32) {
    %c0_i32 = arith.constant 0 : i32
    return %arg2, %arg1 : i32, i32
  }
  func.func @transform_2(%arg0: i32, %arg1: i32, %arg2: i32) -> (i32, i32) {
    %c0_i32 = arith.constant 0 : i32
    %c0_i32_0 = arith.constant 0 : i32
    return %c0_i32, %arg1 : i32, i32
  }
  func.func @transform_3(%arg0: i32, %arg1: i32, %arg2: i32) -> (i32, i32) {
    %c0_i32 = arith.constant 0 : i32
    return %arg0, %arg1 : i32, i32
  }
}

</mosaic_0001>

<bundles_post_ra>
// kernel: transformer_forward.42
= control target key start
LH: loop header
LB: loop body
LE: loop exit
PB: predicated region body
PF: predicated region fallthrough
CT: control target
= control target key end

     0   :  { %vm27_vm0 = vcmask 261120   ;;  %v188_v15 = vmov 0.0   ;;  %vm189_vm1 = vmmov 0   ;;  %vm152_vm2 = vcmask 781312   ;;  %s253_s0 = inlined_call_operand.vmem [shape: f32[16,32], index: 0, kind: input, shape index: {}]   ;;  %s254_s3 = inlined_call_operand.vmem [shape: bf16[32,96], index: 3, kind: input, shape index: {}]   ;;  %s255_s1 = inlined_call_operand.vmem [shape: f32[1,32], index: 1, kind: input, shape index: {}]   ;;  %s256_s2 = inlined_call_operand.vmem [shape: f32[1,32], index: 2, kind: input, shape index: {}]   ;;  %s257_s4 = inlined_call_operand.vmem [shape: f32[1,96], index: 4, kind: input, shape index: {}]   ;;  %s258_s5 = inlined_call_operand.vmem [shape: bf16[16,96], index: 5, kind: output, shape index: {}]  }
   0x1   :  { %v25_v0 = vld [vmem:[%s253_s0] sm:$0xff]  ;;  %v26_v1 = vld [vmem:[%s253_s0 + $0x8] sm:$0xff]  ;;  %172 = vmatprep.subr.bf16.mxu0 %v188_v15  ;;  %176 = vmatprep.mubr.msk.bf16.mxu0 %vm189_vm1, %v188_v15 }
   0x2   :  { %v28_v2 = vsel %vm27_vm0, %v25_v0, 0.0  ;;  %v31_v3 = vsel %vm27_vm0, %v26_v1, 0.0  ;;  %v182_v14 = vld [vmem:[%s254_s3] sm:$0xff]   ;;  %v183_v16 = vld [vmem:[%s254_s3 + $0x8] sm:$0xff]  }
   0x3   :  { %29 = vadd.xlane.f32.xlu0 %v28_v2  ;;  %173 = vmatpush3.bf16.msra.mxu0 %v182_v14  ;;  %v159_v25 = vld [vmem:[%s255_s1] ss:$0 sm:$0xff] }
   0x4   :  { %174 = vmatprep.subr.bf16.mxu0 %v188_v15  ;;  %v160_v29 = vld [vmem:[%s256_s2] ss:$0 sm:$0xff] }
   0x5   :  { %v161_v35 = vld [vmem:[%s257_s4] ss:$0 sm:$0xff] }
   0x7   :  { %32 = vadd.xlane.f32.xlu0 %v31_v3  ;;  %175 = vmatpush3.bf16.msra.mxu0 %v183_v16 }
  0x90   :  { %v30_v4 = vpop.xlane.xlu0 %29 }
  0x91   :  { %v35_v5 = vmul.f32 0.03125, %v30_v4 }
  0x93   :  { %v37_v6 = vsub.f32 %v25_v0, %v35_v5 }
  0x94   :  { %v33_v7 = vpop.xlane.xlu0 %32 }
  0x95   :  { %v36_v8 = vmul.f32 0.03125, %v33_v7  ;;  %v39_v9 = vmul.f32 %v37_v6, %v37_v6 }
  0x97   :  { %v38_v10 = vsub.f32 %v26_v1, %v36_v8  ;;  %v41_v11 = vsel %vm27_vm0, %v39_v9, 0.0 }
  0x98   :  { %42 = vadd.xlane.f32.xlu1 %v41_v11 }
  0x99   :  { %v40_v12 = vmul.f32 %v38_v10, %v38_v10 }
  0x9b   :  { %v44_v13 = vsel %vm27_vm0, %v40_v12, 0.0 }
  0x9c   :  { %45 = vadd.xlane.f32.xlu1 %v44_v13 }
 0x125   :  { %v43_v17 = vpop.xlane.xlu1 %42 }
 0x126   :  { %v47_v18 = vmul.f32 0.03125, %v43_v17 }
 0x128   :  { %v49_v19 = vadd.f32 1e-05, %v47_v18 }
 0x129   :  { %v46_v20 = vpop.xlane.xlu1 %45 }
 0x12a   :  { %184 = vrsqrt.f32 %v49_v19  ;;  %v48_v21 = vmul.f32 0.03125, %v46_v20 }
 0x12c   :  { %v50_v22 = vadd.f32 1e-05, %v48_v21 }
 0x12e   :  { %186 = vrsqrt.f32 %v50_v22 }
 0x134   :  { %v185_v23 = vpop.eup %184 }
 0x135   :  { %v53_v24 = vmul.f32 %v185_v23, %v37_v6 }
 0x137   :  { %v62_v27 = vmul.f32 %v159_v25, %v53_v24 }
 0x138   :  { %v187_v26 = vpop.eup %186 }
 0x139   :  { %v54_v28 = vmul.f32 %v187_v26, %v38_v10  ;;  %v71_v31 = vadd.f32 %v160_v29, %v62_v27 }
 0x13b   :  { %v63_v30 = vmul.f32 %v159_v25, %v54_v28 }
 0x13d   :  { %v72_v32 = vadd.f32 %v160_v29, %v63_v30 }
 0x13f   :  { %v73_v33 = vpack.c.bf16 %v72_v32, %v71_v31 }
 0x141   :  { %74 = vst.msk [vmem:[#allocation2] sm:$0xff] %vm27_vm0, %v73_v33 }
 0x148   :  { %v75_v34 = vld [vmem:[#allocation2] sm:$0xff] }
 0x149   :  { %177 = vmatmul.mubr.msk.bf16.vlgmr.msra.gmra.mrb[0].mxu0 %vm27_vm0, %v75_v34 }
 0x21c   :  { %v137_v36 = vpop.f32.mrb[0].mxu0 }
 0x21d   :  { %v138_v37 = vadd.f32 %v161_v35, %v137_v36  ;;  %v178_v38 = vpop.f32.mrb[1].mxu0 }
 0x21e   :  { %v140_v39 = vpop.f32.mrb[2].mxu0 }
 0x21f   :  { %v167_v40 = vpack.c.bf16 %v138_v37, %v138_v37  ;;  %v141_v41 = vadd.f32 %v161_v35, %v140_v39  ;;  %v179_v42 = vpop.f32.mrb[3].mxu0 }
 0x221   :  { %153 = vst.msk [vmem:[%s258_s5] sm:$0xf] %vm152_vm2, %v167_v40  ;;  %v168_v43 = vpack.c.bf16 %v141_v41, %v141_v41 }
 0x223   :  { %154 = vst.msk [vmem:[%s258_s5 + $0x4] sm:$0xf] %vm152_vm2, %v168_v43 }

// kernel: transformer_forward.44
= control target key start
LH: loop header
LB: loop body
LE: loop exit
PB: predicated region body
PF: predicated region fallthrough
CT: control target
= control target key end

     0   :  { %vm22_vm0 = vcmask 261120   ;;  %v144_v0 = vmov 0.0   ;;  %vm145_vm1 = vmmov 0   ;;  %s202_s1 = inlined_call_operand.vmem [shape: bf16[32,32], index: 1, kind: input, shape index: {}]   ;;  %s203_s0 = inlined_call_operand.vmem [shape: bf16[16,32], index: 0, kind: input, shape index: {}]   ;;  %s204_s2 = inlined_call_operand.vmem [shape: f32[1,32], index: 2, kind: input, shape index: {}]   ;;  %s205_s3 = inlined_call_operand.vmem [shape: f32[16,32], index: 3, kind: input, shape index: {}]   ;;  %s206_s4 = inlined_call_operand.vmem [shape: f32[16,32], index: 4, kind: output, shape index: {}]  }
   0x1   :  { %131 = vmatprep.subr.bf16.mxu0 %v144_v0  ;;  %v141_v1 = vld [vmem:[%s202_s1] sm:$0xff]   ;;  %135 = vmatprep.mubr.msk.bf16.mxu0 %vm145_vm1, %v144_v0  ;;  %23 = vst.msk [vmem:[#allocation2] sm:$0xff] %vm22_vm0, %v144_v0  ;;  %24 = vst.msk [vmem:[#allocation2 + $0x8] sm:$0xff] %vm22_vm0, %v144_v0  ;;  %v142_v2 = vld [vmem:[%s202_s1 + $0x8] sm:$0xff]  }
   0x2   :  { %132 = vmatpush3.bf16.msra.mxu0 %v141_v1  ;;  %v143_v3 = vld [vmem:[%s203_s0] sm:$0xff]   ;;  %v114_v17 = vld [vmem:[%s205_s3 + $0x8] sm:$0xff] }
   0x3   :  { %133 = vmatprep.subr.bf16.mxu0 %v144_v0  ;;  %v127_v12 = vld [vmem:[%s204_s2] ss:$0 sm:$0xff] }
   0x4   :  { %v113_v14 = vld [vmem:[%s205_s3] sm:$0xff] }
   0x6   :  { %134 = vmatpush3.bf16.msra.mxu0 %v142_v2 }
   0x8   :  { %v25_v4 = vld [vmem:[#allocation2] sm:$0xff]  ;;  %v26_v6 = vld [vmem:[#allocation2 + $0x8] sm:$0xff] }
   0x9   :  { %136 = vmatmul.mubr.msk.bf16.vlgmr.msra.gmra.mrb[0].mxu0 %vm22_vm0, %v143_v3 }
  0xdc   :  { %v88_v5 = vpop.f32.mrb[0].mxu0 }
  0xdd   :  { %v95_v7 = vadd.f32 %v88_v5, %v25_v4  ;;  %v137_v8 = vpop.f32.mrb[1].mxu0 }
  0xde   :  { %v91_v9 = vpop.f32.mrb[2].mxu0 }
  0xdf   :  { %97 = vst.msk [vmem:[#allocation2] sm:$0xff] %vm22_vm0, %v95_v7  ;;  %v96_v10 = vadd.f32 %v91_v9, %v26_v6  ;;  %v138_v11 = vpop.f32.mrb[3].mxu0 }
  0xe1   :  { %98 = vst.msk [vmem:[#allocation2 + $0x8] sm:$0xff] %vm22_vm0, %v96_v10 }
  0xe6   :  { %v102_v13 = vld [vmem:[#allocation2] sm:$0xff] }
  0xe7   :  { %v111_v15 = vadd.f32 %v127_v12, %v102_v13 }
  0xe8   :  { %v103_v16 = vld [vmem:[#allocation2 + $0x8] sm:$0xff] }
  0xe9   :  { %v115_v18 = vadd.f32 %v113_v14, %v111_v15  ;;  %v112_v19 = vadd.f32 %v127_v12, %v103_v16 }
  0xeb   :  { %117 = vst.msk [vmem:[%s206_s4] sm:$0xff] %vm22_vm0, %v115_v18  ;;  %v116_v20 = vadd.f32 %v114_v17, %v112_v19 }
  0xed   :  { %118 = vst.msk [vmem:[%s206_s4 + $0x8] sm:$0xff] %vm22_vm0, %v116_v20 }

// kernel: transformer_forward.45
= control target key start
LH: loop header
LB: loop body
LE: loop exit
PB: predicated region body
PF: predicated region fallthrough
CT: control target
= control target key end

     0   :  { %vm27_vm0 = vcmask 261120   ;;  %v188_v15 = vmov 0.0   ;;  %vm189_vm1 = vmmov 0   ;;  %vm152_vm2 = vcmask 257024   ;;  %s253_s0 = inlined_call_operand.vmem [shape: f32[16,32], index: 0, kind: input, shape index: {}]   ;;  %s254_s3 = inlined_call_operand.vmem [shape: bf16[32,32], index: 3, kind: input, shape index: {}]   ;;  %s255_s1 = inlined_call_operand.vmem [shape: f32[1,32], index: 1, kind: input, shape index: {}]   ;;  %s256_s2 = inlined_call_operand.vmem [shape: f32[1,32], index: 2, kind: input, shape index: {}]   ;;  %s257_s4 = inlined_call_operand.vmem [shape: f32[1,32], index: 4, kind: input, shape index: {}]   ;;  %s258_s5 = inlined_call_operand.vmem [shape: bf16[16,32], index: 5, kind: output, shape index: {}]  }
   0x1   :  { %v25_v0 = vld [vmem:[%s253_s0] sm:$0xff]  ;;  %v26_v1 = vld [vmem:[%s253_s0 + $0x8] sm:$0xff]  ;;  %172 = vmatprep.subr.bf16.mxu0 %v188_v15  ;;  %176 = vmatprep.mubr.msk.bf16.mxu0 %vm189_vm1, %v188_v15 }
   0x2   :  { %v28_v2 = vsel %vm27_vm0, %v25_v0, 0.0  ;;  %v31_v3 = vsel %vm27_vm0, %v26_v1, 0.0  ;;  %v182_v14 = vld [vmem:[%s254_s3] sm:$0xff]   ;;  %v183_v16 = vld [vmem:[%s254_s3 + $0x8] sm:$0xff]  }
   0x3   :  { %29 = vadd.xlane.f32.xlu0 %v28_v2  ;;  %173 = vmatpush3.bf16.msra.mxu0 %v182_v14  ;;  %v159_v25 = vld [vmem:[%s255_s1] ss:$0 sm:$0xff] }
   0x4   :  { %174 = vmatprep.subr.bf16.mxu0 %v188_v15  ;;  %v160_v29 = vld [vmem:[%s256_s2] ss:$0 sm:$0xff] }
   0x5   :  { %v161_v35 = vld [vmem:[%s257_s4] ss:$0 sm:$0xff] }
   0x7   :  { %32 = vadd.xlane.f32.xlu0 %v31_v3  ;;  %175 = vmatpush3.bf16.msra.mxu0 %v183_v16 }
  0x90   :  { %v30_v4 = vpop.xlane.xlu0 %29 }
  0x91   :  { %v35_v5 = vmul.f32 0.03125, %v30_v4 }
  0x93   :  { %v37_v6 = vsub.f32 %v25_v0, %v35_v5 }
  0x94   :  { %v33_v7 = vpop.xlane.xlu0 %32 }
  0x95   :  { %v36_v8 = vmul.f32 0.03125, %v33_v7  ;;  %v39_v9 = vmul.f32 %v37_v6, %v37_v6 }
  0x97   :  { %v38_v10 = vsub.f32 %v26_v1, %v36_v8  ;;  %v41_v11 = vsel %vm27_vm0, %v39_v9, 0.0 }
  0x98   :  { %42 = vadd.xlane.f32.xlu1 %v41_v11 }
  0x99   :  { %v40_v12 = vmul.f32 %v38_v10, %v38_v10 }
  0x9b   :  { %v44_v13 = vsel %vm27_vm0, %v40_v12, 0.0 }
  0x9c   :  { %45 = vadd.xlane.f32.xlu1 %v44_v13 }
 0x125   :  { %v43_v17 = vpop.xlane.xlu1 %42 }
 0x126   :  { %v47_v18 = vmul.f32 0.03125, %v43_v17 }
 0x128   :  { %v49_v19 = vadd.f32 1e-05, %v47_v18 }
 0x129   :  { %v46_v20 = vpop.xlane.xlu1 %45 }
 0x12a   :  { %184 = vrsqrt.f32 %v49_v19  ;;  %v48_v21 = vmul.f32 0.03125, %v46_v20 }
 0x12c   :  { %v50_v22 = vadd.f32 1e-05, %v48_v21 }
 0x12e   :  { %186 = vrsqrt.f32 %v50_v22 }
 0x134   :  { %v185_v23 = vpop.eup %184 }
 0x135   :  { %v53_v24 = vmul.f32 %v185_v23, %v37_v6 }
 0x137   :  { %v62_v27 = vmul.f32 %v159_v25, %v53_v24 }
 0x138   :  { %v187_v26 = vpop.eup %186 }
 0x139   :  { %v54_v28 = vmul.f32 %v187_v26, %v38_v10  ;;  %v71_v31 = vadd.f32 %v160_v29, %v62_v27 }
 0x13b   :  { %v63_v30 = vmul.f32 %v159_v25, %v54_v28 }
 0x13d   :  { %v72_v32 = vadd.f32 %v160_v29, %v63_v30 }
 0x13f   :  { %v73_v33 = vpack.c.bf16 %v72_v32, %v71_v31 }
 0x141   :  { %74 = vst.msk [vmem:[#allocation2] sm:$0xff] %vm27_vm0, %v73_v33 }
 0x148   :  { %v75_v34 = vld [vmem:[#allocation2] sm:$0xff] }
 0x149   :  { %177 = vmatmul.mubr.msk.bf16.vlgmr.msra.gmra.mrb[0].mxu0 %vm27_vm0, %v75_v34 }
 0x21c   :  { %v137_v36 = vpop.f32.mrb[0].mxu0 }
 0x21d   :  { %v138_v37 = vadd.f32 %v161_v35, %v137_v36  ;;  %v178_v38 = vpop.f32.mrb[1].mxu0 }
 0x21e   :  { %v140_v39 = vpop.f32.mrb[2].mxu0 }
 0x21f   :  { %v167_v40 = vpack.c.bf16 %v138_v37, %v138_v37  ;;  %v141_v41 = vadd.f32 %v161_v35, %v140_v39  ;;  %v179_v42 = vpop.f32.mrb[3].mxu0 }
 0x221   :  { %153 = vst.msk [vmem:[%s258_s5] sm:$0xf] %vm152_vm2, %v167_v40  ;;  %v168_v43 = vpack.c.bf16 %v141_v41, %v141_v41 }
 0x223   :  { %154 = vst.msk [vmem:[%s258_s5 + $0x4] sm:$0xf] %vm152_vm2, %v168_v43 }

// kernel: transformer_forward.43
= control target key start
LH: loop header
LB: loop body
LE: loop exit
PB: predicated region body
PF: predicated region fallthrough
CT: control target
= control target key end

     0   :  { %s1310_s15 = smov 0   ;;  %s1312_s16 = smov 0   ;;  %s1489_s0 = inlined_call_operand.vmem [shape: bf16[2,8,32], index: 0, kind: input, shape index: {}]   ;;  %s1490_s1 = inlined_call_operand.vmem [shape: bf16[2,8,32], index: 1, kind: input, shape index: {}]   ;;  %s1491_s2 = inlined_call_operand.vmem [shape: bf16[2,8,32], index: 2, kind: input, shape index: {}]   ;;  %s1492_s3 = inlined_call_operand.vmem [shape: f32[2,1,8], index: 3, kind: input, shape index: {}]   ;;  %s1493_s4 = inlined_call_operand.vmem [shape: bf16[2,8,32], index: 4, kind: output, shape index: {}]  }
   0x1   :  { %s1314_s17 = smov 0  }
   0x2 LB: > { %s33_s18 = sadd.s32 1, %s1269_s16  ;;  %p1100_p0 = scmp.ge.s32.totalorder %s1273_s17, 1  ;;  %s1273_s17 = sphi %s1314_s17, %s14_s17   ;;  %s1269_s16 = sphi %s1312_s16, %s1495_s16   ;;  %s1265_s15 = sphi %s1310_s15, %s1494_s15  }
   0x3   : > { %p35_p1 = scmp.ge.s32.totalorder %s33_s18, 2  ;;  %p228_p2 = scmp.lt.s32.totalorder %s1273_s17, 3 }
   0x5   : > { %s1497_s18 = smov (%p35_p1, %s33_s18), 0  ;;  %p229_p3 = pnand %p1100_p0, %p228_p2 }
   0x6   : > { %p278_p4 = scmp.lt.s32.totalorder (!%p229_p3), %s1265_s15, 1  ;;  %vm326_vm0 = vcmask (!%p229_p3), 64512   ;;  %v1275_v0 = vmov (!%p229_p3), 0.0   ;;  %vm1276_vm1 = vmmov (!%p229_p3), 0   ;;  %vm317_vm2 = vcmask (!%p229_p3), 7168   ;;  %s1279_s29 = smov (!%p229_p3), 120  }
   0x7   : > { %232 = sbr.rel (%p229_p3) target bundleno = 1468 (0x5bc), region = 36  ;;  %1141 = vmatprep.subr.bf16.mxu0 (!%p229_p3), %v1275_v0  ;;  %327 = vst.msk [vmem:[#allocation4] sm:$0xff] (!%p229_p3), %vm326_vm0, %v1275_v0  ;;  %328 = vst.msk [vmem:[#allocation4 + $0x8] sm:$0xff] (!%p229_p3), %vm326_vm0, %v1275_v0  ;;  %1143 = vmatprep.mubr.msk.bf16.mxu0 (!%p229_p3), %vm1276_vm1, %v1275_v0  ;;  %v1277_v4 = vmov (!%p229_p3), -inf   ;;  %v339_v5 = vlaneseq (!%p229_p3)  ;;  %v1278_v17 = vmov (!%p229_p3), 0   ;;  %s1280_s30 = smov (!%p229_p3), 112  }
   0x8   : > { %329 = vst.msk [vmem:[#allocation4 + $0x10] sm:$0xff] (!%p229_p3), %vm326_vm0, %v1275_v0  ;;  %330 = vst.msk [vmem:[#allocation4 + $0x18] sm:$0xff] (!%p229_p3), %vm326_vm0, %v1275_v0  ;;  %1147 = vmatprep.subr.bf16.mxu1 (!%p229_p3), %v1275_v0  ;;  %1149 = vmatprep.mubr.msk.bf16.mxu1 (!%p229_p3), %vm1276_vm1, %v1275_v0  ;;  %s1281_s5 = smov (!%p229_p3), 104   ;;  %vm441_vm4 = vcmask (!%p229_p3), 1043456   ;;  %vm915_vm5 = vcmask (!%p229_p3), 60416   ;;  %s1282_s12 = smov (!%p229_p3), 8  }
   0x9   : > { %318 = vst.msk [vmem:[#allocation2] sm:$0xff] (!%p229_p3), %vm317_vm2, %v1277_v4  ;;  %319 = vst.msk [vmem:[#allocation2 + $0x8] sm:$0xff] (!%p229_p3), %vm317_vm2, %v1277_v4  ;;  %v340_v6 = vshrl.u32 (!%p229_p3), %v339_v5, 7  ;;  %v344_v7 = vand.u32 (!%p229_p3), 127, %v339_v5  ;;  %1223 = vset.pattern.permute.xlu0 (!%p229_p3), %v1278_v17  ;;  %1224 = vset.pattern.permute.xlu1 (!%p229_p3), %v1278_v17  ;;  %s1283_s13 = smov (!%p229_p3), 16   ;;  %s1284_s14 = smov (!%p229_p3), 24  }
   0xa   : > { %320 = vst.msk [vmem:[#allocation2 + $0x10] sm:$0xff] (!%p229_p3), %vm317_vm2, %v1277_v4  ;;  %321 = vst.msk [vmem:[#allocation2 + $0x18] sm:$0xff] (!%p229_p3), %vm317_vm2, %v1277_v4  ;;  %vm935_vm6 = vcmask (!%p229_p3), 126016   ;;  %vm955_vm7 = vcmask (!%p229_p3), 191616   ;;  %vm975_vm8 = vcmask (!%p229_p3), 257216  }
   0xb   : > { %322 = vst.msk [vmem:[#allocation3] sm:$0xff] (!%p229_p3), %vm317_vm2, %v1275_v0  ;;  %323 = vst.msk [vmem:[#allocation3 + $0x8] sm:$0xff] (!%p229_p3), %vm317_vm2, %v1275_v0  ;;  %vm347_vm3 = vcmp.gt.s32.totalorder (!%p229_p3), %v344_v7, %v340_v6 }
   0xc   : > { %324 = vst.msk [vmem:[#allocation3 + $0x10] sm:$0xff] (!%p229_p3), %vm317_vm2, %v1275_v0  ;;  %325 = vst.msk [vmem:[#allocation3 + $0x18] sm:$0xff] (!%p229_p3), %vm317_vm2, %v1275_v0  ;;  %v348_v9 = vsel (!%p229_p3), %vm347_vm3, -1e+09, %v1275_v0 }
   0xe   : > { %s1499_s15 = smov (!%p278_p4, %s1265_s15), 1 }
   0xf   : > { %s1342_s19 = sshll.u32 %s1499_s15, 2  ;;  %s304_s28 = scalar_lea.vmem %s1492_s3, %s1499_s15 }
  0x10   : > { %s291_s22 = scalar_lea.vmem %s1490_s1, %s1342_s19  ;;  %s284_s25 = scalar_lea.vmem %s1489_s0, %s1342_s19  ;;  %v1105_v8 = vld [vmem:[%s304_s28] ss:$0 sm:$0xff]  ;;  %v1429_v62 = vld [vmem:[#allocation2 + $0x8] sm:$0xff] }
  0x11   : > { %v357_v1 = vld [vmem:[%s291_s22] sm:$0xf]  ;;  %v1373_v10 = vadd.f32 %v1105_v8, %v348_v9  ;;  %s298_s8 = scalar_lea.vmem %s1491_s2, %s1342_s19  ;;  %v818_v7 = vld [vmem:[#allocation2 + $0x18] sm:$0xff]  ;;  %s1471_s11 = scalar_lea.vmem %s1493_s4, %s1342_s19 }
  0x12   : > { %v364_v2 = vsel %vm326_vm0, %v357_v1, 0  ;;  %v356_v3 = vld [vmem:[%s284_s25] sm:$0xf]  ;;  %v1109_v18 = vcombine.low %v357_v1, %v357_v1 }
  0x13   : > { %1142 = vmatpush3.bf16.xpose.msra.mxu0 %v364_v2  ;;  %v1108_v19 = vcombine.low %v356_v3, %v356_v3  ;;  %v1383_v20 = vld [vmem:[#allocation2] sm:$0xff] }
  0x14   : > { %1159 = vmatprep.subr.bf16.mxu0 %v1275_v0  ;;  %496 = vrot.lane.b32.xlu1 %v1109_v18, %s1279_s29  ;;  %v1397_v24 = vld [vmem:[%s298_s8] sm:$0xf] }
  0x15   : > { %v443_v25 = vsel %vm441_vm4, %v1397_v24, 0 }
  0x16   : > { %1148 = vmatpush3.bf16.msra.mxu1 %v443_v25 }
  0x17   : > { %1153 = vmatprep.subr.bf16.mxu1 %v1275_v0 }
  0x18   : > { %491 = vrot.lane.b32.xlu1 %v1108_v19, %s1279_s29 }
  0x1a   : > { %1144 = vmatmul.mubr.msk.bf16.vlgmr.msra.gmra.mrb[0].mxu0 %vm326_vm0, %v356_v3  ;;  %v683_v3 = vld [vmem:[#allocation2 + $0x10] sm:$0xff] }
  0x1b   : > { %1161 = vmatprep.mubr.msk.bf16.mxu0 %vm1276_vm1, %v1275_v0 }
  0x1c   : > { %634 = vrot.lane.b32.xlu1 %v1109_v18, %s1280_s30 }
  0x20   : > { %632 = vrot.lane.b32.xlu1 %v1108_v19, %s1280_s30 }
  0x24   : > { %769 = vrot.lane.b32.xlu1 %v1109_v18, %s1281_s5 }
  0x28   : > { %767 = vrot.lane.b32.xlu1 %v1108_v19, %s1281_s5 }
  0x86   : > { %v497_v29 = vpop.permute.xlu1 %496 }
  0x87   : > { %v502_v32 = vsel %vm326_vm0, %v497_v29, 0 }
  0x8a   : > { %v492_v30 = vpop.permute.xlu1 %491 }
  0x8e   : > { %v635_v34 = vpop.permute.xlu1 %634 }
  0x8f   : > { %v640_v36 = vsel %vm326_vm0, %v635_v34, 0 }
  0x92   : > { %v633_v35 = vpop.permute.xlu1 %632 }
  0x96   : > { %v770_v37 = vpop.permute.xlu1 %769 }
  0x97   : > { %v775_v38 = vsel %vm326_vm0, %v770_v37, 0 }
  0x9a   : > { %v768_v39 = vpop.permute.xlu1 %767 }
  0xed   : > { %v400_v11 = vpop.f32.mrb[0].mxu0 }
  0xee   : > { %v401_v12 = vadd.f32 %v400_v11, %v1373_v10  ;;  %v1145_v13 = vpop.f32.mrb[1].mxu0 }
  0xef   : > { %v403_v14 = vpop.f32.mrb[2].mxu0 }
  0xf0   : > { %v1146_v15 = vpop.f32.mrb[3].mxu0  ;;  %v407_v16 = vsel %vm326_vm0, %v401_v12, -inf }
  0xf1   : > { %408 = vmax.xlane.f32.xlu0 %v407_v16 }
 0x17e   : > { %v409_v21 = vpop.xlane.xlu0 %408 }
 0x17f   : > { %v1386_v22 = vmax.f32 %v1383_v20, %v409_v21 }
 0x181   : > { %v411_v23 = vsub.f32 %v1383_v20, %v1386_v22  ;;  %487 = vst.msk [vmem:[#allocation2] sm:$0xff] %vm317_vm2, %v1386_v22  ;;  %416 = vperm.xlu0 %1223, %v1386_v22  }
 0x200   : > { %v417_v26 = vpop.permute.xlu0 %416 }
 0x201   : > { %v419_v27 = vsub.f32 %v401_v12, %v417_v26 }
 0x203   : > { %v420_v28 = vmul.f32 1.442695, %v419_v27 }
 0x205   : > { %1227 = vpow2.f32 %v420_v28 }
 0x20f   : > { %v1402_v31 = vpop.eup %1227 }
 0x210   : > { %v437_v33 = vpack.c.bf16 %v1402_v31, %v1402_v31  ;;  %v424_v12 = vsel %vm326_vm0, %v1402_v31, 0.0 }
 0x212   : > { %1150 = vmatmul.mubr.msk.bf16.vlgmr.msra.gmra.mrb[0].mxu1 %vm326_vm0, %v437_v33 }
 0x213   : > { %1154 = vmatpush3.bf16.xpose.msra.mxu1 %v502_v32  ;;  %1155 = vmatprep.mubr.msk.bf16.mxu1 %vm1276_vm1, %v1275_v0 }
 0x214   : > { %1165 = vmatprep.subr.bf16.mxu1 %v1275_v0 }
 0x21a   : > { %1156 = vmatmul.mubr.msk.bf16.vlgmr.msra.gmra.mrb[4].mxu1 %vm326_vm0, %v492_v30 }
 0x21b   : > { %1166 = vmatpush3.bf16.xpose.msra.mxu1 %v640_v36  ;;  %1167 = vmatprep.mubr.msk.bf16.mxu1 %vm1276_vm1, %v1275_v0 }
 0x21c   : > { %1177 = vmatprep.subr.bf16.mxu1 %v1275_v0 }
 0x222   : > { %1168 = vmatmul.mubr.msk.bf16.vlgmr.msra.gmra.mrb[8].mxu1 %vm326_vm0, %v633_v35 }
 0x223   : > { %1178 = vmatpush3.bf16.xpose.msra.mxu1 %v775_v38  ;;  %1179 = vmatprep.mubr.msk.bf16.mxu1 %vm1276_vm1, %v1275_v0  ;;  %v412_v38 = vmul.f32 1.442695, %v411_v23 }
 0x22a   : > { %1180 = vmatmul.mubr.msk.bf16.vlgmr.msra.gmra.mrb[12].mxu1 %vm326_vm0, %v768_v39 }
 0x2e5   : > { %v1421_v40 = vpop.f32.mrb[0].mxu1 }
 0x2e6   : > { %v1151_v41 = vpop.f32.mrb[1].mxu1 }
 0x2e7   : > { %v482_v42 = vpop.f32.mrb[2].mxu1 }
 0x2e8   : > { %v1152_v43 = vpop.f32.mrb[3].mxu1 }
 0x2ed   : > { %v538_v44 = vpop.f32.mrb[4].mxu1 }
 0x2ee   : > { %v539_v45 = vadd.f32 %v538_v44, %v1373_v10  ;;  %v1157_v46 = vpop.f32.mrb[5].mxu1 }
 0x2ef   : > { %v541_v47 = vpop.f32.mrb[6].mxu1  ;;  %v422_v46 = vld [vmem:[#allocation3] sm:$0xff] }
 0x2f0   : > { %v1158_v48 = vpop.f32.mrb[7].mxu1  ;;  %v546_v49 = vsel %vm326_vm0, %v539_v45, -inf }
 0x2f1   : > { %547 = vmax.xlane.f32.xlu1 %v546_v49 }
 0x2f5   : > { %v676_v50 = vpop.f32.mrb[8].mxu1 }
 0x2f6   : > { %v677_v51 = vadd.f32 %v676_v50, %v1373_v10  ;;  %v1169_v52 = vpop.f32.mrb[9].mxu1 }
 0x2f7   : > { %v679_v53 = vpop.f32.mrb[10].mxu1 }
 0x2f8   : > { %v1170_v54 = vpop.f32.mrb[11].mxu1  ;;  %v684_v55 = vsel %vm326_vm0, %v677_v51, -inf }
 0x2f9   : > { %685 = vmax.xlane.f32.xlu0 %v684_v55  ;;  %v700_v55 = vld [vmem:[#allocation3 + $0x10] sm:$0xff] }
 0x2fd   : > { %v811_v56 = vpop.f32.mrb[12].mxu1 }
 0x2fe   : > { %v812_v57 = vadd.f32 %v811_v56, %v1373_v10  ;;  %v1181_v58 = vpop.f32.mrb[13].mxu1  ;;  %v1111_v10 = vcombine.low %v1397_v24, %v1397_v24 }
 0x2ff   : > { %v814_v59 = vpop.f32.mrb[14].mxu1 }
 0x300   : > { %v1182_v60 = vpop.f32.mrb[15].mxu1  ;;  %v819_v61 = vsel %vm326_vm0, %v812_v57, -inf }
 0x301   : > { %820 = vmax.xlane.f32.xlu1 %v819_v61  ;;  %v835_v60 = vld [vmem:[#allocation3 + $0x18] sm:$0xff]  ;;  %v430_v61 = vld [vmem:[#allocation4] sm:$0xff] }
 0x37e   : > { %v548_v63 = vpop.xlane.xlu1 %547 }
 0x37f   : > { %v549_v1 = vmax.f32 %v1429_v62, %v548_v63 }
 0x381   : > { %v550_v2 = vsub.f32 %v1429_v62, %v549_v1  ;;  %631 = vst.msk [vmem:[#allocation2 + $0x8] sm:$0xff] %vm317_vm2, %v549_v1  ;;  %555 = vperm.xlu1 %1224, %v549_v1  }
 0x383   : > { %v551_v41 = vmul.f32 1.442695, %v550_v2 }
 0x386   : > { %v686_v4 = vpop.xlane.xlu0 %685 }
 0x387   : > { %v687_v5 = vmax.f32 %v683_v3, %v686_v4 }
 0x389   : > { %v688_v6 = vsub.f32 %v683_v3, %v687_v5  ;;  %766 = vst.msk [vmem:[#allocation2 + $0x10] sm:$0xff] %vm317_vm2, %v687_v5  ;;  %693 = vperm.xlu0 %1223, %v687_v5  }
 0x38b   : > { %v689_v43 = vmul.f32 1.442695, %v688_v6 }
 0x38e   : > { %v821_v8 = vpop.xlane.xlu1 %820 }
 0x38f   : > { %v822_v9 = vmax.f32 %v818_v7, %v821_v8 }
 0x391   : > { %v823_v11 = vsub.f32 %v818_v7, %v822_v9  ;;  %901 = vst.msk [vmem:[#allocation2 + $0x18] sm:$0xff] %vm317_vm2, %v822_v9  ;;  %828 = vperm.xlu1 %1224, %v822_v9  }
 0x393   : > { %v824_v42 = vmul.f32 1.442695, %v823_v11 }
 0x395   : > { %581 = vrot.lane.b32.xlu1 %v1111_v10, %s1279_s29 }
 0x399   : > { %716 = vrot.lane.b32.xlu1 %v1111_v10, %s1280_s30 }
 0x39d   : > { %851 = vrot.lane.b32.xlu1 %v1111_v10, %s1281_s5 }
 0x3c1   : > { %425 = vadd.xlane.f32.xlu1 %v424_v12 }
 0x400   : > { %v556_v13 = vpop.permute.xlu1 %555 }
 0x401   : > { %v558_v14 = vsub.f32 %v539_v45, %v556_v13 }
 0x403   : > { %v559_v15 = vmul.f32 1.442695, %v558_v14 }
 0x405   : > { %1229 = vpow2.f32 %v559_v15  ;;  %v570_v15 = vld [vmem:[#allocation4 + $0x8] sm:$0xff] }
 0x408   : > { %v694_v16 = vpop.permute.xlu0 %693 }
 0x409   : > { %v696_v17 = vsub.f32 %v677_v51, %v694_v16  ;;  %v562_v51 = vld [vmem:[#allocation3 + $0x8] sm:$0xff] }
 0x40b   : > { %v697_v18 = vmul.f32 1.442695, %v696_v17 }
 0x40d   : > { %1231 = vpow2.f32 %v697_v18 }
 0x40f   : > { %v1230_v19 = vpop.eup %1229 }
 0x410   : > { %v829_v21 = vpop.permute.xlu1 %828  ;;  %v564_v24 = vsel %vm326_vm0, %v1230_v19, 0.0  ;;  %v577_v30 = vpack.c.bf16 %v1230_v19, %v1230_v19 }
 0x411   : > { %v831_v25 = vsub.f32 %v812_v57, %v829_v21  ;;  %565 = vadd.xlane.f32.xlu0 %v564_v24 }
 0x413   : > { %v832_v26 = vmul.f32 1.442695, %v831_v25  ;;  %v708_v25 = vld [vmem:[#allocation4 + $0x10] sm:$0xff] }
 0x414   : > { %v582_v27 = vpop.permute.xlu1 %581 }
 0x415   : > { %1233 = vpow2.f32 %v832_v26  ;;  %v587_v28 = vsel %vm441_vm4, %v582_v27, 0 }
 0x416   : > { %1160 = vmatpush3.bf16.msra.mxu0 %v587_v28  ;;  %1235 = vpow2.f32 %v412_v38 }
 0x417   : > { %v1232_v29 = vpop.eup %1231  ;;  %1171 = vmatprep.subr.bf16.mxu0 %v1275_v0  ;;  %1237 = vpow2.f32 %v551_v41 }
 0x418   : > { %v702_v31 = vsel %vm326_vm0, %v1232_v29, 0.0  ;;  %v717_v32 = vpop.permute.xlu1 %716  ;;  %v715_v36 = vpack.c.bf16 %v1232_v29, %v1232_v29  ;;  %1239 = vpow2.f32 %v824_v42 }
 0x419   : > { %703 = vadd.xlane.f32.xlu0 %v702_v31  ;;  %1162 = vmatmul.mubr.msk.bf16.vlgmr.msra.gmra.mrb[4].mxu0 %vm326_vm0, %v577_v30  ;;  %v722_v33 = vsel %vm441_vm4, %v717_v32, 0  ;;  %1241 = vpow2.f32 %v689_v43  ;;  %v843_v32 = vld [vmem:[#allocation4 + $0x18] sm:$0xff] }
 0x41a   : > { %1172 = vmatpush3.bf16.msra.mxu0 %v722_v33  ;;  %1173 = vmatprep.mubr.msk.bf16.mxu0 %vm1276_vm1, %v1275_v0 }
 0x41b   : > { %1183 = vmatprep.subr.bf16.mxu0 %v1275_v0 }
 0x41c   : > { %v852_v34 = vpop.permute.xlu1 %851 }
 0x41d   : > { %v857_v37 = vsel %vm441_vm4, %v852_v34, 0 }
 0x41f   : > { %v1234_v35 = vpop.eup %1233 }
 0x420   : > { %v837_v39 = vsel %vm326_vm0, %v1234_v35, 0.0  ;;  %v850_v44 = vpack.c.bf16 %v1234_v35, %v1234_v35  ;;  %v1236_v20 = vpop.eup %1235 }
 0x421   : > { %1174 = vmatmul.mubr.msk.bf16.vlgmr.msra.gmra.mrb[8].mxu0 %vm326_vm0, %v715_v36  ;;  %838 = vadd.xlane.f32.xlu1 %v837_v39  ;;  %v1238_v22 = vpop.eup %1237 }
 0x422   : > { %1184 = vmatpush3.bf16.msra.mxu0 %v857_v37  ;;  %1185 = vmatprep.mubr.msk.bf16.mxu0 %vm1276_vm1, %v1275_v0  ;;  %v1240_v23 = vpop.eup %1239  ;;  %v423_v0 = vmul.f32 %v1236_v20, %v422_v46  ;;  %v563_v52 = vmul.f32 %v1238_v22, %v562_v51 }
 0x423   : > { %v1242_v45 = vpop.eup %1241  ;;  %v836_v62 = vmul.f32 %v1240_v23, %v835_v60 }
 0x424   : > { %v701_v56 = vmul.f32 %v1242_v45, %v700_v55 }
 0x429   : > { %1186 = vmatmul.mubr.msk.bf16.vlgmr.msra.gmra.mrb[12].mxu0 %vm326_vm0, %v850_v44 }
 0x42f   : > { %433 = vperm.xlu0 %1223, %v1236_v20  }
 0x432   : > { %573 = vperm.xlu1 %1224, %v1238_v22  }
 0x433   : > { %846 = vperm.xlu0 %1223, %v1240_v23  }
 0x436   : > { %711 = vperm.xlu1 %1224, %v1242_v45  }
 0x44e   : > { %v426_v47 = vpop.xlane.xlu1 %425 }
 0x44f   : > { %v427_v48 = vadd.f32 %v426_v47, %v423_v0 }
 0x451   : > { %429 = vst.msk [vmem:[#allocation3] sm:$0xff] %vm317_vm2, %v427_v48 }
 0x458   : > { %v905_v49 = vld [vmem:[#allocation3] sm:$0xff] }
 0x459   : > { %1243 = vrcp.f32 %v905_v49 }
 0x463   : > { %v1244_v50 = vpop.eup %1243 }
 0x464   : > { %910 = vperm.xlu1 %1224, %v1244_v50  }
 0x49e   : > { %v566_v53 = vpop.xlane.xlu0 %565 }
 0x49f   : > { %v567_v54 = vadd.f32 %v566_v53, %v563_v52 }
 0x4a1   : > { %568 = vst.msk [vmem:[#allocation3 + $0x8] sm:$0xff] %vm317_vm2, %v567_v54 }
 0x4a6   : > { %v704_v57 = vpop.xlane.xlu0 %703 }
 0x4a7   : > { %v705_v58 = vadd.f32 %v704_v57, %v701_v56 }
 0x4a8   : > { %v918_v59 = vld [vmem:[#allocation3 + $0x8] sm:$0xff] }
 0x4a9   : > { %706 = vst.msk [vmem:[#allocation3 + $0x10] sm:$0xff] %vm317_vm2, %v705_v58  ;;  %1245 = vrcp.f32 %v918_v59 }
 0x4ae   : > { %v839_v63 = vpop.xlane.xlu1 %838  ;;  %v434_v1 = vpop.permute.xlu0 %433 }
 0x4af   : > { %v840_v2 = vadd.f32 %v839_v63, %v836_v62  ;;  %v436_v3 = vmul.f32 %v434_v1, %v430_v61 }
 0x4b0   : > { %v938_v4 = vld [vmem:[#allocation3 + $0x10] sm:$0xff] }
 0x4b1   : > { %841 = vst.msk [vmem:[#allocation3 + $0x18] sm:$0xff] %vm317_vm2, %v840_v2  ;;  %v485_v5 = vadd.f32 %v1421_v40, %v436_v3  ;;  %1247 = vrcp.f32 %v938_v4 }
 0x4b2   : > { %v574_v10 = vpop.permute.xlu1 %573  ;;  %v847_v33 = vpop.permute.xlu0 %846 }
 0x4b3   : > { %v1246_v6 = vpop.eup %1245  ;;  %486 = vst.msk [vmem:[#allocation4] sm:$0xff] %vm326_vm0, %v485_v5  ;;  %v576_v16 = vmul.f32 %v574_v10, %v570_v15  ;;  %v849_v34 = vmul.f32 %v847_v33, %v843_v32 }
 0x4b4   : > { %924 = vperm.xlu0 %1223, %v1246_v6  }
 0x4b6   : > { %v712_v11 = vpop.permute.xlu1 %711 }
 0x4b7   : > { %v714_v26 = vmul.f32 %v712_v11, %v708_v25 }
 0x4b8   : > { %v958_v7 = vld [vmem:[#allocation3 + $0x18] sm:$0xff] }
 0x4b9   : > { %1249 = vrcp.f32 %v958_v7 }
 0x4ba   : > { %v907_v12 = vld [vmem:[#allocation4] sm:$0xff] }
 0x4bb   : > { %v1248_v8 = vpop.eup %1247 }
 0x4bc   : > { %944 = vperm.xlu0 %1223, %v1248_v8  }
 0x4c3   : > { %v1250_v9 = vpop.eup %1249 }
 0x4c4   : > { %964 = vperm.xlu0 %1223, %v1250_v9  }
 0x4e3   : > { %v911_v13 = vpop.permute.xlu1 %910 }
 0x4e4   : > { %v913_v14 = vmul.f32 %v911_v13, %v907_v12 }
 0x4e6   : > { %v914_v40 = vpack.c.bf16 %v913_v14, %v913_v14 }
 0x4e8   : > { %916 = vst.msk [vmem:[%s1471_s11] sm:$0xf] %vm915_vm5, %v914_v40 }
 0x4ec   : > { %v623_v17 = vpop.f32.mrb[4].mxu0 }
 0x4ed   : > { %v629_v18 = vadd.f32 %v623_v17, %v576_v16  ;;  %v1163_v19 = vpop.f32.mrb[5].mxu0 }
 0x4ee   : > { %v626_v21 = vpop.f32.mrb[6].mxu0 }
 0x4ef   : > { %630 = vst.msk [vmem:[#allocation4 + $0x8] sm:$0xff] %vm326_vm0, %v629_v18  ;;  %v1164_v24 = vpop.f32.mrb[7].mxu0 }
 0x4f4   : > { %v758_v27 = vpop.f32.mrb[8].mxu0 }
 0x4f5   : > { %v764_v28 = vadd.f32 %v758_v27, %v714_v26  ;;  %v1175_v29 = vpop.f32.mrb[9].mxu0 }
 0x4f6   : > { %v761_v30 = vpop.f32.mrb[10].mxu0  ;;  %v921_v42 = vld [vmem:[#allocation4 + $0x8] sm:$0xff] }
 0x4f7   : > { %765 = vst.msk [vmem:[#allocation4 + $0x10] sm:$0xff] %vm326_vm0, %v764_v28  ;;  %v1176_v31 = vpop.f32.mrb[11].mxu0 }
 0x4fc   : > { %v893_v35 = vpop.f32.mrb[12].mxu0 }
 0x4fd   : > { %v899_v36 = vadd.f32 %v893_v35, %v849_v34  ;;  %v1187_v37 = vpop.f32.mrb[13].mxu0 }
 0x4fe   : > { %v896_v38 = vpop.f32.mrb[14].mxu0  ;;  %v941_v22 = vld [vmem:[#allocation4 + $0x10] sm:$0xff] }
 0x4ff   : > { %900 = vst.msk [vmem:[#allocation4 + $0x18] sm:$0xff] %vm326_vm0, %v899_v36  ;;  %v1188_v39 = vpop.f32.mrb[15].mxu0 }
 0x506   : > { %v961_v0 = vld [vmem:[#allocation4 + $0x18] sm:$0xff] }
 0x533   : > { %v925_v41 = vpop.permute.xlu0 %924 }
 0x534   : > { %v927_v43 = vmul.f32 %v925_v41, %v921_v42 }
 0x536   : > { %v1122_v44 = vpack.c.bf16 %v927_v43, %v927_v43 }
 0x538   : > { %932 = vrot.lane.b32.xlu1 %v1122_v44, %s1282_s12 }
 0x53b   : > { %v945_v20 = vpop.permute.xlu0 %944 }
 0x53c   : > { %v947_v23 = vmul.f32 %v945_v20, %v941_v22 }
 0x53e   : > { %v1123_v45 = vpack.c.bf16 %v947_v23, %v947_v23 }
 0x540   : > { %952 = vrot.lane.b32.xlu1 %v1123_v45, %s1283_s13 }
 0x543   : > { %v965_v46 = vpop.permute.xlu0 %964 }
 0x544   : > { %v967_v47 = vmul.f32 %v965_v46, %v961_v0 }
 0x546   : > { %v1124_v48 = vpack.c.bf16 %v967_v47, %v967_v47 }
 0x548   : > { %972 = vrot.lane.b32.xlu1 %v1124_v48, %s1284_s14 }
 0x5aa   : > { %v933_v49 = vpop.permute.xlu1 %932 }
 0x5ab   : > { %936 = vst.msk [vmem:[%s1471_s11] sm:$0xf] %vm935_vm6, %v933_v49 }
 0x5b2   : > { %v953_v50 = vpop.permute.xlu1 %952 }
 0x5b3   : > { %956 = vst.msk [vmem:[%s1471_s11] sm:$0xf] %vm955_vm7, %v953_v50 }
 0x5ba   : > { %v973_v51 = vpop.permute.xlu1 %972 }
 0x5bb   : > { %976 = vst.msk [vmem:[%s1471_s11] sm:$0xf] %vm975_vm8, %v973_v51 }
 0x5bc PF: > { %s14_s17 = sadd.s32 1, %s1273_s17   ;;  %s1494_s15 = smov %s1269_s16 }
 0x5bd   : > { %p11_p5 = scmp.ge.s32.totalorder %s14_s17, 4   ;;  %s1495_s16 = smov %s1497_s18 }
 0x5bf   :  { %13 = sbr.rel (!%p11_p5) target bundleno = 2 (0x2), region = 102 }

// kernel: transformer_forward.34
= control target key start
LH: loop header
LB: loop body
LE: loop exit
PB: predicated region body
PF: predicated region fallthrough
CT: control target
= control target key end

     0   :  { %s875_s18 = smov 0   ;;  %s877_s19 = smov 0   ;;  %s997_s0 = inlined_call_operand.vmem [shape: f32[16,32], index: 0, kind: input, shape index: {}]   ;;  %s998_s1 = inlined_call_operand.vmem [shape: f32[1,32], index: 1, kind: input, shape index: {}]   ;;  %s999_s2 = inlined_call_operand.vmem [shape: f32[1,32], index: 2, kind: input, shape index: {}]   ;;  %s1000_s3 = inlined_call_operand.vmem [shape: bf16[32,2048], index: 3, kind: input, shape index: {}]   ;;  %s1001_s4 = inlined_call_operand.vmem [shape: f32[1,2048], index: 4, kind: input, shape index: {}]   ;;  %s1002_s5 = inlined_call_operand.vmem [shape: bf16[16,2048], index: 5, kind: output, shape index: {}]  }
   0x1   :  { %s879_s20 = smov 0   ;;  %s881_s21 = smov 0  }
   0x2   :  { %s883_s22 = smov 0  }
   0x3 LB: > { %s24_s23 = sadd.s32 1, %s838_s21  ;;  %s707_s24 = sadd.s32 4294967295, %s842_s22   ;;  %s842_s22 = sphi %s883_s22, %s15_s22   ;;  %s838_s21 = sphi %s881_s21, %s1007_s21   ;;  %s834_s20 = sphi %s879_s20, %s1006_s20   ;;  %s830_s19 = sphi %s877_s19, %s1005_s19   ;;  %s826_s18 = sphi %s875_s18, %s1004_s18  }
   0x4   : > { %p25_p0 = scmp.ge.s32.totalorder %s24_s23, 4  ;;  %p109_p1 = scmp.ne.s32.totalorder %s830_s19, %s826_s18 }
   0x5   : > { %p110_p2 = scmp.eq.s32.totalorder %s842_s22, 0  ;;  %p167_p4 = scmp.eq.s32.totalorder %s707_s24, 3 }
   0x6   : > { %s1009_s23 = smov (%p25_p0, %s24_s23), 0  ;;  %s102_s26 = sadd.s32 1, %s830_s19 }
   0x7   : > { %p111_p3 = por %p110_p2, %p109_p1  ;;  %s99_s25 = ssub.s32 %s838_s21, %s1009_s23 }
   0x8   : > { %p100_p5 = scmp.eq.s32.totalorder %s99_s25, 0  ;;  %p910_p6 = por %p167_p4, %p109_p1 }
   0x9   : > { %p711_p7 = scmp.ge.s32.totalorder %s842_s22, 4 }
   0xa   : > { %s915_s28 = scalar_select %p100_p5, %s830_s19, %s102_s26  }
   0xb   : > { %204 = sbr.rel (%p711_p7) target bundleno = 26 (0x1a), region = 28 }
  0x12   : > { %207 = sbr.rel (!%p111_p3) target bundleno = 26 (0x1a), region = 32  ;;  %s209_s29 = sand.u32 (%p111_p3), 1, %s830_s19  }
  0x13   : > { %s741_s30 = sshll.u32 (%p111_p3), %s838_s21, 4  ;;  %s712_s6 = sshll.u32 (%p111_p3), %s209_s29, 6 }
  0x14   : > { %s214_s9 = scalar_lea.vmem (%p111_p3), %s1000_s3, %s741_s30  ;;  %s211_s10 = scalar_lea.vmem (%p111_p3), [#allocation3], %s712_s6 }
  0x15   : > { %v227_v0 = vld [vmem:[%s214_s9] sm:$0xff] (%p111_p3)  ;;  %v229_v1 = vld [vmem:[%s214_s9 + $0x8] sm:$0xff] (%p111_p3) }
  0x16   : > { %v231_v2 = vld [vmem:[%s214_s9 + $0x40] sm:$0xff] (%p111_p3)  ;;  %228 = vst [vmem:[%s211_s10] sm:$0xff] (%p111_p3), %v227_v0  ;;  %230 = vst [vmem:[%s211_s10 + $0x8] sm:$0xff] (%p111_p3), %v229_v1  ;;  %v233_v3 = vld [vmem:[%s214_s9 + $0x48] sm:$0xff] (%p111_p3) }
  0x17   : > { %232 = vst [vmem:[%s211_s10 + $0x10] sm:$0xff] (%p111_p3), %v231_v2  ;;  %v235_v4 = vld [vmem:[%s214_s9 + $0x80] sm:$0xff] (%p111_p3)  ;;  %v237_v5 = vld [vmem:[%s214_s9 + $0x88] sm:$0xff] (%p111_p3)  ;;  %234 = vst [vmem:[%s211_s10 + $0x18] sm:$0xff] (%p111_p3), %v233_v3 }
  0x18   : > { %236 = vst [vmem:[%s211_s10 + $0x20] sm:$0xff] (%p111_p3), %v235_v4  ;;  %238 = vst [vmem:[%s211_s10 + $0x28] sm:$0xff] (%p111_p3), %v237_v5  ;;  %v239_v6 = vld [vmem:[%s214_s9 + $0xc0] sm:$0xff] (%p111_p3)  ;;  %v241_v7 = vld [vmem:[%s214_s9 + $0xc8] sm:$0xff] (%p111_p3) }
  0x19   : > { %240 = vst [vmem:[%s211_s10 + $0x30] sm:$0xff] %v239_v6  ;;  %242 = vst [vmem:[%s211_s10 + $0x38] sm:$0xff] %v241_v7 }
  0x1a PF: > { %p715_p8 = scmp.ge.s32.totalorder %s842_s22, 1  ;;  %p255_p9 = scmp.lt.s32.totalorder %s842_s22, 5 }
  0x1c   : > { %p256_p10 = pnand %p715_p8, %p255_p9 }
  0x1d   : > { %s262_s11 = sand.u32 (!%p256_p10), 1, %s826_s18   ;;  %s718_s12 = sshll.u32 (!%p256_p10), %s834_s20, 2 }
  0x1e   : > { %259 = sbr.rel (%p256_p10) target bundleno = 603 (0x25b), region = 59  ;;  %s716_s13 = sshll.u32 (!%p256_p10), %s262_s11, 6 }
  0x1f   : > { %s717_s14 = sshll.u32 (!%p256_p10), %s262_s11, 5  ;;  %p305_p11 = scmp.lt.s32.totalorder (!%p256_p10), %s718_s12, 15 }
  0x20   : > { %s933_s24 = scalar_lea.vmem (!%p256_p10), [#allocation3], %s716_s13  ;;  %s935_s25 = scalar_lea.vmem (!%p256_p10), [#allocation4], %s717_s14 }
  0x21   : > { %p719_p12 = scmp.ne.s32.totalorder (!%p256_p10), %s834_s20, 0 }
  0x25   : > { %s1011_s12 = smov (!%p305_p11, %s718_s12), 15  ;;  %315 = sbr.rel (%p719_p12) target bundleno = 359 (0x167), region = 67 }
  0x26   : > { %s307_s17 = scalar_lea.vmem %s1001_s4, %s1011_s12  ;;  %v316_v8 = vld [vmem:[%s997_s0] sm:$0xff] (!%p719_p12)  ;;  %vm318_vm0 = vcmask (!%p719_p12), 261120   ;;  %v317_v9 = vld [vmem:[%s997_s0 + $0x8] sm:$0xff] (!%p719_p12) }
  0x27   : > { %v319_v10 = vsel (!%p719_p12), %vm318_vm0, %v316_v8, 0.0  ;;  %v322_v11 = vsel (!%p719_p12), %vm318_vm0, %v317_v9, 0.0  ;;  %v720_v30 = vld [vmem:[%s998_s1] ss:$0 sm:$0xff] (!%p719_p12) }
  0x28   : > { %320 = vadd.xlane.f32.xlu0 (!%p719_p12), %v319_v10  ;;  %v721_v34 = vld [vmem:[%s999_s2] ss:$0 sm:$0xff] (!%p719_p12) }
  0x2c   : > { %323 = vadd.xlane.f32.xlu0 %v322_v11 }
  0xb5   : > { %v321_v12 = vpop.xlane.xlu0 %320 }
  0xb6   : > { %v326_v13 = vmul.f32 0.03125, %v321_v12 }
  0xb8   : > { %v328_v14 = vsub.f32 %v316_v8, %v326_v13 }
  0xb9   : > { %v324_v15 = vpop.xlane.xlu0 %323 }
  0xba   : > { %v327_v16 = vmul.f32 0.03125, %v324_v15  ;;  %v330_v17 = vmul.f32 %v328_v14, %v328_v14 }
  0xbc   : > { %v329_v18 = vsub.f32 %v317_v9, %v327_v16  ;;  %v332_v19 = vsel %vm318_vm0, %v330_v17, 0.0 }
  0xbd   : > { %333 = vadd.xlane.f32.xlu1 %v332_v19 }
  0xbe   : > { %v331_v20 = vmul.f32 %v329_v18, %v329_v18 }
  0xc0   : > { %v335_v21 = vsel %vm318_vm0, %v331_v20, 0.0 }
  0xc1   : > { %336 = vadd.xlane.f32.xlu1 %v335_v21 }
 0x14a   : > { %v334_v22 = vpop.xlane.xlu1 %333 }
 0x14b   : > { %v338_v23 = vmul.f32 0.03125, %v334_v22 }
 0x14d   : > { %v340_v24 = vadd.f32 1e-05, %v338_v23 }
 0x14e   : > { %v337_v25 = vpop.xlane.xlu1 %336 }
 0x14f   : > { %788 = vrsqrt.f32 %v340_v24  ;;  %v339_v26 = vmul.f32 0.03125, %v337_v25 }
 0x151   : > { %v341_v27 = vadd.f32 1e-05, %v339_v26 }
 0x153   : > { %790 = vrsqrt.f32 %v341_v27 }
 0x159   : > { %v789_v28 = vpop.eup %788 }
 0x15a   : > { %v344_v29 = vmul.f32 %v789_v28, %v328_v14 }
 0x15c   : > { %v353_v32 = vmul.f32 %v720_v30, %v344_v29 }
 0x15d   : > { %v791_v31 = vpop.eup %790 }
 0x15e   : > { %v345_v33 = vmul.f32 %v791_v31, %v329_v18  ;;  %v362_v36 = vadd.f32 %v721_v34, %v353_v32 }
 0x160   : > { %v354_v35 = vmul.f32 %v720_v30, %v345_v33 }
 0x162   : > { %v363_v37 = vadd.f32 %v721_v34, %v354_v35 }
 0x164   : > { %v364_v38 = vpack.c.bf16 %v363_v37, %v362_v36 }
 0x166   : > { %365 = vst.msk [vmem:[#allocation2] sm:$0xff] %vm318_vm0, %v364_v38 }
 0x167 PF: > { %v792_v39 = vld [vmem:[%s933_s24 + $0x4] ss:$16 sps:$4 sm:$0xff]   ;;  %v794_v40 = vld [vmem:[%s933_s24 + $0xc] ss:$16 sps:$4 sm:$0xff]   ;;  %v844_v41 = vmov 0   ;;  %vm437_vm1 = vcmask 261120   ;;  %v377_v49 = vlaneseq }
 0x168   : > { %473 = vmatprep.mubr.bf16.mxu0 %v844_v41  ;;  %516 = vmatprep.mubr.bf16.mxu1 %v844_v41  ;;  %v796_v42 = vld [vmem:[%s933_s24] ss:$16 sps:$4 sm:$0xff]   ;;  %v797_v43 = vld [vmem:[%s933_s24 + $0x8] ss:$16 sps:$4 sm:$0xff]   ;;  %v798_v44 = vld [vmem:[%s933_s24 + $0x24] ss:$16 sps:$4 sm:$0xff]  }
 0x169   : > { %441 = vmatprep.subr.bf16.mxu0 %v792_v39  ;;  %484 = vmatprep.subr.bf16.mxu1 %v794_v40  ;;  %v800_v45 = vld [vmem:[%s933_s24 + $0x2c] ss:$16 sps:$4 sm:$0xff]   ;;  %v802_v46 = vld [vmem:[%s933_s24 + $0x20] ss:$16 sps:$4 sm:$0xff]   ;;  %v803_v47 = vld [vmem:[%s933_s24 + $0x28] ss:$16 sps:$4 sm:$0xff]  }
 0x16a   : > { %442 = vmatpush1.bf16.msra.mxu0 %v796_v42  ;;  %485 = vmatpush1.bf16.msra.mxu1 %v797_v43  ;;  %v378_v50 = vshrl.u32 %v377_v49, 7  ;;  %v375_v53 = vld [vmem:[%s307_s17] sm:$0xf]  ;;  %s746_s12 = sshll.u32 (%p910_p6), %s834_s20, 4 }
 0x16b   : > { %443 = vmatprep.subr.bf16.mxu0 %v798_v44  ;;  %486 = vmatprep.subr.bf16.mxu1 %v800_v45  ;;  %s591_s15 = scalar_lea.vmem (%p910_p6), %s1002_s5, %s746_s12 }
 0x16c   : > { %v379_v51 = vsub.s32 0, %v378_v50  ;;  %v387_v52 = vsub.s32 2, %v378_v50  ;;  %v383_v54 = vsub.s32 1, %v378_v50  ;;  %v391_v55 = vsub.s32 3, %v378_v50 }
 0x16d   : > { %v366_v48 = vld [vmem:[#allocation2] sm:$0xff] }
 0x16e   : > { %444 = vmatpush1.bf16.msra.mxu0 %v802_v46  ;;  %487 = vmatpush1.bf16.msra.mxu1 %v803_v47  ;;  %v380_v56 = vrot.slane %v375_v53, %v379_v51  ;;  %v388_v57 = vrot.slane %v375_v53, %v387_v52  ;;  %v384_v58 = vrot.slane %v375_v53, %v383_v54 }
 0x16f   : > { %v392_v59 = vrot.slane %v375_v53, %v391_v55 }
 0x171   : > { %730 = vmatmul.mubr.msk.bf16.vlgmr.msra.gmra.mrb[0].mxu0 %vm437_vm1, %v366_v48  ;;  %731 = vmatmul.mubr.msk.bf16.vlgmr.msra.gmra.mrb[0].mxu1 %vm437_vm1, %v366_v48 }
 0x244   : > { %v475_v60 = vpop.f32.mrb[0].mxu0  ;;  %v518_v61 = vpop.f32.mrb[0].mxu1 }
 0x245   : > { %v476_v62 = vadd.f32 %v475_v60, %v380_v56  ;;  %v519_v63 = vadd.f32 %v518_v61, %v388_v57  ;;  %v477_v0 = vpop.f32.mrb[1].mxu0  ;;  %v520_v1 = vpop.f32.mrb[1].mxu1 }
 0x246   : > { %v478_v2 = vadd.f32 %v477_v0, %v384_v58  ;;  %v521_v3 = vadd.f32 %v520_v1, %v392_v59  ;;  %v479_v4 = vpop.f32.mrb[2].mxu0  ;;  %v522_v5 = vpop.f32.mrb[2].mxu1 }
 0x247   : > { %vm527_vm2 = vcmp.gt.f32.partialorder %v476_v62, 0.0  ;;  %v535_v6 = vmul.f32 0.01, %v476_v62  ;;  %vm529_vm3 = vcmp.gt.f32.partialorder %v519_v63, 0.0  ;;  %v537_v7 = vmul.f32 0.01, %v519_v63 }
 0x248   : > { %vm528_vm4 = vcmp.gt.f32.partialorder %v478_v2, 0.0  ;;  %v536_v8 = vmul.f32 0.01, %v478_v2  ;;  %vm530_vm5 = vcmp.gt.f32.partialorder %v521_v3, 0.0  ;;  %v538_v9 = vmul.f32 0.01, %v521_v3 }
 0x249   : > { %v543_v10 = vsel %vm527_vm2, %v476_v62, %v535_v6  ;;  %v545_v11 = vsel %vm529_vm3, %v519_v63, %v537_v7  ;;  %v480_v12 = vadd.f32 %v479_v4, %v380_v56  ;;  %v523_v13 = vadd.f32 %v522_v5, %v388_v57  ;;  %v481_v14 = vpop.f32.mrb[3].mxu0  ;;  %v524_v15 = vpop.f32.mrb[3].mxu1 }
 0x24a   : > { %v544_v16 = vsel %vm528_vm4, %v478_v2, %v536_v8  ;;  %v546_v17 = vsel %vm530_vm5, %v521_v3, %v538_v9  ;;  %v482_v18 = vadd.f32 %v481_v14, %v384_v58  ;;  %v525_v19 = vadd.f32 %v524_v15, %v392_v59 }
 0x24b   : > { %v742_v20 = vpack.c.bf16 %v544_v16, %v543_v10  ;;  %v743_v21 = vpack.c.bf16 %v546_v17, %v545_v11  ;;  %vm531_vm6 = vcmp.gt.f32.partialorder %v480_v12, 0.0  ;;  %v539_v22 = vmul.f32 0.01, %v480_v12 }
 0x24c   : > { %vm533_vm7 = vcmp.gt.f32.partialorder %v523_v13, 0.0  ;;  %v541_v23 = vmul.f32 0.01, %v523_v13  ;;  %vm532_vm8 = vcmp.gt.f32.partialorder %v482_v18, 0.0  ;;  %v540_v24 = vmul.f32 0.01, %v482_v18 }
 0x24d   : > { %575 = vst [vmem:[%s935_s25] sm:$0xff] %v742_v20  ;;  %576 = vst [vmem:[%s935_s25 + $0x8] sm:$0xff] %v743_v21  ;;  %v547_v25 = vsel %vm531_vm6, %v480_v12, %v539_v22  ;;  %vm534_vm9 = vcmp.gt.f32.partialorder %v525_v19, 0.0  ;;  %v542_v26 = vmul.f32 0.01, %v525_v19  ;;  %585 = sbr.rel (!%p910_p6) target bundleno = 603 (0x25b), region = 71 }
 0x24e   : > { %v549_v27 = vsel %vm533_vm7, %v523_v13, %v541_v23  ;;  %v548_v28 = vsel %vm532_vm8, %v482_v18, %v540_v24 }
 0x24f   : > { %v744_v29 = vpack.c.bf16 %v548_v28, %v547_v25  ;;  %v550_v30 = vsel %vm534_vm9, %v525_v19, %v542_v26 }
 0x250   : > { %v745_v31 = vpack.c.bf16 %v550_v30, %v549_v27 }
 0x251   : > { %577 = vst [vmem:[%s935_s25 + $0x10] sm:$0xff] %v744_v29 }
 0x252   : > { %578 = vst [vmem:[%s935_s25 + $0x18] sm:$0xff] %v745_v31 }
 0x254   : > { %v604_v32 = vld [vmem:[%s935_s25] sm:$0xff]  ;;  %v606_v33 = vld [vmem:[%s935_s25 + $0x8] sm:$0xff] }
 0x255   : > { %605 = vst [vmem:[%s591_s15] sm:$0xff] %v604_v32  ;;  %607 = vst [vmem:[%s591_s15 + $0x8] sm:$0xff] %v606_v33 }
 0x258   : > { %v608_v34 = vld [vmem:[%s935_s25 + $0x10] sm:$0xff] }
 0x259   : > { %v610_v35 = vld [vmem:[%s935_s25 + $0x18] sm:$0xff]  ;;  %609 = vst [vmem:[%s591_s15 + $0x40] sm:$0xff] %v608_v34 }
 0x25a   : > { %611 = vst [vmem:[%s591_s15 + $0x48] sm:$0xff] %v610_v35 }
 0x25b PF: > { %s15_s22 = sadd.s32 1, %s842_s22   ;;  %s1004_s18 = smov %s830_s19 }
 0x25c   : > { %p12_p13 = scmp.ge.s32.totalorder %s15_s22, 6   ;;  %s1005_s19 = smov %s915_s28 }
 0x25d   : > { %s1006_s20 = smov %s838_s21  ;;  %s1007_s21 = smov %s1009_s23 }
 0x25e   :  { %14 = sbr.rel (!%p12_p13) target bundleno = 3 (0x3), region = 131 }

// kernel: transformer_forward.32
= control target key start
LH: loop header
LB: loop body
LE: loop exit
PB: predicated region body
PF: predicated region fallthrough
CT: control target
= control target key end

     0   :  { %s1286_s15 = smov 0   ;;  %s1288_s16 = smov 0   ;;  %s1464_s0 = inlined_call_operand.vmem [shape: bf16[2,8,32], index: 0, kind: input, shape index: {}]   ;;  %s1465_s1 = inlined_call_operand.vmem [shape: bf16[2,8,32], index: 1, kind: input, shape index: {}]   ;;  %s1466_s2 = inlined_call_operand.vmem [shape: bf16[2,8,32], index: 2, kind: input, shape index: {}]   ;;  %s1467_s3 = inlined_call_operand.vmem [shape: f32[2,1,8], index: 3, kind: input, shape index: {}]   ;;  %s1468_s4 = inlined_call_operand.vmem [shape: bf16[2,8,32], index: 4, kind: output, shape index: {}]  }
   0x1   :  { %s1290_s17 = smov 0  }
   0x2 LB: > { %s33_s18 = sadd.s32 1, %s1245_s16  ;;  %p1076_p0 = scmp.ge.s32.totalorder %s1249_s17, 1  ;;  %s1249_s17 = sphi %s1290_s17, %s14_s17   ;;  %s1245_s16 = sphi %s1288_s16, %s1470_s16   ;;  %s1241_s15 = sphi %s1286_s15, %s1469_s15  }
   0x3   : > { %p35_p1 = scmp.ge.s32.totalorder %s33_s18, 2  ;;  %p228_p2 = scmp.lt.s32.totalorder %s1249_s17, 3 }
   0x5   : > { %s1472_s18 = smov (%p35_p1, %s33_s18), 0  ;;  %p229_p3 = pnand %p1076_p0, %p228_p2 }
   0x6   : > { %p278_p4 = scmp.lt.s32.totalorder (!%p229_p3), %s1241_s15, 1  ;;  %vm326_vm0 = vcmask (!%p229_p3), 64512   ;;  %v1251_v0 = vmov (!%p229_p3), 0.0   ;;  %vm1252_vm1 = vmmov (!%p229_p3), 0   ;;  %vm317_vm2 = vcmask (!%p229_p3), 7168   ;;  %s1255_s29 = smov (!%p229_p3), 120  }
   0x7   : > { %232 = sbr.rel (%p229_p3) target bundleno = 1468 (0x5bc), region = 36  ;;  %1117 = vmatprep.subr.bf16.mxu0 (!%p229_p3), %v1251_v0  ;;  %327 = vst.msk [vmem:[#allocation4] sm:$0xff] (!%p229_p3), %vm326_vm0, %v1251_v0  ;;  %328 = vst.msk [vmem:[#allocation4 + $0x8] sm:$0xff] (!%p229_p3), %vm326_vm0, %v1251_v0  ;;  %1119 = vmatprep.mubr.msk.bf16.mxu0 (!%p229_p3), %vm1252_vm1, %v1251_v0  ;;  %v1253_v4 = vmov (!%p229_p3), -inf   ;;  %v1254_v12 = vmov (!%p229_p3), 0   ;;  %s1256_s30 = smov (!%p229_p3), 112  }
   0x8   : > { %329 = vst.msk [vmem:[#allocation4 + $0x10] sm:$0xff] (!%p229_p3), %vm326_vm0, %v1251_v0  ;;  %330 = vst.msk [vmem:[#allocation4 + $0x18] sm:$0xff] (!%p229_p3), %vm326_vm0, %v1251_v0  ;;  %1123 = vmatprep.subr.bf16.mxu1 (!%p229_p3), %v1251_v0  ;;  %1125 = vmatprep.mubr.msk.bf16.mxu1 (!%p229_p3), %vm1252_vm1, %v1251_v0  ;;  %s1257_s5 = smov (!%p229_p3), 104   ;;  %vm423_vm3 = vcmask (!%p229_p3), 1043456   ;;  %vm897_vm4 = vcmask (!%p229_p3), 60416   ;;  %s1258_s12 = smov (!%p229_p3), 8  }
   0x9   : > { %318 = vst.msk [vmem:[#allocation2] sm:$0xff] (!%p229_p3), %vm317_vm2, %v1253_v4  ;;  %319 = vst.msk [vmem:[#allocation2 + $0x8] sm:$0xff] (!%p229_p3), %vm317_vm2, %v1253_v4  ;;  %1199 = vset.pattern.permute.xlu0 (!%p229_p3), %v1254_v12  ;;  %1200 = vset.pattern.permute.xlu1 (!%p229_p3), %v1254_v12  ;;  %s1259_s13 = smov (!%p229_p3), 16   ;;  %s1260_s14 = smov (!%p229_p3), 24   ;;  %vm915_vm5 = vcmask (!%p229_p3), 126016   ;;  %vm933_vm6 = vcmask (!%p229_p3), 191616  }
   0xa   : > { %320 = vst.msk [vmem:[#allocation2 + $0x10] sm:$0xff] (!%p229_p3), %vm317_vm2, %v1253_v4  ;;  %321 = vst.msk [vmem:[#allocation2 + $0x18] sm:$0xff] (!%p229_p3), %vm317_vm2, %v1253_v4  ;;  %vm951_vm7 = vcmask (!%p229_p3), 257216  }
   0xb   : > { %322 = vst.msk [vmem:[#allocation3] sm:$0xff] (!%p229_p3), %vm317_vm2, %v1251_v0  ;;  %323 = vst.msk [vmem:[#allocation3 + $0x8] sm:$0xff] (!%p229_p3), %vm317_vm2, %v1251_v0 }
   0xc   : > { %324 = vst.msk [vmem:[#allocation3 + $0x10] sm:$0xff] (!%p229_p3), %vm317_vm2, %v1251_v0  ;;  %325 = vst.msk [vmem:[#allocation3 + $0x18] sm:$0xff] (!%p229_p3), %vm317_vm2, %v1251_v0 }
   0xe   : > { %s1474_s15 = smov (!%p278_p4, %s1241_s15), 1 }
   0xf   : > { %s1318_s19 = sshll.u32 %s1474_s15, 2  ;;  %s304_s28 = scalar_lea.vmem %s1467_s3, %s1474_s15 }
  0x10   : > { %s291_s22 = scalar_lea.vmem %s1465_s1, %s1318_s19  ;;  %s284_s25 = scalar_lea.vmem %s1464_s0, %s1318_s19  ;;  %v1348_v5 = vld [vmem:[%s304_s28] ss:$0 sm:$0xff]  ;;  %v1404_v57 = vld [vmem:[#allocation2 + $0x8] sm:$0xff] }
  0x11   : > { %v333_v1 = vld [vmem:[%s291_s22] sm:$0xf]  ;;  %s298_s8 = scalar_lea.vmem %s1466_s2, %s1318_s19  ;;  %v665_v61 = vld [vmem:[#allocation2 + $0x10] sm:$0xff]  ;;  %s1446_s11 = scalar_lea.vmem %s1468_s4, %s1318_s19 }
  0x12   : > { %v346_v2 = vsel %vm326_vm0, %v333_v1, 0  ;;  %v332_v3 = vld [vmem:[%s284_s25] sm:$0xf]  ;;  %v1085_v13 = vcombine.low %v333_v1, %v333_v1 }
  0x13   : > { %1118 = vmatpush3.bf16.xpose.msra.mxu0 %v346_v2  ;;  %v1084_v14 = vcombine.low %v332_v3, %v332_v3  ;;  %v1358_v15 = vld [vmem:[#allocation2] sm:$0xff]  ;;  %v800_v2 = vld [vmem:[#allocation2 + $0x18] sm:$0xff] }
  0x14   : > { %1135 = vmatprep.subr.bf16.mxu0 %v1251_v0  ;;  %478 = vrot.lane.b32.xlu1 %v1085_v13, %s1255_s29  ;;  %v1372_v19 = vld [vmem:[%s298_s8] sm:$0xf] }
  0x15   : > { %v425_v20 = vsel %vm423_vm3, %v1372_v19, 0 }
  0x16   : > { %1124 = vmatpush3.bf16.msra.mxu1 %v425_v20 }
  0x17   : > { %1129 = vmatprep.subr.bf16.mxu1 %v1251_v0 }
  0x18   : > { %473 = vrot.lane.b32.xlu1 %v1084_v14, %s1255_s29 }
  0x1a   : > { %1120 = vmatmul.mubr.msk.bf16.vlgmr.msra.gmra.mrb[0].mxu0 %vm326_vm0, %v332_v3 }
  0x1b   : > { %1137 = vmatprep.mubr.msk.bf16.mxu0 %vm1252_vm1, %v1251_v0 }
  0x1c   : > { %616 = vrot.lane.b32.xlu1 %v1085_v13, %s1256_s30 }
  0x20   : > { %614 = vrot.lane.b32.xlu1 %v1084_v14, %s1256_s30 }
  0x24   : > { %751 = vrot.lane.b32.xlu1 %v1085_v13, %s1257_s5 }
  0x28   : > { %749 = vrot.lane.b32.xlu1 %v1084_v14, %s1257_s5 }
  0x86   : > { %v479_v24 = vpop.permute.xlu1 %478 }
  0x87   : > { %v484_v27 = vsel %vm326_vm0, %v479_v24, 0 }
  0x8a   : > { %v474_v25 = vpop.permute.xlu1 %473 }
  0x8e   : > { %v617_v29 = vpop.permute.xlu1 %616 }
  0x8f   : > { %v622_v31 = vsel %vm326_vm0, %v617_v29, 0 }
  0x92   : > { %v615_v30 = vpop.permute.xlu1 %614 }
  0x96   : > { %v752_v32 = vpop.permute.xlu1 %751 }
  0x97   : > { %v757_v33 = vsel %vm326_vm0, %v752_v32, 0 }
  0x9a   : > { %v750_v34 = vpop.permute.xlu1 %749 }
  0xed   : > { %v382_v6 = vpop.f32.mrb[0].mxu0 }
  0xee   : > { %v383_v7 = vadd.f32 %v1348_v5, %v382_v6  ;;  %v1121_v8 = vpop.f32.mrb[1].mxu0 }
  0xef   : > { %v385_v9 = vpop.f32.mrb[2].mxu0 }
  0xf0   : > { %v1122_v10 = vpop.f32.mrb[3].mxu0  ;;  %v389_v11 = vsel %vm326_vm0, %v383_v7, -inf }
  0xf1   : > { %390 = vmax.xlane.f32.xlu0 %v389_v11 }
 0x17e   : > { %v391_v16 = vpop.xlane.xlu0 %390 }
 0x17f   : > { %v1361_v17 = vmax.f32 %v1358_v15, %v391_v16 }
 0x181   : > { %v393_v18 = vsub.f32 %v1358_v15, %v1361_v17  ;;  %469 = vst.msk [vmem:[#allocation2] sm:$0xff] %vm317_vm2, %v1361_v17  ;;  %398 = vperm.xlu0 %1199, %v1361_v17  }
 0x200   : > { %v399_v21 = vpop.permute.xlu0 %398 }
 0x201   : > { %v401_v22 = vsub.f32 %v383_v7, %v399_v21 }
 0x203   : > { %v402_v23 = vmul.f32 1.442695, %v401_v22 }
 0x205   : > { %1203 = vpow2.f32 %v402_v23 }
 0x20f   : > { %v1377_v26 = vpop.eup %1203 }
 0x210   : > { %v419_v28 = vpack.c.bf16 %v1377_v26, %v1377_v26  ;;  %v406_v7 = vsel %vm326_vm0, %v1377_v26, 0.0 }
 0x212   : > { %1126 = vmatmul.mubr.msk.bf16.vlgmr.msra.gmra.mrb[0].mxu1 %vm326_vm0, %v419_v28 }
 0x213   : > { %1130 = vmatpush3.bf16.xpose.msra.mxu1 %v484_v27  ;;  %1131 = vmatprep.mubr.msk.bf16.mxu1 %vm1252_vm1, %v1251_v0 }
 0x214   : > { %1141 = vmatprep.subr.bf16.mxu1 %v1251_v0 }
 0x21a   : > { %1132 = vmatmul.mubr.msk.bf16.vlgmr.msra.gmra.mrb[4].mxu1 %vm326_vm0, %v474_v25 }
 0x21b   : > { %1142 = vmatpush3.bf16.xpose.msra.mxu1 %v622_v31  ;;  %1143 = vmatprep.mubr.msk.bf16.mxu1 %vm1252_vm1, %v1251_v0 }
 0x21c   : > { %1153 = vmatprep.subr.bf16.mxu1 %v1251_v0 }
 0x222   : > { %1144 = vmatmul.mubr.msk.bf16.vlgmr.msra.gmra.mrb[8].mxu1 %vm326_vm0, %v615_v30 }
 0x223   : > { %1154 = vmatpush3.bf16.xpose.msra.mxu1 %v757_v33  ;;  %1155 = vmatprep.mubr.msk.bf16.mxu1 %vm1252_vm1, %v1251_v0  ;;  %v394_v33 = vmul.f32 1.442695, %v393_v18 }
 0x22a   : > { %1156 = vmatmul.mubr.msk.bf16.vlgmr.msra.gmra.mrb[12].mxu1 %vm326_vm0, %v750_v34 }
 0x2e5   : > { %v1396_v35 = vpop.f32.mrb[0].mxu1 }
 0x2e6   : > { %v1127_v36 = vpop.f32.mrb[1].mxu1 }
 0x2e7   : > { %v464_v37 = vpop.f32.mrb[2].mxu1 }
 0x2e8   : > { %v1128_v38 = vpop.f32.mrb[3].mxu1 }
 0x2ed   : > { %v520_v39 = vpop.f32.mrb[4].mxu1 }
 0x2ee   : > { %v521_v40 = vadd.f32 %v1348_v5, %v520_v39  ;;  %v1133_v41 = vpop.f32.mrb[5].mxu1 }
 0x2ef   : > { %v523_v42 = vpop.f32.mrb[6].mxu1  ;;  %v404_v41 = vld [vmem:[#allocation3] sm:$0xff] }
 0x2f0   : > { %v1134_v43 = vpop.f32.mrb[7].mxu1  ;;  %v528_v44 = vsel %vm326_vm0, %v521_v40, -inf }
 0x2f1   : > { %529 = vmax.xlane.f32.xlu1 %v528_v44 }
 0x2f5   : > { %v658_v45 = vpop.f32.mrb[8].mxu1 }
 0x2f6   : > { %v659_v46 = vadd.f32 %v1348_v5, %v658_v45  ;;  %v1145_v47 = vpop.f32.mrb[9].mxu1 }
 0x2f7   : > { %v661_v48 = vpop.f32.mrb[10].mxu1 }
 0x2f8   : > { %v1146_v49 = vpop.f32.mrb[11].mxu1  ;;  %v666_v50 = vsel %vm326_vm0, %v659_v46, -inf }
 0x2f9   : > { %667 = vmax.xlane.f32.xlu0 %v666_v50  ;;  %v682_v50 = vld [vmem:[#allocation3 + $0x10] sm:$0xff] }
 0x2fd   : > { %v793_v51 = vpop.f32.mrb[12].mxu1 }
 0x2fe   : > { %v794_v52 = vadd.f32 %v1348_v5, %v793_v51  ;;  %v1157_v53 = vpop.f32.mrb[13].mxu1  ;;  %v1087_v5 = vcombine.low %v1372_v19, %v1372_v19 }
 0x2ff   : > { %v796_v54 = vpop.f32.mrb[14].mxu1 }
 0x300   : > { %v1158_v55 = vpop.f32.mrb[15].mxu1  ;;  %v801_v56 = vsel %vm326_vm0, %v794_v52, -inf }
 0x301   : > { %802 = vmax.xlane.f32.xlu1 %v801_v56  ;;  %v817_v55 = vld [vmem:[#allocation3 + $0x18] sm:$0xff]  ;;  %v412_v56 = vld [vmem:[#allocation4] sm:$0xff] }
 0x37e   : > { %v530_v58 = vpop.xlane.xlu1 %529 }
 0x37f   : > { %v531_v59 = vmax.f32 %v1404_v57, %v530_v58 }
 0x381   : > { %v532_v60 = vsub.f32 %v1404_v57, %v531_v59  ;;  %613 = vst.msk [vmem:[#allocation2 + $0x8] sm:$0xff] %vm317_vm2, %v531_v59  ;;  %537 = vperm.xlu1 %1200, %v531_v59  }
 0x383   : > { %v533_v36 = vmul.f32 1.442695, %v532_v60 }
 0x386   : > { %v668_v62 = vpop.xlane.xlu0 %667 }
 0x387   : > { %v669_v63 = vmax.f32 %v665_v61, %v668_v62 }
 0x389   : > { %v670_v1 = vsub.f32 %v665_v61, %v669_v63  ;;  %748 = vst.msk [vmem:[#allocation2 + $0x10] sm:$0xff] %vm317_vm2, %v669_v63  ;;  %675 = vperm.xlu0 %1199, %v669_v63  }
 0x38b   : > { %v671_v38 = vmul.f32 1.442695, %v670_v1 }
 0x38e   : > { %v803_v3 = vpop.xlane.xlu1 %802 }
 0x38f   : > { %v804_v4 = vmax.f32 %v800_v2, %v803_v3 }
 0x391   : > { %v805_v6 = vsub.f32 %v800_v2, %v804_v4  ;;  %883 = vst.msk [vmem:[#allocation2 + $0x18] sm:$0xff] %vm317_vm2, %v804_v4  ;;  %810 = vperm.xlu1 %1200, %v804_v4  }
 0x393   : > { %v806_v37 = vmul.f32 1.442695, %v805_v6 }
 0x395   : > { %563 = vrot.lane.b32.xlu1 %v1087_v5, %s1255_s29 }
 0x399   : > { %698 = vrot.lane.b32.xlu1 %v1087_v5, %s1256_s30 }
 0x39d   : > { %833 = vrot.lane.b32.xlu1 %v1087_v5, %s1257_s5 }
 0x3c1   : > { %407 = vadd.xlane.f32.xlu1 %v406_v7 }
 0x400   : > { %v538_v8 = vpop.permute.xlu1 %537 }
 0x401   : > { %v540_v9 = vsub.f32 %v521_v40, %v538_v8 }
 0x403   : > { %v541_v10 = vmul.f32 1.442695, %v540_v9 }
 0x405   : > { %1205 = vpow2.f32 %v541_v10  ;;  %v552_v10 = vld [vmem:[#allocation4 + $0x8] sm:$0xff] }
 0x408   : > { %v676_v11 = vpop.permute.xlu0 %675 }
 0x409   : > { %v678_v12 = vsub.f32 %v659_v46, %v676_v11  ;;  %v544_v46 = vld [vmem:[#allocation3 + $0x8] sm:$0xff] }
 0x40b   : > { %v679_v13 = vmul.f32 1.442695, %v678_v12 }
 0x40d   : > { %1207 = vpow2.f32 %v679_v13 }
 0x40f   : > { %v1206_v14 = vpop.eup %1205 }
 0x410   : > { %v811_v16 = vpop.permute.xlu1 %810  ;;  %v546_v19 = vsel %vm326_vm0, %v1206_v14, 0.0  ;;  %v559_v25 = vpack.c.bf16 %v1206_v14, %v1206_v14 }
 0x411   : > { %v813_v20 = vsub.f32 %v794_v52, %v811_v16  ;;  %547 = vadd.xlane.f32.xlu0 %v546_v19 }
 0x413   : > { %v814_v21 = vmul.f32 1.442695, %v813_v20  ;;  %v690_v20 = vld [vmem:[#allocation4 + $0x10] sm:$0xff] }
 0x414   : > { %v564_v22 = vpop.permute.xlu1 %563 }
 0x415   : > { %1209 = vpow2.f32 %v814_v21  ;;  %v569_v23 = vsel %vm423_vm3, %v564_v22, 0 }
 0x416   : > { %1136 = vmatpush3.bf16.msra.mxu0 %v569_v23  ;;  %1211 = vpow2.f32 %v394_v33 }
 0x417   : > { %v1208_v24 = vpop.eup %1207  ;;  %1147 = vmatprep.subr.bf16.mxu0 %v1251_v0  ;;  %1213 = vpow2.f32 %v533_v36 }
 0x418   : > { %v684_v26 = vsel %vm326_vm0, %v1208_v24, 0.0  ;;  %v699_v27 = vpop.permute.xlu1 %698  ;;  %v697_v31 = vpack.c.bf16 %v1208_v24, %v1208_v24  ;;  %1215 = vpow2.f32 %v806_v37 }
 0x419   : > { %685 = vadd.xlane.f32.xlu0 %v684_v26  ;;  %1138 = vmatmul.mubr.msk.bf16.vlgmr.msra.gmra.mrb[4].mxu0 %vm326_vm0, %v559_v25  ;;  %v704_v28 = vsel %vm423_vm3, %v699_v27, 0  ;;  %1217 = vpow2.f32 %v671_v38  ;;  %v825_v27 = vld [vmem:[#allocation4 + $0x18] sm:$0xff] }
 0x41a   : > { %1148 = vmatpush3.bf16.msra.mxu0 %v704_v28  ;;  %1149 = vmatprep.mubr.msk.bf16.mxu0 %vm1252_vm1, %v1251_v0 }
 0x41b   : > { %1159 = vmatprep.subr.bf16.mxu0 %v1251_v0 }
 0x41c   : > { %v834_v29 = vpop.permute.xlu1 %833 }
 0x41d   : > { %v839_v32 = vsel %vm423_vm3, %v834_v29, 0 }
 0x41f   : > { %v1210_v30 = vpop.eup %1209 }
 0x420   : > { %v819_v34 = vsel %vm326_vm0, %v1210_v30, 0.0  ;;  %v832_v39 = vpack.c.bf16 %v1210_v30, %v1210_v30  ;;  %v1212_v15 = vpop.eup %1211 }
 0x421   : > { %1150 = vmatmul.mubr.msk.bf16.vlgmr.msra.gmra.mrb[8].mxu0 %vm326_vm0, %v697_v31  ;;  %820 = vadd.xlane.f32.xlu1 %v819_v34  ;;  %v1214_v17 = vpop.eup %1213 }
 0x422   : > { %1160 = vmatpush3.bf16.msra.mxu0 %v839_v32  ;;  %1161 = vmatprep.mubr.msk.bf16.mxu0 %vm1252_vm1, %v1251_v0  ;;  %v1216_v18 = vpop.eup %1215  ;;  %v405_v0 = vmul.f32 %v1212_v15, %v404_v41  ;;  %v545_v47 = vmul.f32 %v1214_v17, %v544_v46 }
 0x423   : > { %v1218_v40 = vpop.eup %1217  ;;  %v818_v57 = vmul.f32 %v1216_v18, %v817_v55 }
 0x424   : > { %v683_v51 = vmul.f32 %v1218_v40, %v682_v50 }
 0x429   : > { %1162 = vmatmul.mubr.msk.bf16.vlgmr.msra.gmra.mrb[12].mxu0 %vm326_vm0, %v832_v39 }
 0x42f   : > { %415 = vperm.xlu0 %1199, %v1212_v15  }
 0x432   : > { %555 = vperm.xlu1 %1200, %v1214_v17  }
 0x433   : > { %828 = vperm.xlu0 %1199, %v1216_v18  }
 0x436   : > { %693 = vperm.xlu1 %1200, %v1218_v40  }
 0x44e   : > { %v408_v42 = vpop.xlane.xlu1 %407 }
 0x44f   : > { %v409_v43 = vadd.f32 %v408_v42, %v405_v0 }
 0x451   : > { %411 = vst.msk [vmem:[#allocation3] sm:$0xff] %vm317_vm2, %v409_v43 }
 0x458   : > { %v887_v44 = vld [vmem:[#allocation3] sm:$0xff] }
 0x459   : > { %1219 = vrcp.f32 %v887_v44 }
 0x463   : > { %v1220_v45 = vpop.eup %1219 }
 0x464   : > { %892 = vperm.xlu1 %1200, %v1220_v45  }
 0x49e   : > { %v548_v48 = vpop.xlane.xlu0 %547 }
 0x49f   : > { %v549_v49 = vadd.f32 %v548_v48, %v545_v47 }
 0x4a1   : > { %550 = vst.msk [vmem:[#allocation3 + $0x8] sm:$0xff] %vm317_vm2, %v549_v49 }
 0x4a6   : > { %v686_v52 = vpop.xlane.xlu0 %685 }
 0x4a7   : > { %v687_v53 = vadd.f32 %v686_v52, %v683_v51 }
 0x4a8   : > { %v899_v54 = vld [vmem:[#allocation3 + $0x8] sm:$0xff] }
 0x4a9   : > { %688 = vst.msk [vmem:[#allocation3 + $0x10] sm:$0xff] %vm317_vm2, %v687_v53  ;;  %1221 = vrcp.f32 %v899_v54 }
 0x4ae   : > { %v821_v58 = vpop.xlane.xlu1 %820  ;;  %v416_v59 = vpop.permute.xlu0 %415 }
 0x4af   : > { %v822_v60 = vadd.f32 %v821_v58, %v818_v57  ;;  %v418_v61 = vmul.f32 %v416_v59, %v412_v56 }
 0x4b0   : > { %v917_v62 = vld [vmem:[#allocation3 + $0x10] sm:$0xff] }
 0x4b1   : > { %823 = vst.msk [vmem:[#allocation3 + $0x18] sm:$0xff] %vm317_vm2, %v822_v60  ;;  %v467_v63 = vadd.f32 %v1396_v35, %v418_v61  ;;  %1223 = vrcp.f32 %v917_v62 }
 0x4b2   : > { %v556_v5 = vpop.permute.xlu1 %555  ;;  %v829_v28 = vpop.permute.xlu0 %828 }
 0x4b3   : > { %v1222_v1 = vpop.eup %1221  ;;  %468 = vst.msk [vmem:[#allocation4] sm:$0xff] %vm326_vm0, %v467_v63  ;;  %v558_v11 = vmul.f32 %v556_v5, %v552_v10  ;;  %v831_v29 = vmul.f32 %v829_v28, %v825_v27 }
 0x4b4   : > { %904 = vperm.xlu0 %1199, %v1222_v1  }
 0x4b6   : > { %v694_v6 = vpop.permute.xlu1 %693 }
 0x4b7   : > { %v696_v21 = vmul.f32 %v694_v6, %v690_v20 }
 0x4b8   : > { %v935_v2 = vld [vmem:[#allocation3 + $0x18] sm:$0xff] }
 0x4b9   : > { %1225 = vrcp.f32 %v935_v2 }
 0x4ba   : > { %v889_v7 = vld [vmem:[#allocation4] sm:$0xff] }
 0x4bb   : > { %v1224_v3 = vpop.eup %1223 }
 0x4bc   : > { %922 = vperm.xlu0 %1199, %v1224_v3  }
 0x4c3   : > { %v1226_v4 = vpop.eup %1225 }
 0x4c4   : > { %940 = vperm.xlu0 %1199, %v1226_v4  }
 0x4e3   : > { %v893_v8 = vpop.permute.xlu1 %892 }
 0x4e4   : > { %v895_v9 = vmul.f32 %v893_v8, %v889_v7 }
 0x4e6   : > { %v896_v35 = vpack.c.bf16 %v895_v9, %v895_v9 }
 0x4e8   : > { %898 = vst.msk [vmem:[%s1446_s11] sm:$0xf] %vm897_vm4, %v896_v35 }
 0x4ec   : > { %v605_v12 = vpop.f32.mrb[4].mxu0 }
 0x4ed   : > { %v611_v13 = vadd.f32 %v605_v12, %v558_v11  ;;  %v1139_v14 = vpop.f32.mrb[5].mxu0 }
 0x4ee   : > { %v608_v16 = vpop.f32.mrb[6].mxu0 }
 0x4ef   : > { %612 = vst.msk [vmem:[#allocation4 + $0x8] sm:$0xff] %vm326_vm0, %v611_v13  ;;  %v1140_v19 = vpop.f32.mrb[7].mxu0 }
 0x4f4   : > { %v740_v22 = vpop.f32.mrb[8].mxu0 }
 0x4f5   : > { %v746_v23 = vadd.f32 %v740_v22, %v696_v21  ;;  %v1151_v24 = vpop.f32.mrb[9].mxu0 }
 0x4f6   : > { %v743_v25 = vpop.f32.mrb[10].mxu0  ;;  %v901_v37 = vld [vmem:[#allocation4 + $0x8] sm:$0xff] }
 0x4f7   : > { %747 = vst.msk [vmem:[#allocation4 + $0x10] sm:$0xff] %vm326_vm0, %v746_v23  ;;  %v1152_v26 = vpop.f32.mrb[11].mxu0 }
 0x4fc   : > { %v875_v30 = vpop.f32.mrb[12].mxu0 }
 0x4fd   : > { %v881_v31 = vadd.f32 %v875_v30, %v831_v29  ;;  %v1163_v32 = vpop.f32.mrb[13].mxu0 }
 0x4fe   : > { %v878_v33 = vpop.f32.mrb[14].mxu0  ;;  %v919_v17 = vld [vmem:[#allocation4 + $0x10] sm:$0xff] }
 0x4ff   : > { %882 = vst.msk [vmem:[#allocation4 + $0x18] sm:$0xff] %vm326_vm0, %v881_v31  ;;  %v1164_v34 = vpop.f32.mrb[15].mxu0 }
 0x506   : > { %v937_v0 = vld [vmem:[#allocation4 + $0x18] sm:$0xff] }
 0x533   : > { %v905_v36 = vpop.permute.xlu0 %904 }
 0x534   : > { %v907_v38 = vmul.f32 %v905_v36, %v901_v37 }
 0x536   : > { %v1098_v39 = vpack.c.bf16 %v907_v38, %v907_v38 }
 0x538   : > { %912 = vrot.lane.b32.xlu1 %v1098_v39, %s1258_s12 }
 0x53b   : > { %v923_v15 = vpop.permute.xlu0 %922 }
 0x53c   : > { %v925_v18 = vmul.f32 %v923_v15, %v919_v17 }
 0x53e   : > { %v1099_v40 = vpack.c.bf16 %v925_v18, %v925_v18 }
 0x540   : > { %930 = vrot.lane.b32.xlu1 %v1099_v40, %s1259_s13 }
 0x543   : > { %v941_v41 = vpop.permute.xlu0 %940 }
 0x544   : > { %v943_v42 = vmul.f32 %v941_v41, %v937_v0 }
 0x546   : > { %v1100_v43 = vpack.c.bf16 %v943_v42, %v943_v42 }
 0x548   : > { %948 = vrot.lane.b32.xlu1 %v1100_v43, %s1260_s14 }
 0x5aa   : > { %v913_v44 = vpop.permute.xlu1 %912 }
 0x5ab   : > { %916 = vst.msk [vmem:[%s1446_s11] sm:$0xf] %vm915_vm5, %v913_v44 }
 0x5b2   : > { %v931_v45 = vpop.permute.xlu1 %930 }
 0x5b3   : > { %934 = vst.msk [vmem:[%s1446_s11] sm:$0xf] %vm933_vm6, %v931_v45 }
 0x5ba   : > { %v949_v46 = vpop.permute.xlu1 %948 }
 0x5bb   : > { %952 = vst.msk [vmem:[%s1446_s11] sm:$0xf] %vm951_vm7, %v949_v46 }
 0x5bc PF: > { %s14_s17 = sadd.s32 1, %s1249_s17   ;;  %s1469_s15 = smov %s1245_s16 }
 0x5bd   : > { %p11_p5 = scmp.ge.s32.totalorder %s14_s17, 4   ;;  %s1470_s16 = smov %s1472_s18 }
 0x5bf   :  { %13 = sbr.rel (!%p11_p5) target bundleno = 2 (0x2), region = 92 }

// kernel: transformer_forward.41
= control target key start
LH: loop header
LB: loop body
LE: loop exit
PB: predicated region body
PF: predicated region fallthrough
CT: control target
= control target key end

     0   :  { %vm16_vm0 = vcmask 261120   ;;  %vm70_vm1 = vcmask 257024   ;;  %s129_s0 = inlined_call_operand.vmem [shape: f32[16,32], index: 0, kind: input, shape index: {}]   ;;  %s130_s1 = inlined_call_operand.vmem [shape: f32[1,32], index: 1, kind: input, shape index: {}]   ;;  %s131_s2 = inlined_call_operand.vmem [shape: f32[1,32], index: 2, kind: input, shape index: {}]   ;;  %s132_s3 = inlined_call_operand.vmem [shape: bf16[16,32], index: 3, kind: output, shape index: {}]  }
   0x1   :  { %v14_v0 = vld [vmem:[%s129_s0] sm:$0xff]  ;;  %v15_v1 = vld [vmem:[%s129_s0 + $0x8] sm:$0xff] }
   0x2   :  { %v17_v2 = vsel %vm16_vm0, %v14_v0, 0.0  ;;  %v20_v3 = vsel %vm16_vm0, %v15_v1, 0.0  ;;  %v77_v21 = vld [vmem:[%s130_s1] ss:$0 sm:$0xff] }
   0x3   :  { %18 = vadd.xlane.f32.xlu0 %v17_v2  ;;  %v78_v23 = vld [vmem:[%s131_s2] ss:$0 sm:$0xff] }
   0x7   :  { %21 = vadd.xlane.f32.xlu0 %v20_v3 }
  0x90   :  { %v19_v4 = vpop.xlane.xlu0 %18 }
  0x91   :  { %v24_v5 = vmul.f32 0.03125, %v19_v4 }
  0x93   :  { %v26_v6 = vsub.f32 %v14_v0, %v24_v5 }
  0x94   :  { %v22_v7 = vpop.xlane.xlu0 %21 }
  0x95   :  { %v25_v8 = vmul.f32 0.03125, %v22_v7  ;;  %v28_v9 = vmul.f32 %v26_v6, %v26_v6 }
  0x97   :  { %v27_v10 = vsub.f32 %v15_v1, %v25_v8  ;;  %v30_v11 = vsel %vm16_vm0, %v28_v9, 0.0 }
  0x98   :  { %31 = vadd.xlane.f32.xlu1 %v30_v11 }
  0x99   :  { %v29_v12 = vmul.f32 %v27_v10, %v27_v10 }
  0x9b   :  { %v33_v13 = vsel %vm16_vm0, %v29_v12, 0.0 }
  0x9c   :  { %34 = vadd.xlane.f32.xlu1 %v33_v13 }
 0x125   :  { %v32_v14 = vpop.xlane.xlu1 %31 }
 0x126   :  { %v36_v15 = vmul.f32 0.03125, %v32_v14 }
 0x128   :  { %v38_v16 = vadd.f32 1e-05, %v36_v15 }
 0x129   :  { %v35_v17 = vpop.xlane.xlu1 %34 }
 0x12a   :  { %83 = vrsqrt.f32 %v38_v16  ;;  %v37_v18 = vmul.f32 0.03125, %v35_v17 }
 0x12c   :  { %v39_v19 = vadd.f32 1e-05, %v37_v18 }
 0x12e   :  { %85 = vrsqrt.f32 %v39_v19 }
 0x134   :  { %v84_v20 = vpop.eup %83 }
 0x135   :  { %v42_v22 = vmul.f32 %v84_v20, %v26_v6 }
 0x137   :  { %v51_v24 = vmul.f32 %v77_v21, %v42_v22 }
 0x138   :  { %v86_v25 = vpop.eup %85 }
 0x139   :  { %v60_v26 = vadd.f32 %v78_v23, %v51_v24  ;;  %v43_v27 = vmul.f32 %v86_v25, %v27_v10 }
 0x13b   :  { %v81_v28 = vpack.c.bf16 %v60_v26, %v60_v26  ;;  %v52_v29 = vmul.f32 %v77_v21, %v43_v27 }
 0x13d   :  { %71 = vst.msk [vmem:[%s132_s3] sm:$0xf] %vm70_vm1, %v81_v28  ;;  %v61_v30 = vadd.f32 %v78_v23, %v52_v29 }
 0x13f   :  { %v82_v31 = vpack.c.bf16 %v61_v30, %v61_v30 }
 0x141   :  { %72 = vst.msk [vmem:[%s132_s3 + $0x4] sm:$0xf] %vm70_vm1, %v82_v31 }

// kernel: transformer_forward.35
= control target key start
LH: loop header
LB: loop body
LE: loop exit
PB: predicated region body
PF: predicated region fallthrough
CT: control target
= control target key end

     0   :  { %s1587_s15 = smov 0   ;;  %s1589_s16 = smov 0   ;;  %s1749_s0 = inlined_call_operand.vmem [shape: bf16[16,2048], index: 0, kind: input, shape index: {}]   ;;  %s1750_s1 = inlined_call_operand.vmem [shape: bf16[2048,32], index: 1, kind: input, shape index: {}]   ;;  %s1751_s2 = inlined_call_operand.vmem [shape: f32[1,32], index: 2, kind: input, shape index: {}]   ;;  %s1752_s3 = inlined_call_operand.vmem [shape: f32[16,32], index: 3, kind: input, shape index: {}]   ;;  %s1753_s4 = inlined_call_operand.vmem [shape: f32[16,32], index: 4, kind: output, shape index: {}]  }
   0x1   :  { %s1591_s17 = smov 0   ;;  %s1593_s18 = smov 0  }
   0x2   :  { %s1595_s19 = smov 0  }
   0x3 LB: > { %s26_s20 = sadd.s32 1, %s1555_s18  ;;  %p49_p1 = scmp.ne.s32.totalorder %s1547_s16, %s1543_s15  ;;  %s1559_s19 = sphi %s1595_s19, %s14_s19   ;;  %s1555_s18 = sphi %s1593_s18, %s1757_s18   ;;  %s1551_s17 = sphi %s1591_s17, %s1756_s17   ;;  %s1547_s16 = sphi %s1589_s16, %s1755_s16   ;;  %s1543_s15 = sphi %s1587_s15, %s1754_s15  }
   0x4   : > { %p27_p0 = scmp.ge.s32.totalorder %s26_s20, 2  ;;  %p50_p2 = scmp.eq.s32.totalorder %s1559_s19, 0 }
   0x5   : > { %s42_s22 = sadd.s32 1, %s1547_s16  ;;  %p1240_p5 = scmp.ge.s32.totalorder %s1559_s19, 2 }
   0x6   : > { %s1759_s20 = smov (%p27_p0, %s26_s20), 0  ;;  %p51_p3 = por %p50_p2, %p49_p1 }
   0x7   : > { %s38_s21 = ssub.s32 %s1555_s18, %s1759_s20  ;;  %203 = sbr.rel (%p1240_p5) target bundleno = 22 (0x16), region = 24 }
   0x8   : > { %p40_p4 = scmp.eq.s32.totalorder %s38_s21, 0 }
   0xa   : > { %s1622_s23 = scalar_select %p40_p4, %s1547_s16, %s42_s22  }
   0xe   : > { %206 = sbr.rel (!%p51_p3) target bundleno = 22 (0x16), region = 28  ;;  %s208_s24 = sand.u32 (%p51_p3), 1, %s1547_s16  }
   0xf   : > { %s1327_s25 = sshll.u32 (%p51_p3), %s1555_s18, 5  ;;  %s1241_s26 = sshll.u32 (%p51_p3), %s208_s24, 6 }
  0x10   : > { %s216_s29 = scalar_lea.vmem (%p51_p3), %s1749_s0, %s1327_s25  ;;  %s210_s30 = scalar_lea.vmem (%p51_p3), [#allocation3], %s1241_s26 }
  0x11   : > { %v229_v0 = vld [vmem:[%s216_s29] sm:$0xff] (%p51_p3)  ;;  %v231_v1 = vld [vmem:[%s216_s29 + $0x8] sm:$0xff] (%p51_p3)  ;;  %v233_v2 = vld [vmem:[%s216_s29 + $0x10] sm:$0xff] (%p51_p3) }
  0x12   : > { %230 = vst [vmem:[%s210_s30] sm:$0xff] (%p51_p3), %v229_v0  ;;  %232 = vst [vmem:[%s210_s30 + $0x8] sm:$0xff] (%p51_p3), %v231_v1  ;;  %v235_v3 = vld [vmem:[%s216_s29 + $0x18] sm:$0xff] (%p51_p3)  ;;  %v237_v4 = vld [vmem:[%s216_s29 + $0x40] sm:$0xff] (%p51_p3) }
  0x13   : > { %234 = vst [vmem:[%s210_s30 + $0x10] sm:$0xff] (%p51_p3), %v233_v2  ;;  %v239_v5 = vld [vmem:[%s216_s29 + $0x48] sm:$0xff] (%p51_p3)  ;;  %236 = vst [vmem:[%s210_s30 + $0x18] sm:$0xff] (%p51_p3), %v235_v3  ;;  %v241_v6 = vld [vmem:[%s216_s29 + $0x50] sm:$0xff] (%p51_p3) }
  0x14   : > { %238 = vst [vmem:[%s210_s30 + $0x20] sm:$0xff] (%p51_p3), %v237_v4  ;;  %240 = vst [vmem:[%s210_s30 + $0x28] sm:$0xff] (%p51_p3), %v239_v5  ;;  %v243_v7 = vld [vmem:[%s216_s29 + $0x58] sm:$0xff] (%p51_p3) }
  0x15   : > { %242 = vst [vmem:[%s210_s30 + $0x30] sm:$0xff] %v241_v6  ;;  %244 = vst [vmem:[%s210_s30 + $0x38] sm:$0xff] %v243_v7 }
  0x16 PF: > { %p1244_p6 = scmp.ge.s32.totalorder %s1559_s19, 1  ;;  %p261_p7 = scmp.lt.s32.totalorder %s1559_s19, 3 }
  0x18   : > { %p262_p8 = pnand %p1244_p6, %p261_p7 }
  0x19   : > { %s268_s5 = sand.u32 (!%p262_p8), 1, %s1543_s15   ;;  %s1246_s6 = sshll.u32 (!%p262_p8), %s1551_s17, 7 }
  0x1a   : > { %265 = sbr.rel (%p262_p8) target bundleno = 342 (0x156), region = 55  ;;  %s1245_s7 = sshll.u32 (!%p262_p8), %s268_s5, 6 }
  0x1b   : > { %p318_p9 = scmp.lt.s32.totalorder (!%p262_p8), %s1246_s6, 255  ;;  %s1639_s12 = scalar_lea.vmem (!%p262_p8), [#allocation3], %s1245_s7 }
  0x1c   : > { %p1248_p10 = scmp.ne.s32.totalorder (!%p262_p8), %s1551_s17, 0 }
  0x21   : > { %s1761_s6 = smov (!%p318_p9, %s1246_s6), 255  ;;  %351 = sbr.rel (%p1248_p10) target bundleno = 40 (0x28), region = 63 }
  0x22   : > { %s1247_s8 = sshll.u32 %s1761_s6, 2  ;;  %vm352_vm0 = vcmask (!%p1248_p10), 261120   ;;  %v1561_v8 = vmov (!%p1248_p10), 0.0  }
  0x23   : > { %s1637_s11 = scalar_lea.vmem %s1750_s1, %s1247_s8  ;;  %353 = vst.msk [vmem:[#allocation2] sm:$0xff] (!%p1248_p10), %vm352_vm0, %v1561_v8  ;;  %354 = vst.msk [vmem:[#allocation2 + $0x8] sm:$0xff] (!%p1248_p10), %vm352_vm0, %v1561_v8 }
  0x28 PF: > { %v1457_v9 = vld [vmem:[%s1637_s11 + $0x40] sm:$0xff]   ;;  %v1461_v13 = vld [vmem:[%s1637_s11 + $0x48] sm:$0xff]   ;;  %v1465_v17 = vld [vmem:[%s1637_s11 + $0x50] sm:$0xff]   ;;  %vm1083_vm1 = vcmask 261120   ;;  %p1321_p11 = scmp.ne.s32.totalorder %s1551_s17, 1 }
  0x29   : > { %v1458_v10 = vld [vmem:[%s1637_s11 + $0xc0] sm:$0xff]   ;;  %1328 = vmatprep.subr.bf16.mxu0 %v1457_v9  ;;  %v1462_v14 = vld [vmem:[%s1637_s11 + $0xc8] sm:$0xff]   ;;  %v1466_v18 = vld [vmem:[%s1637_s11 + $0xd0] sm:$0xff]  }
  0x2a   : > { %v1459_v11 = vld [vmem:[%s1637_s11] sm:$0xff]   ;;  %1350 = vmatprep.subr.bf16.mxu1 %v1458_v10  ;;  %v1463_v15 = vld [vmem:[%s1637_s11 + $0x8] sm:$0xff]   ;;  %v1467_v19 = vld [vmem:[%s1637_s11 + $0x10] sm:$0xff]  }
  0x2b   : > { %v1460_v12 = vld [vmem:[%s1637_s11 + $0x80] sm:$0xff]   ;;  %1329 = vmatpush3.bf16.msra.mxu0 %v1459_v11  ;;  %v1464_v16 = vld [vmem:[%s1637_s11 + $0x88] sm:$0xff]   ;;  %v1468_v20 = vld [vmem:[%s1637_s11 + $0x90] sm:$0xff]  }
  0x2c   : > { %1351 = vmatpush3.bf16.msra.mxu1 %v1460_v12  ;;  %1330 = vmatprep.subr.bf16.mxu0 %v1461_v13  ;;  %v1469_v21 = vld [vmem:[%s1637_s11 + $0x58] sm:$0xff]   ;;  %v1473_v25 = vld [vmem:[%s1637_s11 + $0x60] sm:$0xff]   ;;  %v1477_v29 = vld [vmem:[%s1637_s11 + $0x68] sm:$0xff]  }
  0x2d   : > { %1352 = vmatprep.subr.bf16.mxu1 %v1462_v14  ;;  %v1470_v22 = vld [vmem:[%s1637_s11 + $0xd8] sm:$0xff]   ;;  %v1474_v26 = vld [vmem:[%s1637_s11 + $0xe0] sm:$0xff]   ;;  %v1478_v30 = vld [vmem:[%s1637_s11 + $0xe8] sm:$0xff]  }
  0x2e   : > { %v1471_v23 = vld [vmem:[%s1637_s11 + $0x18] sm:$0xff]   ;;  %v1475_v27 = vld [vmem:[%s1637_s11 + $0x20] sm:$0xff]   ;;  %v1479_v31 = vld [vmem:[%s1637_s11 + $0x28] sm:$0xff]  }
  0x2f   : > { %1331 = vmatpush3.bf16.msra.mxu0 %v1463_v15  ;;  %v1472_v24 = vld [vmem:[%s1637_s11 + $0x98] sm:$0xff]   ;;  %v1476_v28 = vld [vmem:[%s1637_s11 + $0xa0] sm:$0xff]   ;;  %v1480_v32 = vld [vmem:[%s1637_s11 + $0xa8] sm:$0xff]  }
  0x30   : > { %1353 = vmatpush3.bf16.msra.mxu1 %v1464_v16  ;;  %1332 = vmatprep.subr.bf16.mxu0 %v1465_v17  ;;  %v1481_v33 = vld [vmem:[%s1637_s11 + $0x70] sm:$0xff]   ;;  %v1485_v37 = vld [vmem:[%s1637_s11 + $0x78] sm:$0xff]   ;;  %v1489_v49 = vld [vmem:[%s1637_s11 + $0x140] sm:$0xff]  }
  0x31   : > { %1354 = vmatprep.subr.bf16.mxu1 %v1466_v18  ;;  %v1482_v34 = vld [vmem:[%s1637_s11 + $0xf0] sm:$0xff]   ;;  %v1486_v38 = vld [vmem:[%s1637_s11 + $0xf8] sm:$0xff]   ;;  %v1490_v50 = vld [vmem:[%s1637_s11 + $0x1c0] sm:$0xff]  }
  0x32   : > { %v1483_v35 = vld [vmem:[%s1637_s11 + $0x30] sm:$0xff]   ;;  %v1487_v39 = vld [vmem:[%s1637_s11 + $0x38] sm:$0xff]   ;;  %v1491_v51 = vld [vmem:[%s1637_s11 + $0x100] sm:$0xff]  }
  0x33   : > { %1333 = vmatpush3.bf16.msra.mxu0 %v1467_v19  ;;  %v1484_v36 = vld [vmem:[%s1637_s11 + $0xb0] sm:$0xff]   ;;  %v1488_v40 = vld [vmem:[%s1637_s11 + $0xb8] sm:$0xff]   ;;  %v1492_v52 = vld [vmem:[%s1637_s11 + $0x180] sm:$0xff]  }
  0x34   : > { %1355 = vmatpush3.bf16.msra.mxu1 %v1468_v20  ;;  %1334 = vmatprep.subr.bf16.mxu0 %v1469_v21  ;;  %v357_v41 = vld [vmem:[%s1639_s12] sm:$0xff]  ;;  %v358_v43 = vld [vmem:[%s1639_s12 + $0x8] sm:$0xff]  ;;  %v1493_v53 = vld [vmem:[%s1637_s11 + $0x148] sm:$0xff]  }
  0x35   : > { %1356 = vmatprep.subr.bf16.mxu1 %v1470_v22  ;;  %v361_v42 = vld [vmem:[%s1639_s12 + $0x20] sm:$0xff]  ;;  %v362_v46 = vld [vmem:[%s1639_s12 + $0x28] sm:$0xff]  ;;  %v1494_v54 = vld [vmem:[%s1637_s11 + $0x1c8] sm:$0xff]  }
  0x36   : > { %v1249_v44 = vcombine.low %v357_v41, %v361_v42  ;;  %v1250_v45 = vcombine.high %v357_v41, %v361_v42  ;;  %v1251_v47 = vcombine.low %v358_v43, %v362_v46  ;;  %v1252_v48 = vcombine.high %v358_v43, %v362_v46  ;;  %v1495_v55 = vld [vmem:[%s1637_s11 + $0x108] sm:$0xff]   ;;  %v1497_v57 = vld [vmem:[%s1637_s11 + $0x150] sm:$0xff]   ;;  %v1501_v61 = vld [vmem:[%s1637_s11 + $0x158] sm:$0xff]  }
  0x37   : > { %1335 = vmatpush3.bf16.msra.mxu0 %v1471_v23  ;;  %v1496_v56 = vld [vmem:[%s1637_s11 + $0x188] sm:$0xff]   ;;  %v1498_v58 = vld [vmem:[%s1637_s11 + $0x1d0] sm:$0xff]   ;;  %v1502_v62 = vld [vmem:[%s1637_s11 + $0x1d8] sm:$0xff]  }
  0x38   : > { %1357 = vmatpush3.bf16.msra.mxu1 %v1472_v24  ;;  %1336 = vmatprep.subr.bf16.mxu0 %v1473_v25  ;;  %v1499_v59 = vld [vmem:[%s1637_s11 + $0x110] sm:$0xff]   ;;  %v1503_v63 = vld [vmem:[%s1637_s11 + $0x118] sm:$0xff]   ;;  %v1505_v1 = vld [vmem:[%s1637_s11 + $0x160] sm:$0xff]  }
  0x39   : > { %1358 = vmatprep.subr.bf16.mxu1 %v1474_v26  ;;  %949 = vmatprep.mubr.bf16.mxu0 %v1250_v45  ;;  %v1500_v60 = vld [vmem:[%s1637_s11 + $0x190] sm:$0xff]   ;;  %v1504_v0 = vld [vmem:[%s1637_s11 + $0x198] sm:$0xff]   ;;  %v1506_v2 = vld [vmem:[%s1637_s11 + $0x1e0] sm:$0xff]  }
  0x3a   : > { %990 = vmatprep.mubr.bf16.mxu1 %v1252_v48  ;;  %v1507_v3 = vld [vmem:[%s1637_s11 + $0x120] sm:$0xff]   ;;  %v1509_v5 = vld [vmem:[%s1637_s11 + $0x168] sm:$0xff]   ;;  %v1513_v9 = vld [vmem:[%s1637_s11 + $0x170] sm:$0xff]  }
  0x3b   : > { %1337 = vmatpush3.bf16.msra.mxu0 %v1475_v27  ;;  %v1508_v4 = vld [vmem:[%s1637_s11 + $0x1a0] sm:$0xff]   ;;  %v1510_v6 = vld [vmem:[%s1637_s11 + $0x1e8] sm:$0xff]   ;;  %v1514_v10 = vld [vmem:[%s1637_s11 + $0x1f0] sm:$0xff]  }
  0x3c   : > { %1359 = vmatpush3.bf16.msra.mxu1 %v1476_v28  ;;  %1338 = vmatprep.subr.bf16.mxu0 %v1477_v29  ;;  %v1511_v7 = vld [vmem:[%s1637_s11 + $0x128] sm:$0xff]   ;;  %v1515_v11 = vld [vmem:[%s1637_s11 + $0x130] sm:$0xff]   ;;  %v1517_v13 = vld [vmem:[%s1637_s11 + $0x178] sm:$0xff]  }
  0x3d   : > { %1360 = vmatprep.subr.bf16.mxu1 %v1478_v30  ;;  %v1512_v8 = vld [vmem:[%s1637_s11 + $0x1a8] sm:$0xff]   ;;  %v1516_v12 = vld [vmem:[%s1637_s11 + $0x1b0] sm:$0xff]   ;;  %v1518_v14 = vld [vmem:[%s1637_s11 + $0x1f8] sm:$0xff]  }
  0x3e   : > { %v1519_v15 = vld [vmem:[%s1637_s11 + $0x138] sm:$0xff]   ;;  %v359_v17 = vld [vmem:[%s1639_s12 + $0x10] sm:$0xff]  ;;  %v360_v21 = vld [vmem:[%s1639_s12 + $0x18] sm:$0xff] }
  0x3f   : > { %1339 = vmatpush3.bf16.msra.mxu0 %v1479_v31  ;;  %v1520_v16 = vld [vmem:[%s1637_s11 + $0x1b8] sm:$0xff]   ;;  %v363_v18 = vld [vmem:[%s1639_s12 + $0x30] sm:$0xff]  ;;  %v364_v22 = vld [vmem:[%s1639_s12 + $0x38] sm:$0xff] }
  0x40   : > { %1361 = vmatpush3.bf16.msra.mxu1 %v1480_v32  ;;  %1340 = vmatprep.subr.bf16.mxu0 %v1481_v33  ;;  %v1253_v19 = vcombine.low %v359_v17, %v363_v18  ;;  %v1254_v20 = vcombine.high %v359_v17, %v363_v18  ;;  %v1255_v23 = vcombine.low %v360_v21, %v364_v22 }
  0x41   : > { %1362 = vmatprep.subr.bf16.mxu1 %v1482_v34  ;;  %v1256_v24 = vcombine.high %v360_v21, %v364_v22 }
  0x43   : > { %1341 = vmatpush3.bf16.msra.mxu0 %v1483_v35 }
  0x44   : > { %1363 = vmatpush3.bf16.msra.mxu1 %v1484_v36  ;;  %1342 = vmatprep.subr.bf16.mxu0 %v1485_v37 }
  0x45   : > { %1364 = vmatprep.subr.bf16.mxu1 %v1486_v38 }
  0x47   : > { %1343 = vmatpush3.bf16.msra.mxu0 %v1487_v39 }
  0x48   : > { %1365 = vmatpush3.bf16.msra.mxu1 %v1488_v40  ;;  %1372 = vmatprep.subr.bf16.mxu0 %v1489_v49 }
  0x49   : > { %1394 = vmatprep.subr.bf16.mxu1 %v1490_v50 }
  0x4a   : > { %950 = vmatmul.mubr.bf16.vlgmr.msra.gmra.mrb[0].mxu0 %v1249_v44 }
  0x4b   : > { %991 = vmatmul.mubr.bf16.vlgmr.msra.gmra.mrb[0].mxu1 %v1251_v47  ;;  %1373 = vmatpush3.bf16.msra.mxu0 %v1491_v51  ;;  %v355_v51 = vld [vmem:[#allocation2] sm:$0xff] }
  0x4c   : > { %1395 = vmatpush3.bf16.msra.mxu1 %v1492_v52  ;;  %1374 = vmatprep.subr.bf16.mxu0 %v1493_v53 }
  0x4d   : > { %1396 = vmatprep.subr.bf16.mxu1 %v1494_v54  ;;  %1031 = vmatprep.mubr.bf16.mxu0 %v1254_v20 }
  0x4e   : > { %1072 = vmatprep.mubr.bf16.mxu1 %v1256_v24 }
  0x4f   : > { %1375 = vmatpush3.bf16.msra.mxu0 %v1495_v55  ;;  %v356_v55 = vld [vmem:[#allocation2 + $0x8] sm:$0xff] }
  0x50   : > { %1397 = vmatpush3.bf16.msra.mxu1 %v1496_v56  ;;  %1376 = vmatprep.subr.bf16.mxu0 %v1497_v57 }
  0x51   : > { %1398 = vmatprep.subr.bf16.mxu1 %v1498_v58 }
  0x53   : > { %1377 = vmatpush3.bf16.msra.mxu0 %v1499_v59 }
  0x54   : > { %1399 = vmatpush3.bf16.msra.mxu1 %v1500_v60  ;;  %1378 = vmatprep.subr.bf16.mxu0 %v1501_v61  ;;  %v1322_v60 = vld [vmem:[%s1751_s2] ss:$0 sm:$0xff] (!%p1321_p11) }
  0x55   : > { %1400 = vmatprep.subr.bf16.mxu1 %v1502_v62  ;;  %v1101_v61 = vld [vmem:[%s1752_s3] sm:$0xff] (!%p1321_p11) }
  0x57   : > { %1379 = vmatpush3.bf16.msra.mxu0 %v1503_v63 }
  0x58   : > { %1401 = vmatpush3.bf16.msra.mxu1 %v1504_v0  ;;  %1380 = vmatprep.subr.bf16.mxu0 %v1505_v1  ;;  %v1102_v0 = vld [vmem:[%s1752_s3 + $0x8] sm:$0xff] (!%p1321_p11) }
  0x59   : > { %1402 = vmatprep.subr.bf16.mxu1 %v1506_v2 }
  0x5b   : > { %1381 = vmatpush3.bf16.msra.mxu0 %v1507_v3 }
  0x5c   : > { %1403 = vmatpush3.bf16.msra.mxu1 %v1508_v4  ;;  %1382 = vmatprep.subr.bf16.mxu0 %v1509_v5 }
  0x5d   : > { %1404 = vmatprep.subr.bf16.mxu1 %v1510_v6 }
  0x5f   : > { %1383 = vmatpush3.bf16.msra.mxu0 %v1511_v7 }
  0x60   : > { %1405 = vmatpush3.bf16.msra.mxu1 %v1512_v8  ;;  %1384 = vmatprep.subr.bf16.mxu0 %v1513_v9 }
  0x61   : > { %1406 = vmatprep.subr.bf16.mxu1 %v1514_v10 }
  0x63   : > { %1385 = vmatpush3.bf16.msra.mxu0 %v1515_v11 }
  0x64   : > { %1407 = vmatpush3.bf16.msra.mxu1 %v1516_v12  ;;  %1386 = vmatprep.subr.bf16.mxu0 %v1517_v13 }
  0x65   : > { %1408 = vmatprep.subr.bf16.mxu1 %v1518_v14 }
  0x67   : > { %1387 = vmatpush3.bf16.msra.mxu0 %v1519_v15 }
  0x68   : > { %1409 = vmatpush3.bf16.msra.mxu1 %v1520_v16 }
  0x6a   : > { %1032 = vmatmul.mubr.bf16.vlgmr.msra.gmra.mrb[4].mxu0 %v1253_v19 }
  0x6b   : > { %1073 = vmatmul.mubr.bf16.vlgmr.msra.gmra.mrb[4].mxu1 %v1255_v23 }
 0x11d   : > { %v1344_v25 = vpop.f32.mrb[0].mxu0 }
 0x11e   : > { %v1366_v26 = vpop.f32.mrb[0].mxu1  ;;  %v1345_v27 = vpop.f32.mrb[1].mxu0 }
 0x11f   : > { %v1346_v28 = vadd.f32 %v1345_v27, %v1344_v25  ;;  %v1367_v29 = vpop.f32.mrb[1].mxu1  ;;  %v1347_v30 = vpop.f32.mrb[2].mxu0 }
 0x120   : > { %v1368_v31 = vadd.f32 %v1367_v29, %v1366_v26  ;;  %v1369_v32 = vpop.f32.mrb[2].mxu1  ;;  %v1348_v33 = vpop.f32.mrb[3].mxu0 }
 0x121   : > { %v1349_v34 = vadd.f32 %v1348_v33, %v1347_v30  ;;  %v1370_v35 = vpop.f32.mrb[3].mxu1 }
 0x122   : > { %v993_v36 = vadd.f32 %v1368_v31, %v1346_v28  ;;  %v1371_v37 = vadd.f32 %v1370_v35, %v1369_v32 }
 0x124   : > { %v996_v38 = vadd.f32 %v1371_v37, %v1349_v34 }
 0x13d   : > { %v1388_v39 = vpop.f32.mrb[4].mxu0 }
 0x13e   : > { %v1410_v40 = vpop.f32.mrb[4].mxu1  ;;  %v1389_v41 = vpop.f32.mrb[5].mxu0 }
 0x13f   : > { %v1390_v42 = vadd.f32 %v1389_v41, %v1388_v39  ;;  %v1411_v43 = vpop.f32.mrb[5].mxu1  ;;  %v1391_v44 = vpop.f32.mrb[6].mxu0 }
 0x140   : > { %v1412_v45 = vadd.f32 %v1411_v43, %v1410_v40  ;;  %v1413_v46 = vpop.f32.mrb[6].mxu1  ;;  %v1392_v47 = vpop.f32.mrb[7].mxu0 }
 0x141   : > { %v1034_v48 = vadd.f32 %v1390_v42, %v993_v36  ;;  %v1393_v49 = vadd.f32 %v1392_v47, %v1391_v44  ;;  %v1414_v50 = vpop.f32.mrb[7].mxu1 }
 0x142   : > { %v1415_v52 = vadd.f32 %v1414_v50, %v1413_v46 }
 0x143   : > { %v1075_v53 = vadd.f32 %v1412_v45, %v1034_v48  ;;  %v1037_v54 = vadd.f32 %v1393_v49, %v996_v38  ;;  %1089 = sbr.rel (%p1321_p11) target bundleno = 342 (0x156), region = 67 }
 0x145   : > { %v1081_v56 = vadd.f32 %v1075_v53, %v355_v51  ;;  %v1078_v57 = vadd.f32 %v1415_v52, %v1037_v54 }
 0x147   : > { %1084 = vst.msk [vmem:[#allocation2] sm:$0xff] %vm1083_vm1, %v1081_v56  ;;  %v1082_v58 = vadd.f32 %v1078_v57, %v356_v55 }
 0x149   : > { %1085 = vst.msk [vmem:[#allocation2 + $0x8] sm:$0xff] %vm1083_vm1, %v1082_v58 }
 0x14e   : > { %v1090_v59 = vld [vmem:[#allocation2] sm:$0xff] }
 0x14f   : > { %v1099_v62 = vadd.f32 %v1322_v60, %v1090_v59 }
 0x150   : > { %v1091_v63 = vld [vmem:[#allocation2 + $0x8] sm:$0xff] }
 0x151   : > { %v1100_v1 = vadd.f32 %v1322_v60, %v1091_v63  ;;  %v1103_v2 = vadd.f32 %v1101_v61, %v1099_v62 }
 0x153   : > { %v1104_v3 = vadd.f32 %v1102_v0, %v1100_v1  ;;  %1105 = vst.msk [vmem:[%s1753_s4] sm:$0xff] %vm1083_vm1, %v1103_v2 }
 0x155   : > { %1106 = vst.msk [vmem:[%s1753_s4 + $0x8] sm:$0xff] %vm1083_vm1, %v1104_v3 }
 0x156 PF: > { %s14_s19 = sadd.s32 1, %s1559_s19   ;;  %s1754_s15 = smov %s1547_s16 }
 0x157   : > { %p11_p12 = scmp.ge.s32.totalorder %s14_s19, 4   ;;  %s1755_s16 = smov %s1622_s23 }
 0x158   : > { %s1756_s17 = smov %s1555_s18  ;;  %s1757_s18 = smov %s1759_s20 }
 0x159   :  { %13 = sbr.rel (!%p11_p12) target bundleno = 3 (0x3), region = 111 }

// kernel: transformer_forward.46
= control target key start
LH: loop header
LB: loop body
LE: loop exit
PB: predicated region body
PF: predicated region fallthrough
CT: control target
= control target key end

     0   :  { %vm19_vm0 = vcmask 523264   ;;  %v151_v0 = vmov 0.0   ;;  %vm152_vm1 = vmmov 0   ;;  %vm47_vm2 = vcmask 261120   ;;  %s195_s1 = inlined_call_operand.vmem [shape: bf16[32,64], index: 1, kind: input, shape index: {}]   ;;  %s196_s0 = inlined_call_operand.vmem [shape: bf16[16,32], index: 0, kind: input, shape index: {}]   ;;  %s197_s2 = inlined_call_operand.vmem [shape: f32[1,64], index: 2, kind: input, shape index: {}]   ;;  %s198_s3 = inlined_call_operand.vmem [shape: bf16[16,64], index: 3, kind: output, shape index: {}]  }
   0x1   :  { %138 = vmatprep.subr.bf16.mxu0 %v151_v0  ;;  %v148_v1 = vld [vmem:[%s195_s1] sm:$0xff]   ;;  %142 = vmatprep.mubr.msk.bf16.mxu0 %vm152_vm1, %v151_v0  ;;  %20 = vst.msk [vmem:[#allocation2] sm:$0xff] %vm19_vm0, %v151_v0  ;;  %21 = vst.msk [vmem:[#allocation2 + $0x8] sm:$0xff] %vm19_vm0, %v151_v0  ;;  %v149_v2 = vld [vmem:[%s195_s1 + $0x8] sm:$0xff]   ;;  %vm119_vm3 = vcmask 519168  }
   0x2   :  { %139 = vmatpush3.bf16.msra.mxu0 %v148_v1  ;;  %v150_v3 = vld [vmem:[%s196_s0] sm:$0xff]  }
   0x3   :  { %140 = vmatprep.subr.bf16.mxu0 %v151_v0  ;;  %v130_v12 = vld [vmem:[%s197_s2] ss:$0 sm:$0xff] }
   0x6   :  { %141 = vmatpush3.bf16.msra.mxu0 %v149_v2 }
   0x8   :  { %v22_v4 = vld [vmem:[#allocation2] sm:$0xff]  ;;  %v23_v6 = vld [vmem:[#allocation2 + $0x8] sm:$0xff] }
   0x9   :  { %143 = vmatmul.mubr.msk.bf16.vlgmr.msra.gmra.mrb[0].mxu0 %vm47_vm2, %v150_v3 }
  0xdc   :  { %v85_v5 = vpop.f32.mrb[0].mxu0 }
  0xdd   :  { %v92_v7 = vadd.f32 %v85_v5, %v22_v4  ;;  %v144_v8 = vpop.f32.mrb[1].mxu0 }
  0xde   :  { %v88_v9 = vpop.f32.mrb[2].mxu0 }
  0xdf   :  { %95 = vst.msk [vmem:[#allocation2] sm:$0xff] %vm19_vm0, %v92_v7  ;;  %v93_v10 = vadd.f32 %v88_v9, %v23_v6  ;;  %v145_v11 = vpop.f32.mrb[3].mxu0 }
  0xe1   :  { %96 = vst.msk [vmem:[#allocation2 + $0x8] sm:$0xff] %vm19_vm0, %v93_v10 }
  0xe6   :  { %v100_v13 = vld [vmem:[#allocation2] sm:$0xff] }
  0xe7   :  { %v109_v14 = vadd.f32 %v130_v12, %v100_v13 }
  0xe8   :  { %v101_v15 = vld [vmem:[#allocation2 + $0x8] sm:$0xff] }
  0xe9   :  { %v133_v16 = vpack.c.bf16 %v109_v14, %v109_v14  ;;  %v110_v17 = vadd.f32 %v130_v12, %v101_v15 }
  0xeb   :  { %120 = vst.msk [vmem:[%s198_s3] sm:$0xf] %vm119_vm3, %v133_v16  ;;  %v134_v18 = vpack.c.bf16 %v110_v17, %v110_v17 }
  0xed   :  { %121 = vst.msk [vmem:[%s198_s3 + $0x4] sm:$0xf] %vm119_vm3, %v134_v18 }

// kernel: transformer_forward.61
= control target key start
LH: loop header
LB: loop body
LE: loop exit
PB: predicated region body
PF: predicated region fallthrough
CT: control target
= control target key end

     0   :  { %v158_v1 = vmov 0   ;;  %vm58_vm0 = vcmask 261120   ;;  %v122_v6 = vlaneseq  ;;  %s209_s1 = inlined_call_operand.vmem [shape: bf16[32,256], index: 1, kind: input, shape index: {}]   ;;  %s210_s0 = inlined_call_operand.vmem [shape: bf16[16,32], index: 0, kind: input, shape index: {}]   ;;  %s211_s2 = inlined_call_operand.vmem [shape: f32[1,256], index: 2, kind: input, shape index: {}]   ;;  %s212_s3 = inlined_call_operand.vmem [shape: f32[16,256], index: 3, kind: output, shape index: {}]  }
   0x1   :  { %v151_v0 = vld [vmem:[%s209_s1 + $0x4] ss:$8 sps:$4 sm:$0xff]   ;;  %94 = vmatprep.mubr.bf16.mxu0 %v158_v1  ;;  %v153_v2 = vld [vmem:[%s209_s1] ss:$8 sps:$4 sm:$0xff]   ;;  %v154_v3 = vld [vmem:[%s209_s1 + $0x14] ss:$8 sps:$4 sm:$0xff]  }
   0x2   :  { %62 = vmatprep.subr.bf16.mxu0 %v151_v0  ;;  %v156_v4 = vld [vmem:[%s209_s1 + $0x10] ss:$8 sps:$4 sm:$0xff]   ;;  %v157_v5 = vld [vmem:[%s210_s0] sm:$0xff]   ;;  %v123_v7 = vshrl.u32 %v122_v6, 7 }
   0x3   :  { %63 = vmatpush1.bf16.msra.mxu0 %v153_v2  ;;  %v120_v9 = vld [vmem:[%s211_s2] sm:$0x3] }
   0x4   :  { %64 = vmatprep.subr.bf16.mxu0 %v154_v3  ;;  %v124_v8 = vsub.s32 0, %v123_v7  ;;  %v128_v10 = vsub.s32 1, %v123_v7 }
   0x6   :  { %v125_v11 = vrot.slane %v120_v9, %v124_v8  ;;  %v129_v12 = vrot.slane %v120_v9, %v128_v10 }
   0x7   :  { %65 = vmatpush1.bf16.msra.mxu0 %v156_v4 }
   0xa   :  { %149 = vmatmul.mubr.msk.bf16.vlgmr.msra.gmra.mrb[0].mxu0 %vm58_vm0, %v157_v5 }
  0xdd   :  { %v96_v13 = vpop.f32.mrb[0].mxu0 }
  0xde   :  { %v132_v14 = vadd.f32 %v125_v11, %v96_v13  ;;  %v98_v15 = vpop.f32.mrb[1].mxu0 }
  0xdf   :  { %v133_v16 = vadd.f32 %v129_v12, %v98_v15  ;;  %v100_v17 = vpop.f32.mrb[2].mxu0 }
  0xe0   :  { %136 = vst [vmem:[%s212_s3] sm:$0xff] %v132_v14  ;;  %v134_v18 = vadd.f32 %v125_v11, %v100_v17  ;;  %v102_v19 = vpop.f32.mrb[3].mxu0 }
  0xe1   :  { %137 = vst [vmem:[%s212_s3 + $0x8] sm:$0xff] %v133_v16  ;;  %v135_v20 = vadd.f32 %v129_v12, %v102_v19 }
  0xe2   :  { %138 = vst [vmem:[%s212_s3 + $0x10] sm:$0xff] %v134_v18 }
  0xe3   :  { %139 = vst [vmem:[%s212_s3 + $0x18] sm:$0xff] %v135_v20 }

</bundles_post_ra>
